<compile_context>
chip_gen: v7x
topology: tpu7x:2x2x1
jax: 0.10.0
libtpu: 0.0.40
codegen_flags: <defaults>
</compile_context>

<pallas_src>
import functools

import jax
import jax.numpy as jnp
from jax import lax
from jax.experimental import pallas as pl
from jax.experimental.pallas import tpu as pltpu

SLOPE = 0.1        # LeakyReLU negative slope
PATCH = 4          # patch size of the stand-in "DINO" featurizer

CFG = dict(
    pretrained=None,
    hidden_dim=32,
    k_means=dict(init="k-means++", n_cluster=4, n_pos=2),   # unused (stage-0 path)
    enc_num_blocks=2,
    dec_num_blocks=2,
    vq=dict(num_codebooks=[12, 10], embed_dims=[16, 16], beta=0.25,
            normalize="none", vq_type="param", agg_type="concat"),
    last_norm=False,
)
FEAT_DIM = 48      # stand-in extractor output dim (= C * PATCH * PATCH here)


# --------------------------------------------------------------------------
# Fused forward kernel
# --------------------------------------------------------------------------
def _fused_kernel(*refs, num_vq, enc_skips, dec_skips, hidden):
    """One grid step processes one TILE_M-row tile of the ORIGINAL half paired
    with the corresponding tile of the AUGMENTED half."""
    packed_ref, loss_ref = refs[-2], refs[-1]
    p_ori_ref, p_aug_ref = refs[0], refs[1]
    wit = iter(refs[2:-2])

    def nxt():
        return next(wit)[...]

    # ---- unpack resident weights (order must match _flatten_weights) ----
    patch_w, patch_b = nxt(), nxt()
    enc_blocks = []
    for sk in enc_skips:
        enc_blocks.append([nxt(), nxt(), nxt(), nxt()] + ([nxt(), nxt()] if sk else []))
    vq_in = [(nxt(), nxt()) for _ in range(num_vq)]
    codebooks = [nxt() for _ in range(num_vq)]
    vq_out = [(nxt(), nxt(), nxt()) for _ in range(num_vq - 1)]
    agg_ws = [nxt() for _ in range(num_vq)]      # widened: (embed_i, pack_w)
    agg_b = nxt()                                # (1, pack_w)
    dec_blocks = []
    for sk in dec_skips:
        dec_blocks.append([nxt(), nxt(), nxt(), nxt()] + ([nxt(), nxt()] if sk else []))

    # ---- helpers ----
    def leaky(x):
        return jnp.where(x >= 0, x, SLOPE * x)

    def linear(x, w, b):
        return jnp.dot(x, w, preferred_element_type=jnp.float32) + b

    def resblock(x, blk, skip):
        h = leaky(linear(x, blk[0], blk[1]))
        y = linear(h, blk[2], blk[3])
        s = linear(x, blk[4], blk[5]) if skip else x
        return y + s

    def vq_assign(z, e):
        # squared distance up to a per-row constant: the |z|^2 term is dropped,
        # which is value-preserving for both softmax(-d) and the argmin.
        e2 = jnp.sum(e * e, axis=1, keepdims=True).T                      # (1, K)
        ze = lax.dot_general(z, e, (((1,), (1,)), ((), ())),
                             preferred_element_type=jnp.float32)          # (T, K)
        d = e2 - 2.0 * ze
        neg = -d
        mx = jnp.max(neg, axis=1, keepdims=True)
        ex = jnp.exp(neg - mx)
        prob = ex / jnp.sum(ex, axis=1, keepdims=True)
        k = d.shape[1]
        iota = lax.broadcasted_iota(jnp.int32, d.shape, 1)
        min_d = jnp.min(d, axis=1, keepdims=True)
        first = jnp.min(jnp.where(d == min_d, iota, k), axis=1, keepdims=True)
        one_hot = (iota == first).astype(jnp.float32)
        zq = jnp.dot(one_hot, e, preferred_element_type=jnp.float32)
        return zq, prob

    def sq_sum(x):
        return jnp.sum(jnp.sum(x * x, axis=1, keepdims=True), axis=0, keepdims=True)

    def jsd_sum(p, q):
        m = 0.5 * (p + q)
        log_m = jnp.log(jnp.maximum(m, 1e-12))

        def kl(t):
            log_t = jnp.log(jnp.maximum(t, 1e-12))
            per = jnp.where(t > 0, t * (log_t - log_m), 0.0)
            return jnp.sum(jnp.sum(per, axis=1, keepdims=True), axis=0, keepdims=True)

        return 0.5 * (kl(p) + kl(q))

    def chain(tokens):
        dino = linear(tokens, patch_w, patch_b)          # stand-in DINO features
        f = dino
        for blk, sk in zip(enc_blocks, enc_skips):       # enc_proj
            f = resblock(f, blk, sk)
        zqs, probs, vq_sq = [], [], []
        for i in range(num_vq):
            w, b = vq_in[i]
            feat_i = linear(leaky(f), w, b)              # vq_input_proj[i]
            zq, prob = vq_assign(feat_i, codebooks[i])
            zqs.append(zq)
            probs.append(prob)
            vq_sq.append(sq_sum(zq - feat_i))            # VQ + commitment MSE partial
            if i < num_vq - 1:
                # concat([feat, z_q]) @ W == feat @ W[:hidden] + z_q @ W[hidden:]
                wf, wz, bo = vq_out[i]
                f = (jnp.dot(f, wf, preferred_element_type=jnp.float32)
                     + jnp.dot(zq, wz, preferred_element_type=jnp.float32) + bo)
        # aggregate projection; the widened weights also place each z_q into its
        # own lane band of the 128-wide packed slab (identity columns), so the
        # lane-dense packing costs zero extra ops.
        packed = jnp.dot(zqs[0], agg_ws[0], preferred_element_type=jnp.float32)
        for i in range(1, num_vq):
            packed = packed + jnp.dot(zqs[i], agg_ws[i],
                                      preferred_element_type=jnp.float32)
        packed = packed + agg_b
        feat_agg = packed[:, :hidden]                    # decoder input
        r = feat_agg
        for blk, sk in zip(dec_blocks, dec_skips):       # dec_proj
            r = resblock(r, blk, sk)
        rec = sq_sum(r - dino)                           # recon MSE partial
        return packed, probs, vq_sq, rec

    packed_o, probs_o, sq_o, rec_o = chain(p_ori_ref[...])
    _, probs_a, sq_a, rec_a = chain(p_aug_ref[...])

    # ---- lane-dense packed writeback (original half only) ----
    packed_ref[...] = packed_o

    # ---- per-tile loss partial sums -> one (8, 128) block per grid step ----
    scalars = [sq_o[i] + sq_a[i] for i in range(num_vq)]      # VQ squared-error sums
    scalars.append(rec_o + rec_a)                             # recon squared-error sum
    scalars.append(jsd_sum(probs_o[0], probs_a[0]))           # contra-pos JSD sum
    scalars.append(jsd_sum(probs_o[-1], probs_a[-1]))         # contra-neg JSD sum

    lane = lax.broadcasted_iota(jnp.int32, (8, 128), 1)
    row = lax.broadcasted_iota(jnp.int32, (8, 128), 0)
    acc = jnp.zeros((8, 128), jnp.float32)
    for idx, s in enumerate(scalars):
        acc = acc + jnp.where((row == 0) & (lane == idx), s, 0.0)
    loss_ref[...] = acc


# --------------------------------------------------------------------------
# Host-side weight flattening / preprocessing (kernel unpack order)
# --------------------------------------------------------------------------
def _flatten_weights(params, cfg, pack_w):
    hidden = cfg["hidden_dim"]
    embed_dims = cfg["vq"]["embed_dims"]
    num_vq = len(embed_dims)

    arrs = [params["patch_w"], params["patch_b"].reshape(1, -1)]

    enc_skips = []
    for blk in params["enc"]:
        skip = blk["w1"].shape[0] != blk["w2"].shape[1]
        enc_skips.append(skip)
        arrs += [blk["w1"], blk["b1"].reshape(1, -1), blk["w2"], blk["b2"].reshape(1, -1)]
        if skip:
            arrs += [blk["ws"], blk["bs"].reshape(1, -1)]

    for i in range(num_vq):
        arrs += [params["vq_in"][i]["w"], params["vq_in"][i]["b"].reshape(1, -1)]

    for i in range(num_vq):
        arrs.append(params["codebooks"][i])

    # vq_output_proj: split the (hidden+embed, hidden) weight to avoid concat
    for i in range(num_vq - 1):
        w = params["vq_out"][i]["w"]
        arrs += [w[:hidden], w[hidden:], params["vq_out"][i]["b"].reshape(1, -1)]

    # aggregate projection, widened with identity placement columns so that the
    # packed [feat | z_q0 | z_q1 | 0] slab falls out of the same matmul.
    agg_w = params["agg_w"]                                   # (sum(embed), hidden)
    row_off, col_off = 0, hidden
    for i in range(num_vq):
        e_i = embed_dims[i]
        w_i = agg_w[row_off:row_off + e_i]                    # (e_i, hidden)
        place = jnp.zeros((e_i, pack_w - hidden), jnp.float32)
        place = place.at[:, col_off - hidden:col_off - hidden + e_i].set(
            jnp.eye(e_i, dtype=jnp.float32))
        arrs.append(jnp.concatenate([w_i, place], axis=1))    # (e_i, pack_w)
        row_off += e_i
        col_off += e_i
    agg_b = jnp.zeros((1, pack_w), jnp.float32).at[0, :hidden].set(params["agg_b"])
    arrs.append(agg_b)

    dec_skips = []
    for blk in params["dec"]:
        skip = blk["w1"].shape[0] != blk["w2"].shape[1]
        dec_skips.append(skip)
        arrs += [blk["w1"], blk["b1"].reshape(1, -1), blk["w2"], blk["b2"].reshape(1, -1)]
        if skip:
            arrs += [blk["ws"], blk["bs"].reshape(1, -1)]

    return arrs, tuple(enc_skips), tuple(dec_skips)


# --------------------------------------------------------------------------
# Deterministic parameter init
# --------------------------------------------------------------------------
def _init_linear(key, din, dout):
    kw, kb = jax.random.split(key)
    bound = 1.0 / (din ** 0.5)
    w = jax.random.uniform(kw, (din, dout), jnp.float32, -bound, bound)
    b = jax.random.uniform(kb, (dout,), jnp.float32, -bound, bound)
    return w, b


def _init_resblock(key, din, dout):
    k1, k2, k3 = jax.random.split(key, 3)
    w1, b1 = _init_linear(k1, din, dout)
    w2, b2 = _init_linear(k2, dout, dout)
    ws, bs = _init_linear(k3, din, dout)
    return dict(w1=w1, b1=b1, w2=w2, b2=b2, ws=ws, bs=bs)


def init_params(key, cfg):
    hidden = cfg["hidden_dim"]
    embed_dims = cfg["vq"]["embed_dims"]
    num_cb = cfg["vq"]["num_codebooks"]
    num_vq = len(num_cb)
    keys = iter(jax.random.split(key, 64))

    params = {}
    params["patch_w"], params["patch_b"] = _init_linear(next(keys), 3 * PATCH * PATCH, FEAT_DIM)
    params["enc"] = [
        _init_resblock(next(keys), FEAT_DIM if i == 0 else hidden, hidden)
        for i in range(cfg["enc_num_blocks"])
    ]
    params["vq_in"] = []
    for i in range(num_vq):
        w, b = _init_linear(next(keys), hidden, embed_dims[i])
        params["vq_in"].append(dict(w=w, b=b))
    params["codebooks"] = [
        jax.random.uniform(next(keys), (num_cb[i], embed_dims[i]), jnp.float32,
                           -1.0 / num_cb[i], 1.0 / num_cb[i])
        for i in range(num_vq)
    ]
    params["vq_out"] = []
    for i in range(num_vq - 1):
        w, b = _init_linear(next(keys), hidden + embed_dims[i], hidden)
        params["vq_out"].append(dict(w=w, b=b))
    params["agg_w"], params["agg_b"] = _init_linear(next(keys), sum(embed_dims), hidden)
    n_dec = cfg["dec_num_blocks"]
    params["dec"] = [
        _init_resblock(next(keys), hidden, FEAT_DIM if i == n_dec - 1 else hidden)
        for i in range(n_dec)
    ]
    return params


# --------------------------------------------------------------------------
# Forward (stage = 0 path of DINOContra.forward)
# --------------------------------------------------------------------------
def _pick_tile(m):
    # largest token tile (multiple of 8 for sublane tiling) dividing the half count
    for t in (512, 256, 128, 64, 32, 16, 8):
        if m % t == 0:
            return t
    raise ValueError(f"half token count {m} must be a multiple of 8")


def _resident_spec(shape):
    n = len(shape)
    return pl.BlockSpec(shape, lambda i, _n=n: (0,) * _n)


def forward(params, cfg, img, rng):
    beta = cfg["vq"]["beta"]
    embed_dims = cfg["vq"]["embed_dims"]
    num_vq = len(embed_dims)
    hidden = cfg["hidden_dim"]
    feat_dim = params["patch_w"].shape[1]

    # _photo_aug: per-sample per-channel random scale/offset (deterministic JAX PRNG)
    # TODO(synk): the random GaussianBlur branch of _photo_aug is omitted.
    B = img.shape[0]
    k1, k2 = jax.random.split(rng)
    scale = jax.random.uniform(k1, (B, 3, 1, 1), jnp.float32, 0.9, 1.1)
    offset = jax.random.uniform(k2, (B, 3, 1, 1), jnp.float32, -0.1, 0.1)
    img_aug = img * scale + offset
    x = jnp.concatenate([img, img_aug], axis=0)          # (2B, 3, H, W), NCHW

    # extractor stand-in: patchify (glue) + in-kernel linear projection
    B2, C, H, W = x.shape
    h, w = H // PATCH, W // PATCH
    patches = (x.reshape(B2, C, h, PATCH, w, PATCH)
                .transpose(0, 2, 4, 1, 3, 5)
                .reshape(B2 * h * w, C * PATCH * PATCH)).astype(jnp.float32)

    M = B * h * w                      # tokens in the original half
    feat_in = C * PATCH * PATCH
    tile_m = _pick_tile(M)
    num_tiles = M // tile_m

    used = hidden + sum(embed_dims)
    pack_w = max(128, ((used + 127) // 128) * 128)       # lane-dense packed width

    weights, enc_skips, dec_skips = _flatten_weights(params, cfg, pack_w)

    kernel = functools.partial(
        _fused_kernel, num_vq=num_vq, enc_skips=enc_skips,
        dec_skips=dec_skips, hidden=hidden)

    in_specs = (
        [  # paired token tiles: original half (block i) / augmented half (block i+num_tiles)
            pl.BlockSpec((tile_m, feat_in), lambda i: (i, 0)),
            pl.BlockSpec((tile_m, feat_in), lambda i, _n=num_tiles: (i + _n, 0)),
        ]
        + [_resident_spec(a.shape) for a in weights]     # weights stay resident in VMEM
    )
    out_specs = [
        pl.BlockSpec((tile_m, pack_w), lambda i: (i, 0)),
        pl.BlockSpec((8, 128), lambda i: (i, 0)),
    ]
    out_shape = [
        jax.ShapeDtypeStruct((M, pack_w), jnp.float32),
        jax.ShapeDtypeStruct((num_tiles * 8, 128), jnp.float32),
    ]

    packed, partials = pl.pallas_call(
        kernel,
        grid=(num_tiles,),
        in_specs=in_specs,
        out_specs=out_specs,
        out_shape=out_shape,
        compiler_params=pltpu.CompilerParams(dimension_semantics=("parallel",)),
    )(patches, patches, *weights)

    # finalize losses from per-tile partial sums (tiny reductions, plain XLA)
    sums = jnp.sum(partials, axis=0)                     # (128,)
    n_total = 2 * M
    output = {}
    for i in range(num_vq):
        mse_i = sums[i] / float(n_total * embed_dims[i])
        # codebook loss + beta * commitment loss (equal values in the forward pass)
        output[f"vq{i}-loss"] = (1.0 + beta) * mse_i
    output["recon-loss"] = sums[num_vq] / float(n_total * feat_dim)
    output["contra-loss-pos"] = sums[num_vq + 1] / float(M)
    output["contra-loss-neg"] = sums[num_vq + 2] / float(M)

    # unpack the lane-dense slab: [ feat(hidden) | z_q0 | z_q1 | zero-pad ]
    feat = packed[:, :hidden]
    feat_vqs = []
    off = hidden
    for i in range(num_vq):
        feat_vqs.append(packed[:, off:off + embed_dims[i]])
        off += embed_dims[i]
    return feat, feat_vqs, output


# --------------------------------------------------------------------------
if __name__ == "__main__":
    key = jax.random.PRNGKey(0)
    k_img, k_aug = jax.random.split(key)
    img = jax.random.normal(k_img, (2, 3, 16, 16), jnp.float32)

    params = init_params(jax.random.PRNGKey(42), CFG)

    fwd = jax.jit(functools.partial(forward, params, CFG))
    feat, feat_vqs, output = fwd(img, k_aug)
    jax.block_until_ready(feat)
    jax.block_until_ready(output)

    # sanity checks
    n_tokens_half = img.shape[0] * (16 // PATCH) * (16 // PATCH)   # original half only
    assert feat.shape == (n_tokens_half, CFG["hidden_dim"])
    assert feat_vqs[0].shape == (n_tokens_half, CFG["vq"]["embed_dims"][0])
    for k, v in output.items():
        assert bool(jnp.isfinite(v)), f"non-finite output {k}"
    assert bool(jnp.all(jnp.isfinite(feat)))

    print("KERNEL_OK")
</pallas_src>

<mosaic_0001>
module attributes {stable_mosaic.version = 11 : i64} {
  func.func @_fused_kernel(%arg0: i32, %arg1: memref<32x48xf32, #tpu.memory_space<vmem>>, %arg2: memref<32x48xf32, #tpu.memory_space<vmem>>, %arg3: memref<48x48xf32, #tpu.memory_space<vmem>>, %arg4: memref<1x48xf32, #tpu.memory_space<vmem>>, %arg5: memref<48x32xf32, #tpu.memory_space<vmem>>, %arg6: memref<1x32xf32, #tpu.memory_space<vmem>>, %arg7: memref<32x32xf32, #tpu.memory_space<vmem>>, %arg8: memref<1x32xf32, #tpu.memory_space<vmem>>, %arg9: memref<48x32xf32, #tpu.memory_space<vmem>>, %arg10: memref<1x32xf32, #tpu.memory_space<vmem>>, %arg11: memref<32x32xf32, #tpu.memory_space<vmem>>, %arg12: memref<1x32xf32, #tpu.memory_space<vmem>>, %arg13: memref<32x32xf32, #tpu.memory_space<vmem>>, %arg14: memref<1x32xf32, #tpu.memory_space<vmem>>, %arg15: memref<32x16xf32, #tpu.memory_space<vmem>>, %arg16: memref<1x16xf32, #tpu.memory_space<vmem>>, %arg17: memref<32x16xf32, #tpu.memory_space<vmem>>, %arg18: memref<1x16xf32, #tpu.memory_space<vmem>>, %arg19: memref<12x16xf32, #tpu.memory_space<vmem>>, %arg20: memref<10x16xf32, #tpu.memory_space<vmem>>, %arg21: memref<32x32xf32, #tpu.memory_space<vmem>>, %arg22: memref<16x32xf32, #tpu.memory_space<vmem>>, %arg23: memref<1x32xf32, #tpu.memory_space<vmem>>, %arg24: memref<16x128xf32, #tpu.memory_space<vmem>>, %arg25: memref<16x128xf32, #tpu.memory_space<vmem>>, %arg26: memref<1x128xf32, #tpu.memory_space<vmem>>, %arg27: memref<32x32xf32, #tpu.memory_space<vmem>>, %arg28: memref<1x32xf32, #tpu.memory_space<vmem>>, %arg29: memref<32x32xf32, #tpu.memory_space<vmem>>, %arg30: memref<1x32xf32, #tpu.memory_space<vmem>>, %arg31: memref<32x48xf32, #tpu.memory_space<vmem>>, %arg32: memref<1x48xf32, #tpu.memory_space<vmem>>, %arg33: memref<48x48xf32, #tpu.memory_space<vmem>>, %arg34: memref<1x48xf32, #tpu.memory_space<vmem>>, %arg35: memref<32x48xf32, #tpu.memory_space<vmem>>, %arg36: memref<1x48xf32, #tpu.memory_space<vmem>>, %arg37: memref<32x128xf32, #tpu.memory_space<vmem>>, %arg38: memref<8x128xf32, #tpu.memory_space<vmem>>) attributes {dimension_semantics = [#tpu.dimension_semantics<parallel>], iteration_bounds = array<i64: 1>, scalar_prefetch = 0 : i64, scratch_operands = 0 : i64, tpu.core_type = #tpu.core_type<tc>, window_params = [{transform_indices = @transform_0, window_bounds = array<i64: 32, 48>}, {transform_indices = @transform_1, window_bounds = array<i64: 32, 48>}, {pipeline_mode = #tpu.pipeline_mode<synchronous>, transform_indices = @transform_2, window_bounds = array<i64: 48, 48>}, {pipeline_mode = #tpu.pipeline_mode<synchronous>, transform_indices = @transform_3, window_bounds = array<i64: 1, 48>}, {pipeline_mode = #tpu.pipeline_mode<synchronous>, transform_indices = @transform_4, window_bounds = array<i64: 48, 32>}, {pipeline_mode = #tpu.pipeline_mode<synchronous>, transform_indices = @transform_5, window_bounds = array<i64: 1, 32>}, {pipeline_mode = #tpu.pipeline_mode<synchronous>, transform_indices = @transform_6, window_bounds = array<i64: 32, 32>}, {pipeline_mode = #tpu.pipeline_mode<synchronous>, transform_indices = @transform_7, window_bounds = array<i64: 1, 32>}, {pipeline_mode = #tpu.pipeline_mode<synchronous>, transform_indices = @transform_8, window_bounds = array<i64: 48, 32>}, {pipeline_mode = #tpu.pipeline_mode<synchronous>, transform_indices = @transform_9, window_bounds = array<i64: 1, 32>}, {pipeline_mode = #tpu.pipeline_mode<synchronous>, transform_indices = @transform_10, window_bounds = array<i64: 32, 32>}, {pipeline_mode = #tpu.pipeline_mode<synchronous>, transform_indices = @transform_11, window_bounds = array<i64: 1, 32>}, {pipeline_mode = #tpu.pipeline_mode<synchronous>, transform_indices = @transform_12, window_bounds = array<i64: 32, 32>}, {pipeline_mode = #tpu.pipeline_mode<synchronous>, transform_indices = @transform_13, window_bounds = array<i64: 1, 32>}, {pipeline_mode = #tpu.pipeline_mode<synchronous>, transform_indices = @transform_14, window_bounds = array<i64: 32, 16>}, {pipeline_mode = #tpu.pipeline_mode<synchronous>, transform_indices = @transform_15, window_bounds = array<i64: 1, 16>}, {pipeline_mode = #tpu.pipeline_mode<synchronous>, transform_indices = @transform_16, window_bounds = array<i64: 32, 16>}, {pipeline_mode = #tpu.pipeline_mode<synchronous>, transform_indices = @transform_17, window_bounds = array<i64: 1, 16>}, {pipeline_mode = #tpu.pipeline_mode<synchronous>, transform_indices = @transform_18, window_bounds = array<i64: 12, 16>}, {pipeline_mode = #tpu.pipeline_mode<synchronous>, transform_indices = @transform_19, window_bounds = array<i64: 10, 16>}, {pipeline_mode = #tpu.pipeline_mode<synchronous>, transform_indices = @transform_20, window_bounds = array<i64: 32, 32>}, {pipeline_mode = #tpu.pipeline_mode<synchronous>, transform_indices = @transform_21, window_bounds = array<i64: 16, 32>}, {pipeline_mode = #tpu.pipeline_mode<synchronous>, transform_indices = @transform_22, window_bounds = array<i64: 1, 32>}, {pipeline_mode = #tpu.pipeline_mode<synchronous>, transform_indices = @transform_23, window_bounds = array<i64: 16, 128>}, {pipeline_mode = #tpu.pipeline_mode<synchronous>, transform_indices = @transform_24, window_bounds = array<i64: 16, 128>}, {pipeline_mode = #tpu.pipeline_mode<synchronous>, transform_indices = @transform_25, window_bounds = array<i64: 1, 128>}, {pipeline_mode = #tpu.pipeline_mode<synchronous>, transform_indices = @transform_26, window_bounds = array<i64: 32, 32>}, {pipeline_mode = #tpu.pipeline_mode<synchronous>, transform_indices = @transform_27, window_bounds = array<i64: 1, 32>}, {pipeline_mode = #tpu.pipeline_mode<synchronous>, transform_indices = @transform_28, window_bounds = array<i64: 32, 32>}, {pipeline_mode = #tpu.pipeline_mode<synchronous>, transform_indices = @transform_29, window_bounds = array<i64: 1, 32>}, {pipeline_mode = #tpu.pipeline_mode<synchronous>, transform_indices = @transform_30, window_bounds = array<i64: 32, 48>}, {pipeline_mode = #tpu.pipeline_mode<synchronous>, transform_indices = @transform_31, window_bounds = array<i64: 1, 48>}, {pipeline_mode = #tpu.pipeline_mode<synchronous>, transform_indices = @transform_32, window_bounds = array<i64: 48, 48>}, {pipeline_mode = #tpu.pipeline_mode<synchronous>, transform_indices = @transform_33, window_bounds = array<i64: 1, 48>}, {pipeline_mode = #tpu.pipeline_mode<synchronous>, transform_indices = @transform_34, window_bounds = array<i64: 32, 48>}, {pipeline_mode = #tpu.pipeline_mode<synchronous>, transform_indices = @transform_35, window_bounds = array<i64: 1, 48>}, {transform_indices = @transform_36, window_bounds = array<i64: 32, 128>}, {transform_indices = @transform_37, window_bounds = array<i64: 8, 128>}]} {
    %c0 = arith.constant 0 : index
    %c0_0 = arith.constant 0 : index
    %0 = vector.load %arg3[%c0, %c0_0] : memref<48x48xf32, #tpu.memory_space<vmem>>, vector<48x48xf32>
    %c0_1 = arith.constant 0 : index
    %c0_2 = arith.constant 0 : index
    %1 = vector.load %arg4[%c0_1, %c0_2] : memref<1x48xf32, #tpu.memory_space<vmem>>, vector<1x48xf32>
    %c0_3 = arith.constant 0 : index
    %c0_4 = arith.constant 0 : index
    %2 = vector.load %arg5[%c0_3, %c0_4] : memref<48x32xf32, #tpu.memory_space<vmem>>, vector<48x32xf32>
    %c0_5 = arith.constant 0 : index
    %c0_6 = arith.constant 0 : index
    %3 = vector.load %arg6[%c0_5, %c0_6] : memref<1x32xf32, #tpu.memory_space<vmem>>, vector<1x32xf32>
    %c0_7 = arith.constant 0 : index
    %c0_8 = arith.constant 0 : index
    %4 = vector.load %arg7[%c0_7, %c0_8] : memref<32x32xf32, #tpu.memory_space<vmem>>, vector<32x32xf32>
    %c0_9 = arith.constant 0 : index
    %c0_10 = arith.constant 0 : index
    %5 = vector.load %arg8[%c0_9, %c0_10] : memref<1x32xf32, #tpu.memory_space<vmem>>, vector<1x32xf32>
    %c0_11 = arith.constant 0 : index
    %c0_12 = arith.constant 0 : index
    %6 = vector.load %arg9[%c0_11, %c0_12] : memref<48x32xf32, #tpu.memory_space<vmem>>, vector<48x32xf32>
    %c0_13 = arith.constant 0 : index
    %c0_14 = arith.constant 0 : index
    %7 = vector.load %arg10[%c0_13, %c0_14] : memref<1x32xf32, #tpu.memory_space<vmem>>, vector<1x32xf32>
    %c0_15 = arith.constant 0 : index
    %c0_16 = arith.constant 0 : index
    %8 = vector.load %arg11[%c0_15, %c0_16] : memref<32x32xf32, #tpu.memory_space<vmem>>, vector<32x32xf32>
    %c0_17 = arith.constant 0 : index
    %c0_18 = arith.constant 0 : index
    %9 = vector.load %arg12[%c0_17, %c0_18] : memref<1x32xf32, #tpu.memory_space<vmem>>, vector<1x32xf32>
    %c0_19 = arith.constant 0 : index
    %c0_20 = arith.constant 0 : index
    %10 = vector.load %arg13[%c0_19, %c0_20] : memref<32x32xf32, #tpu.memory_space<vmem>>, vector<32x32xf32>
    %c0_21 = arith.constant 0 : index
    %c0_22 = arith.constant 0 : index
    %11 = vector.load %arg14[%c0_21, %c0_22] : memref<1x32xf32, #tpu.memory_space<vmem>>, vector<1x32xf32>
    %c0_23 = arith.constant 0 : index
    %c0_24 = arith.constant 0 : index
    %12 = vector.load %arg15[%c0_23, %c0_24] : memref<32x16xf32, #tpu.memory_space<vmem>>, vector<32x16xf32>
    %c0_25 = arith.constant 0 : index
    %c0_26 = arith.constant 0 : index
    %13 = vector.load %arg16[%c0_25, %c0_26] : memref<1x16xf32, #tpu.memory_space<vmem>>, vector<1x16xf32>
    %c0_27 = arith.constant 0 : index
    %c0_28 = arith.constant 0 : index
    %14 = vector.load %arg17[%c0_27, %c0_28] : memref<32x16xf32, #tpu.memory_space<vmem>>, vector<32x16xf32>
    %c0_29 = arith.constant 0 : index
    %c0_30 = arith.constant 0 : index
    %15 = vector.load %arg18[%c0_29, %c0_30] : memref<1x16xf32, #tpu.memory_space<vmem>>, vector<1x16xf32>
    %c0_31 = arith.constant 0 : index
    %c0_32 = arith.constant 0 : index
    %16 = vector.load %arg19[%c0_31, %c0_32] : memref<12x16xf32, #tpu.memory_space<vmem>>, vector<12x16xf32>
    %c0_33 = arith.constant 0 : index
    %c0_34 = arith.constant 0 : index
    %17 = vector.load %arg20[%c0_33, %c0_34] : memref<10x16xf32, #tpu.memory_space<vmem>>, vector<10x16xf32>
    %c0_35 = arith.constant 0 : index
    %c0_36 = arith.constant 0 : index
    %18 = vector.load %arg21[%c0_35, %c0_36] : memref<32x32xf32, #tpu.memory_space<vmem>>, vector<32x32xf32>
    %c0_37 = arith.constant 0 : index
    %c0_38 = arith.constant 0 : index
    %19 = vector.load %arg22[%c0_37, %c0_38] : memref<16x32xf32, #tpu.memory_space<vmem>>, vector<16x32xf32>
    %c0_39 = arith.constant 0 : index
    %c0_40 = arith.constant 0 : index
    %20 = vector.load %arg23[%c0_39, %c0_40] : memref<1x32xf32, #tpu.memory_space<vmem>>, vector<1x32xf32>
    %c0_41 = arith.constant 0 : index
    %c0_42 = arith.constant 0 : index
    %21 = vector.load %arg24[%c0_41, %c0_42] : memref<16x128xf32, #tpu.memory_space<vmem>>, vector<16x128xf32>
    %c0_43 = arith.constant 0 : index
    %c0_44 = arith.constant 0 : index
    %22 = vector.load %arg25[%c0_43, %c0_44] : memref<16x128xf32, #tpu.memory_space<vmem>>, vector<16x128xf32>
    %c0_45 = arith.constant 0 : index
    %c0_46 = arith.constant 0 : index
    %23 = vector.load %arg26[%c0_45, %c0_46] : memref<1x128xf32, #tpu.memory_space<vmem>>, vector<1x128xf32>
    %c0_47 = arith.constant 0 : index
    %c0_48 = arith.constant 0 : index
    %24 = vector.load %arg27[%c0_47, %c0_48] : memref<32x32xf32, #tpu.memory_space<vmem>>, vector<32x32xf32>
    %c0_49 = arith.constant 0 : index
    %c0_50 = arith.constant 0 : index
    %25 = vector.load %arg28[%c0_49, %c0_50] : memref<1x32xf32, #tpu.memory_space<vmem>>, vector<1x32xf32>
    %c0_51 = arith.constant 0 : index
    %c0_52 = arith.constant 0 : index
    %26 = vector.load %arg29[%c0_51, %c0_52] : memref<32x32xf32, #tpu.memory_space<vmem>>, vector<32x32xf32>
    %c0_53 = arith.constant 0 : index
    %c0_54 = arith.constant 0 : index
    %27 = vector.load %arg30[%c0_53, %c0_54] : memref<1x32xf32, #tpu.memory_space<vmem>>, vector<1x32xf32>
    %c0_55 = arith.constant 0 : index
    %c0_56 = arith.constant 0 : index
    %28 = vector.load %arg31[%c0_55, %c0_56] : memref<32x48xf32, #tpu.memory_space<vmem>>, vector<32x48xf32>
    %c0_57 = arith.constant 0 : index
    %c0_58 = arith.constant 0 : index
    %29 = vector.load %arg32[%c0_57, %c0_58] : memref<1x48xf32, #tpu.memory_space<vmem>>, vector<1x48xf32>
    %c0_59 = arith.constant 0 : index
    %c0_60 = arith.constant 0 : index
    %30 = vector.load %arg33[%c0_59, %c0_60] : memref<48x48xf32, #tpu.memory_space<vmem>>, vector<48x48xf32>
    %c0_61 = arith.constant 0 : index
    %c0_62 = arith.constant 0 : index
    %31 = vector.load %arg34[%c0_61, %c0_62] : memref<1x48xf32, #tpu.memory_space<vmem>>, vector<1x48xf32>
    %c0_63 = arith.constant 0 : index
    %c0_64 = arith.constant 0 : index
    %32 = vector.load %arg35[%c0_63, %c0_64] : memref<32x48xf32, #tpu.memory_space<vmem>>, vector<32x48xf32>
    %c0_65 = arith.constant 0 : index
    %c0_66 = arith.constant 0 : index
    %33 = vector.load %arg36[%c0_65, %c0_66] : memref<1x48xf32, #tpu.memory_space<vmem>>, vector<1x48xf32>
    %c0_67 = arith.constant 0 : index
    %c0_68 = arith.constant 0 : index
    %34 = vector.load %arg1[%c0_67, %c0_68] : memref<32x48xf32, #tpu.memory_space<vmem>>, vector<32x48xf32>
    %cst = arith.constant dense<0.000000e+00> : vector<32x48xf32>
    %35 = tpu.matmul %34, %0, %cst {dimension_numbers = #tpu.dot_dimension_numbers<[1], [0], [0], [1], [0, 0, 1, 1], [], []>} : vector<32x48xf32>, vector<48x48xf32>, vector<32x48xf32> -> vector<32x48xf32>
    %36 = vector.broadcast %1 : vector<1x48xf32> to vector<32x48xf32>
    %37 = arith.addf %35, %36 : vector<32x48xf32>
    %cst_69 = arith.constant dense<0.000000e+00> : vector<32x32xf32>
    %38 = tpu.matmul %37, %2, %cst_69 {dimension_numbers = #tpu.dot_dimension_numbers<[1], [0], [0], [1], [0, 0, 1, 1], [], []>} : vector<32x48xf32>, vector<48x32xf32>, vector<32x32xf32> -> vector<32x32xf32>
    %39 = vector.broadcast %3 : vector<1x32xf32> to vector<32x32xf32>
    %40 = arith.addf %38, %39 : vector<32x32xf32>
    %cst_70 = arith.constant 0.000000e+00 : f32
    %41 = vector.broadcast %cst_70 : f32 to vector<32x32xf32>
    %42 = arith.cmpf oge, %40, %41 : vector<32x32xf32>
    %cst_71 = arith.constant 1.000000e-01 : f32
    %43 = vector.broadcast %cst_71 : f32 to vector<32x32xf32>
    %44 = arith.mulf %43, %40 : vector<32x32xf32>
    %45 = arith.select %42, %40, %44 : vector<32x32xi1>, vector<32x32xf32>
    %cst_72 = arith.constant dense<0.000000e+00> : vector<32x32xf32>
    %46 = tpu.matmul %45, %4, %cst_72 {dimension_numbers = #tpu.dot_dimension_numbers<[1], [0], [0], [1], [0, 0, 1, 1], [], []>} : vector<32x32xf32>, vector<32x32xf32>, vector<32x32xf32> -> vector<32x32xf32>
    %47 = vector.broadcast %5 : vector<1x32xf32> to vector<32x32xf32>
    %48 = arith.addf %46, %47 : vector<32x32xf32>
    %cst_73 = arith.constant dense<0.000000e+00> : vector<32x32xf32>
    %49 = tpu.matmul %37, %6, %cst_73 {dimension_numbers = #tpu.dot_dimension_numbers<[1], [0], [0], [1], [0, 0, 1, 1], [], []>} : vector<32x48xf32>, vector<48x32xf32>, vector<32x32xf32> -> vector<32x32xf32>
    %50 = vector.broadcast %7 : vector<1x32xf32> to vector<32x32xf32>
    %51 = arith.addf %49, %50 : vector<32x32xf32>
    %52 = arith.addf %48, %51 : vector<32x32xf32>
    %cst_74 = arith.constant dense<0.000000e+00> : vector<32x32xf32>
    %53 = tpu.matmul %52, %8, %cst_74 {dimension_numbers = #tpu.dot_dimension_numbers<[1], [0], [0], [1], [0, 0, 1, 1], [], []>} : vector<32x32xf32>, vector<32x32xf32>, vector<32x32xf32> -> vector<32x32xf32>
    %54 = vector.broadcast %9 : vector<1x32xf32> to vector<32x32xf32>
    %55 = arith.addf %53, %54 : vector<32x32xf32>
    %cst_75 = arith.constant 0.000000e+00 : f32
    %56 = vector.broadcast %cst_75 : f32 to vector<32x32xf32>
    %57 = arith.cmpf oge, %55, %56 : vector<32x32xf32>
    %cst_76 = arith.constant 1.000000e-01 : f32
    %58 = vector.broadcast %cst_76 : f32 to vector<32x32xf32>
    %59 = arith.mulf %58, %55 : vector<32x32xf32>
    %60 = arith.select %57, %55, %59 : vector<32x32xi1>, vector<32x32xf32>
    %cst_77 = arith.constant dense<0.000000e+00> : vector<32x32xf32>
    %61 = tpu.matmul %60, %10, %cst_77 {dimension_numbers = #tpu.dot_dimension_numbers<[1], [0], [0], [1], [0, 0, 1, 1], [], []>} : vector<32x32xf32>, vector<32x32xf32>, vector<32x32xf32> -> vector<32x32xf32>
    %62 = vector.broadcast %11 : vector<1x32xf32> to vector<32x32xf32>
    %63 = arith.addf %61, %62 : vector<32x32xf32>
    %64 = arith.addf %63, %52 : vector<32x32xf32>
    %cst_78 = arith.constant 0.000000e+00 : f32
    %65 = vector.broadcast %cst_78 : f32 to vector<32x32xf32>
    %66 = arith.cmpf oge, %64, %65 : vector<32x32xf32>
    %cst_79 = arith.constant 1.000000e-01 : f32
    %67 = vector.broadcast %cst_79 : f32 to vector<32x32xf32>
    %68 = arith.mulf %67, %64 : vector<32x32xf32>
    %69 = arith.select %66, %64, %68 : vector<32x32xi1>, vector<32x32xf32>
    %cst_80 = arith.constant dense<0.000000e+00> : vector<32x16xf32>
    %70 = tpu.matmul %69, %12, %cst_80 {dimension_numbers = #tpu.dot_dimension_numbers<[1], [0], [0], [1], [0, 0, 1, 1], [], []>} : vector<32x32xf32>, vector<32x16xf32>, vector<32x16xf32> -> vector<32x16xf32>
    %71 = vector.broadcast %13 : vector<1x16xf32> to vector<32x16xf32>
    %72 = arith.addf %70, %71 : vector<32x16xf32>
    %73 = arith.mulf %16, %16 : vector<12x16xf32>
    %cst_81 = arith.constant dense<0.000000e+00> : vector<12xf32>
    %74 = vector.multi_reduction <add>, %73, %cst_81 [1] : vector<12x16xf32> to vector<12xf32>
    %75 = vector.shape_cast %74 : vector<12xf32> to vector<12x1xf32>
    %76 = tpu.transpose %75, [1, 0] : vector<12x1xf32> -> vector<1x12xf32>
    %cst_82 = arith.constant dense<0.000000e+00> : vector<32x12xf32>
    %77 = tpu.matmul %72, %16, %cst_82 {dimension_numbers = #tpu.dot_dimension_numbers<[1], [1], [0], [0], [0, 0, 1, 0], [], []>} : vector<32x16xf32>, vector<12x16xf32>, vector<32x12xf32> -> vector<32x12xf32>
    %cst_83 = arith.constant 2.000000e+00 : f32
    %78 = vector.broadcast %cst_83 : f32 to vector<32x12xf32>
    %79 = arith.mulf %78, %77 : vector<32x12xf32>
    %80 = vector.broadcast %76 : vector<1x12xf32> to vector<32x12xf32>
    %81 = arith.subf %80, %79 : vector<32x12xf32>
    %cst_84 = arith.constant 0.000000e+00 : f32
    %82 = vector.broadcast %cst_84 : f32 to vector<32x12xf32>
    %83 = arith.subf %82, %81 : vector<32x12xf32>
    %cst_85 = arith.constant dense<0xFF800000> : vector<32xf32>
    %84 = vector.multi_reduction <maximumf>, %83, %cst_85 [1] : vector<32x12xf32> to vector<32xf32>
    %85 = vector.shape_cast %84 : vector<32xf32> to vector<32x1xf32>
    %86 = vector.broadcast %85 : vector<32x1xf32> to vector<32x12xf32>
    %87 = arith.subf %83, %86 : vector<32x12xf32>
    %88 = math.exp %87 : vector<32x12xf32>
    %cst_86 = arith.constant dense<0.000000e+00> : vector<32xf32>
    %89 = vector.multi_reduction <add>, %88, %cst_86 [1] : vector<32x12xf32> to vector<32xf32>
    %90 = vector.shape_cast %89 : vector<32xf32> to vector<32x1xf32>
    %91 = vector.broadcast %90 : vector<32x1xf32> to vector<32x12xf32>
    %92 = arith.divf %88, %91 : vector<32x12xf32>
    %93 = tpu.iota {dimensions = array<i32: 1>} : vector<32x12xi32>
    %cst_87 = arith.constant dense<0x7F800000> : vector<32xf32>
    %94 = vector.multi_reduction <minimumf>, %81, %cst_87 [1] : vector<32x12xf32> to vector<32xf32>
    %95 = vector.shape_cast %94 : vector<32xf32> to vector<32x1xf32>
    %96 = vector.broadcast %95 : vector<32x1xf32> to vector<32x12xf32>
    %97 = arith.cmpf oeq, %81, %96 : vector<32x12xf32>
    %c12_i32 = arith.constant 12 : i32
    %98 = vector.broadcast %c12_i32 : i32 to vector<32x12xi32>
    %99 = arith.select %97, %93, %98 : vector<32x12xi1>, vector<32x12xi32>
    %cst_88 = arith.constant dense<2147483647> : vector<32xi32>
    %100 = vector.multi_reduction <minsi>, %99, %cst_88 [1] : vector<32x12xi32> to vector<32xi32>
    %101 = vector.shape_cast %100 : vector<32xi32> to vector<32x1xi32>
    %102 = vector.broadcast %101 : vector<32x1xi32> to vector<32x12xi32>
    %103 = arith.cmpi eq, %93, %102 : vector<32x12xi32>
    %104 = arith.extui %103 : vector<32x12xi1> to vector<32x12xi32>
    %105 = arith.sitofp %104 : vector<32x12xi32> to vector<32x12xf32>
    %cst_89 = arith.constant dense<0.000000e+00> : vector<32x16xf32>
    %106 = tpu.matmul %105, %16, %cst_89 {dimension_numbers = #tpu.dot_dimension_numbers<[1], [0], [0], [1], [0, 0, 1, 1], [], []>} : vector<32x12xf32>, vector<12x16xf32>, vector<32x16xf32> -> vector<32x16xf32>
    %107 = arith.subf %106, %72 : vector<32x16xf32>
    %108 = arith.mulf %107, %107 : vector<32x16xf32>
    %cst_90 = arith.constant dense<0.000000e+00> : vector<32xf32>
    %109 = vector.multi_reduction <add>, %108, %cst_90 [1] : vector<32x16xf32> to vector<32xf32>
    %110 = vector.shape_cast %109 : vector<32xf32> to vector<32x1xf32>
    %cst_91 = arith.constant dense<0.000000e+00> : vector<1xf32>
    %111 = vector.multi_reduction <add>, %110, %cst_91 [0] : vector<32x1xf32> to vector<1xf32>
    %112 = vector.shape_cast %111 : vector<1xf32> to vector<1x1xf32>
    %cst_92 = arith.constant dense<0.000000e+00> : vector<32x32xf32>
    %113 = tpu.matmul %64, %18, %cst_92 {dimension_numbers = #tpu.dot_dimension_numbers<[1], [0], [0], [1], [0, 0, 1, 1], [], []>} : vector<32x32xf32>, vector<32x32xf32>, vector<32x32xf32> -> vector<32x32xf32>
    %cst_93 = arith.constant dense<0.000000e+00> : vector<32x32xf32>
    %114 = tpu.matmul %106, %19, %cst_93 {dimension_numbers = #tpu.dot_dimension_numbers<[1], [0], [0], [1], [0, 0, 1, 1], [], []>} : vector<32x16xf32>, vector<16x32xf32>, vector<32x32xf32> -> vector<32x32xf32>
    %115 = arith.addf %113, %114 : vector<32x32xf32>
    %116 = vector.broadcast %20 : vector<1x32xf32> to vector<32x32xf32>
    %117 = arith.addf %115, %116 : vector<32x32xf32>
    %cst_94 = arith.constant 0.000000e+00 : f32
    %118 = vector.broadcast %cst_94 : f32 to vector<32x32xf32>
    %119 = arith.cmpf oge, %117, %118 : vector<32x32xf32>
    %cst_95 = arith.constant 1.000000e-01 : f32
    %120 = vector.broadcast %cst_95 : f32 to vector<32x32xf32>
    %121 = arith.mulf %120, %117 : vector<32x32xf32>
    %122 = arith.select %119, %117, %121 : vector<32x32xi1>, vector<32x32xf32>
    %cst_96 = arith.constant dense<0.000000e+00> : vector<32x16xf32>
    %123 = tpu.matmul %122, %14, %cst_96 {dimension_numbers = #tpu.dot_dimension_numbers<[1], [0], [0], [1], [0, 0, 1, 1], [], []>} : vector<32x32xf32>, vector<32x16xf32>, vector<32x16xf32> -> vector<32x16xf32>
    %124 = vector.broadcast %15 : vector<1x16xf32> to vector<32x16xf32>
    %125 = arith.addf %123, %124 : vector<32x16xf32>
    %126 = arith.mulf %17, %17 : vector<10x16xf32>
    %cst_97 = arith.constant dense<0.000000e+00> : vector<10xf32>
    %127 = vector.multi_reduction <add>, %126, %cst_97 [1] : vector<10x16xf32> to vector<10xf32>
    %128 = vector.shape_cast %127 : vector<10xf32> to vector<10x1xf32>
    %129 = tpu.transpose %128, [1, 0] : vector<10x1xf32> -> vector<1x10xf32>
    %cst_98 = arith.constant dense<0.000000e+00> : vector<32x10xf32>
    %130 = tpu.matmul %125, %17, %cst_98 {dimension_numbers = #tpu.dot_dimension_numbers<[1], [1], [0], [0], [0, 0, 1, 0], [], []>} : vector<32x16xf32>, vector<10x16xf32>, vector<32x10xf32> -> vector<32x10xf32>
    %cst_99 = arith.constant 2.000000e+00 : f32
    %131 = vector.broadcast %cst_99 : f32 to vector<32x10xf32>
    %132 = arith.mulf %131, %130 : vector<32x10xf32>
    %133 = vector.broadcast %129 : vector<1x10xf32> to vector<32x10xf32>
    %134 = arith.subf %133, %132 : vector<32x10xf32>
    %cst_100 = arith.constant 0.000000e+00 : f32
    %135 = vector.broadcast %cst_100 : f32 to vector<32x10xf32>
    %136 = arith.subf %135, %134 : vector<32x10xf32>
    %cst_101 = arith.constant dense<0xFF800000> : vector<32xf32>
    %137 = vector.multi_reduction <maximumf>, %136, %cst_101 [1] : vector<32x10xf32> to vector<32xf32>
    %138 = vector.shape_cast %137 : vector<32xf32> to vector<32x1xf32>
    %139 = vector.broadcast %138 : vector<32x1xf32> to vector<32x10xf32>
    %140 = arith.subf %136, %139 : vector<32x10xf32>
    %141 = math.exp %140 : vector<32x10xf32>
    %cst_102 = arith.constant dense<0.000000e+00> : vector<32xf32>
    %142 = vector.multi_reduction <add>, %141, %cst_102 [1] : vector<32x10xf32> to vector<32xf32>
    %143 = vector.shape_cast %142 : vector<32xf32> to vector<32x1xf32>
    %144 = vector.broadcast %143 : vector<32x1xf32> to vector<32x10xf32>
    %145 = arith.divf %141, %144 : vector<32x10xf32>
    %146 = tpu.iota {dimensions = array<i32: 1>} : vector<32x10xi32>
    %cst_103 = arith.constant dense<0x7F800000> : vector<32xf32>
    %147 = vector.multi_reduction <minimumf>, %134, %cst_103 [1] : vector<32x10xf32> to vector<32xf32>
    %148 = vector.shape_cast %147 : vector<32xf32> to vector<32x1xf32>
    %149 = vector.broadcast %148 : vector<32x1xf32> to vector<32x10xf32>
    %150 = arith.cmpf oeq, %134, %149 : vector<32x10xf32>
    %c10_i32 = arith.constant 10 : i32
    %151 = vector.broadcast %c10_i32 : i32 to vector<32x10xi32>
    %152 = arith.select %150, %146, %151 : vector<32x10xi1>, vector<32x10xi32>
    %cst_104 = arith.constant dense<2147483647> : vector<32xi32>
    %153 = vector.multi_reduction <minsi>, %152, %cst_104 [1] : vector<32x10xi32> to vector<32xi32>
    %154 = vector.shape_cast %153 : vector<32xi32> to vector<32x1xi32>
    %155 = vector.broadcast %154 : vector<32x1xi32> to vector<32x10xi32>
    %156 = arith.cmpi eq, %146, %155 : vector<32x10xi32>
    %157 = arith.extui %156 : vector<32x10xi1> to vector<32x10xi32>
    %158 = arith.sitofp %157 : vector<32x10xi32> to vector<32x10xf32>
    %cst_105 = arith.constant dense<0.000000e+00> : vector<32x16xf32>
    %159 = tpu.matmul %158, %17, %cst_105 {dimension_numbers = #tpu.dot_dimension_numbers<[1], [0], [0], [1], [0, 0, 1, 1], [], []>} : vector<32x10xf32>, vector<10x16xf32>, vector<32x16xf32> -> vector<32x16xf32>
    %160 = arith.subf %159, %125 : vector<32x16xf32>
    %161 = arith.mulf %160, %160 : vector<32x16xf32>
    %cst_106 = arith.constant dense<0.000000e+00> : vector<32xf32>
    %162 = vector.multi_reduction <add>, %161, %cst_106 [1] : vector<32x16xf32> to vector<32xf32>
    %163 = vector.shape_cast %162 : vector<32xf32> to vector<32x1xf32>
    %cst_107 = arith.constant dense<0.000000e+00> : vector<1xf32>
    %164 = vector.multi_reduction <add>, %163, %cst_107 [0] : vector<32x1xf32> to vector<1xf32>
    %165 = vector.shape_cast %164 : vector<1xf32> to vector<1x1xf32>
    %cst_108 = arith.constant dense<0.000000e+00> : vector<32x128xf32>
    %166 = tpu.matmul %106, %21, %cst_108 {dimension_numbers = #tpu.dot_dimension_numbers<[1], [0], [0], [1], [0, 0, 1, 1], [], []>} : vector<32x16xf32>, vector<16x128xf32>, vector<32x128xf32> -> vector<32x128xf32>
    %cst_109 = arith.constant dense<0.000000e+00> : vector<32x128xf32>
    %167 = tpu.matmul %159, %22, %cst_109 {dimension_numbers = #tpu.dot_dimension_numbers<[1], [0], [0], [1], [0, 0, 1, 1], [], []>} : vector<32x16xf32>, vector<16x128xf32>, vector<32x128xf32> -> vector<32x128xf32>
    %168 = arith.addf %166, %167 : vector<32x128xf32>
    %169 = vector.broadcast %23 : vector<1x128xf32> to vector<32x128xf32>
    %170 = arith.addf %168, %169 : vector<32x128xf32>
    %171 = vector.extract_strided_slice %170 {offsets = [0, 0], sizes = [32, 32], strides = [1, 1]} : vector<32x128xf32> to vector<32x32xf32>
    %cst_110 = arith.constant dense<0.000000e+00> : vector<32x32xf32>
    %172 = tpu.matmul %171, %24, %cst_110 {dimension_numbers = #tpu.dot_dimension_numbers<[1], [0], [0], [1], [0, 0, 1, 1], [], []>} : vector<32x32xf32>, vector<32x32xf32>, vector<32x32xf32> -> vector<32x32xf32>
    %173 = vector.broadcast %25 : vector<1x32xf32> to vector<32x32xf32>
    %174 = arith.addf %172, %173 : vector<32x32xf32>
    %cst_111 = arith.constant 0.000000e+00 : f32
    %175 = vector.broadcast %cst_111 : f32 to vector<32x32xf32>
    %176 = arith.cmpf oge, %174, %175 : vector<32x32xf32>
    %cst_112 = arith.constant 1.000000e-01 : f32
    %177 = vector.broadcast %cst_112 : f32 to vector<32x32xf32>
    %178 = arith.mulf %177, %174 : vector<32x32xf32>
    %179 = arith.select %176, %174, %178 : vector<32x32xi1>, vector<32x32xf32>
    %cst_113 = arith.constant dense<0.000000e+00> : vector<32x32xf32>
    %180 = tpu.matmul %179, %26, %cst_113 {dimension_numbers = #tpu.dot_dimension_numbers<[1], [0], [0], [1], [0, 0, 1, 1], [], []>} : vector<32x32xf32>, vector<32x32xf32>, vector<32x32xf32> -> vector<32x32xf32>
    %181 = vector.broadcast %27 : vector<1x32xf32> to vector<32x32xf32>
    %182 = arith.addf %180, %181 : vector<32x32xf32>
    %183 = arith.addf %182, %171 : vector<32x32xf32>
    %cst_114 = arith.constant dense<0.000000e+00> : vector<32x48xf32>
    %184 = tpu.matmul %183, %28, %cst_114 {dimension_numbers = #tpu.dot_dimension_numbers<[1], [0], [0], [1], [0, 0, 1, 1], [], []>} : vector<32x32xf32>, vector<32x48xf32>, vector<32x48xf32> -> vector<32x48xf32>
    %185 = vector.broadcast %29 : vector<1x48xf32> to vector<32x48xf32>
    %186 = arith.addf %184, %185 : vector<32x48xf32>
    %cst_115 = arith.constant 0.000000e+00 : f32
    %187 = vector.broadcast %cst_115 : f32 to vector<32x48xf32>
    %188 = arith.cmpf oge, %186, %187 : vector<32x48xf32>
    %cst_116 = arith.constant 1.000000e-01 : f32
    %189 = vector.broadcast %cst_116 : f32 to vector<32x48xf32>
    %190 = arith.mulf %189, %186 : vector<32x48xf32>
    %191 = arith.select %188, %186, %190 : vector<32x48xi1>, vector<32x48xf32>
    %cst_117 = arith.constant dense<0.000000e+00> : vector<32x48xf32>
    %192 = tpu.matmul %191, %30, %cst_117 {dimension_numbers = #tpu.dot_dimension_numbers<[1], [0], [0], [1], [0, 0, 1, 1], [], []>} : vector<32x48xf32>, vector<48x48xf32>, vector<32x48xf32> -> vector<32x48xf32>
    %193 = vector.broadcast %31 : vector<1x48xf32> to vector<32x48xf32>
    %194 = arith.addf %192, %193 : vector<32x48xf32>
    %cst_118 = arith.constant dense<0.000000e+00> : vector<32x48xf32>
    %195 = tpu.matmul %183, %32, %cst_118 {dimension_numbers = #tpu.dot_dimension_numbers<[1], [0], [0], [1], [0, 0, 1, 1], [], []>} : vector<32x32xf32>, vector<32x48xf32>, vector<32x48xf32> -> vector<32x48xf32>
    %196 = vector.broadcast %33 : vector<1x48xf32> to vector<32x48xf32>
    %197 = arith.addf %195, %196 : vector<32x48xf32>
    %198 = arith.addf %194, %197 : vector<32x48xf32>
    %199 = arith.subf %198, %37 : vector<32x48xf32>
    %200 = arith.mulf %199, %199 : vector<32x48xf32>
    %cst_119 = arith.constant dense<0.000000e+00> : vector<32xf32>
    %201 = vector.multi_reduction <add>, %200, %cst_119 [1] : vector<32x48xf32> to vector<32xf32>
    %202 = vector.shape_cast %201 : vector<32xf32> to vector<32x1xf32>
    %cst_120 = arith.constant dense<0.000000e+00> : vector<1xf32>
    %203 = vector.multi_reduction <add>, %202, %cst_120 [0] : vector<32x1xf32> to vector<1xf32>
    %204 = vector.shape_cast %203 : vector<1xf32> to vector<1x1xf32>
    %c0_121 = arith.constant 0 : index
    %c0_122 = arith.constant 0 : index
    %205 = vector.load %arg2[%c0_121, %c0_122] : memref<32x48xf32, #tpu.memory_space<vmem>>, vector<32x48xf32>
    %cst_123 = arith.constant dense<0.000000e+00> : vector<32x48xf32>
    %206 = tpu.matmul %205, %0, %cst_123 {dimension_numbers = #tpu.dot_dimension_numbers<[1], [0], [0], [1], [0, 0, 1, 1], [], []>} : vector<32x48xf32>, vector<48x48xf32>, vector<32x48xf32> -> vector<32x48xf32>
    %207 = vector.broadcast %1 : vector<1x48xf32> to vector<32x48xf32>
    %208 = arith.addf %206, %207 : vector<32x48xf32>
    %cst_124 = arith.constant dense<0.000000e+00> : vector<32x32xf32>
    %209 = tpu.matmul %208, %2, %cst_124 {dimension_numbers = #tpu.dot_dimension_numbers<[1], [0], [0], [1], [0, 0, 1, 1], [], []>} : vector<32x48xf32>, vector<48x32xf32>, vector<32x32xf32> -> vector<32x32xf32>
    %210 = vector.broadcast %3 : vector<1x32xf32> to vector<32x32xf32>
    %211 = arith.addf %209, %210 : vector<32x32xf32>
    %cst_125 = arith.constant 0.000000e+00 : f32
    %212 = vector.broadcast %cst_125 : f32 to vector<32x32xf32>
    %213 = arith.cmpf oge, %211, %212 : vector<32x32xf32>
    %cst_126 = arith.constant 1.000000e-01 : f32
    %214 = vector.broadcast %cst_126 : f32 to vector<32x32xf32>
    %215 = arith.mulf %214, %211 : vector<32x32xf32>
    %216 = arith.select %213, %211, %215 : vector<32x32xi1>, vector<32x32xf32>
    %cst_127 = arith.constant dense<0.000000e+00> : vector<32x32xf32>
    %217 = tpu.matmul %216, %4, %cst_127 {dimension_numbers = #tpu.dot_dimension_numbers<[1], [0], [0], [1], [0, 0, 1, 1], [], []>} : vector<32x32xf32>, vector<32x32xf32>, vector<32x32xf32> -> vector<32x32xf32>
    %218 = vector.broadcast %5 : vector<1x32xf32> to vector<32x32xf32>
    %219 = arith.addf %217, %218 : vector<32x32xf32>
    %cst_128 = arith.constant dense<0.000000e+00> : vector<32x32xf32>
    %220 = tpu.matmul %208, %6, %cst_128 {dimension_numbers = #tpu.dot_dimension_numbers<[1], [0], [0], [1], [0, 0, 1, 1], [], []>} : vector<32x48xf32>, vector<48x32xf32>, vector<32x32xf32> -> vector<32x32xf32>
    %221 = vector.broadcast %7 : vector<1x32xf32> to vector<32x32xf32>
    %222 = arith.addf %220, %221 : vector<32x32xf32>
    %223 = arith.addf %219, %222 : vector<32x32xf32>
    %cst_129 = arith.constant dense<0.000000e+00> : vector<32x32xf32>
    %224 = tpu.matmul %223, %8, %cst_129 {dimension_numbers = #tpu.dot_dimension_numbers<[1], [0], [0], [1], [0, 0, 1, 1], [], []>} : vector<32x32xf32>, vector<32x32xf32>, vector<32x32xf32> -> vector<32x32xf32>
    %225 = vector.broadcast %9 : vector<1x32xf32> to vector<32x32xf32>
    %226 = arith.addf %224, %225 : vector<32x32xf32>
    %cst_130 = arith.constant 0.000000e+00 : f32
    %227 = vector.broadcast %cst_130 : f32 to vector<32x32xf32>
    %228 = arith.cmpf oge, %226, %227 : vector<32x32xf32>
    %cst_131 = arith.constant 1.000000e-01 : f32
    %229 = vector.broadcast %cst_131 : f32 to vector<32x32xf32>
    %230 = arith.mulf %229, %226 : vector<32x32xf32>
    %231 = arith.select %228, %226, %230 : vector<32x32xi1>, vector<32x32xf32>
    %cst_132 = arith.constant dense<0.000000e+00> : vector<32x32xf32>
    %232 = tpu.matmul %231, %10, %cst_132 {dimension_numbers = #tpu.dot_dimension_numbers<[1], [0], [0], [1], [0, 0, 1, 1], [], []>} : vector<32x32xf32>, vector<32x32xf32>, vector<32x32xf32> -> vector<32x32xf32>
    %233 = vector.broadcast %11 : vector<1x32xf32> to vector<32x32xf32>
    %234 = arith.addf %232, %233 : vector<32x32xf32>
    %235 = arith.addf %234, %223 : vector<32x32xf32>
    %cst_133 = arith.constant 0.000000e+00 : f32
    %236 = vector.broadcast %cst_133 : f32 to vector<32x32xf32>
    %237 = arith.cmpf oge, %235, %236 : vector<32x32xf32>
    %cst_134 = arith.constant 1.000000e-01 : f32
    %238 = vector.broadcast %cst_134 : f32 to vector<32x32xf32>
    %239 = arith.mulf %238, %235 : vector<32x32xf32>
    %240 = arith.select %237, %235, %239 : vector<32x32xi1>, vector<32x32xf32>
    %cst_135 = arith.constant dense<0.000000e+00> : vector<32x16xf32>
    %241 = tpu.matmul %240, %12, %cst_135 {dimension_numbers = #tpu.dot_dimension_numbers<[1], [0], [0], [1], [0, 0, 1, 1], [], []>} : vector<32x32xf32>, vector<32x16xf32>, vector<32x16xf32> -> vector<32x16xf32>
    %242 = vector.broadcast %13 : vector<1x16xf32> to vector<32x16xf32>
    %243 = arith.addf %241, %242 : vector<32x16xf32>
    %244 = arith.mulf %16, %16 : vector<12x16xf32>
    %cst_136 = arith.constant dense<0.000000e+00> : vector<12xf32>
    %245 = vector.multi_reduction <add>, %244, %cst_136 [1] : vector<12x16xf32> to vector<12xf32>
    %246 = vector.shape_cast %245 : vector<12xf32> to vector<12x1xf32>
    %247 = tpu.transpose %246, [1, 0] : vector<12x1xf32> -> vector<1x12xf32>
    %cst_137 = arith.constant dense<0.000000e+00> : vector<32x12xf32>
    %248 = tpu.matmul %243, %16, %cst_137 {dimension_numbers = #tpu.dot_dimension_numbers<[1], [1], [0], [0], [0, 0, 1, 0], [], []>} : vector<32x16xf32>, vector<12x16xf32>, vector<32x12xf32> -> vector<32x12xf32>
    %cst_138 = arith.constant 2.000000e+00 : f32
    %249 = vector.broadcast %cst_138 : f32 to vector<32x12xf32>
    %250 = arith.mulf %249, %248 : vector<32x12xf32>
    %251 = vector.broadcast %247 : vector<1x12xf32> to vector<32x12xf32>
    %252 = arith.subf %251, %250 : vector<32x12xf32>
    %cst_139 = arith.constant 0.000000e+00 : f32
    %253 = vector.broadcast %cst_139 : f32 to vector<32x12xf32>
    %254 = arith.subf %253, %252 : vector<32x12xf32>
    %cst_140 = arith.constant dense<0xFF800000> : vector<32xf32>
    %255 = vector.multi_reduction <maximumf>, %254, %cst_140 [1] : vector<32x12xf32> to vector<32xf32>
    %256 = vector.shape_cast %255 : vector<32xf32> to vector<32x1xf32>
    %257 = vector.broadcast %256 : vector<32x1xf32> to vector<32x12xf32>
    %258 = arith.subf %254, %257 : vector<32x12xf32>
    %259 = math.exp %258 : vector<32x12xf32>
    %cst_141 = arith.constant dense<0.000000e+00> : vector<32xf32>
    %260 = vector.multi_reduction <add>, %259, %cst_141 [1] : vector<32x12xf32> to vector<32xf32>
    %261 = vector.shape_cast %260 : vector<32xf32> to vector<32x1xf32>
    %262 = vector.broadcast %261 : vector<32x1xf32> to vector<32x12xf32>
    %263 = arith.divf %259, %262 : vector<32x12xf32>
    %264 = tpu.iota {dimensions = array<i32: 1>} : vector<32x12xi32>
    %cst_142 = arith.constant dense<0x7F800000> : vector<32xf32>
    %265 = vector.multi_reduction <minimumf>, %252, %cst_142 [1] : vector<32x12xf32> to vector<32xf32>
    %266 = vector.shape_cast %265 : vector<32xf32> to vector<32x1xf32>
    %267 = vector.broadcast %266 : vector<32x1xf32> to vector<32x12xf32>
    %268 = arith.cmpf oeq, %252, %267 : vector<32x12xf32>
    %c12_i32_143 = arith.constant 12 : i32
    %269 = vector.broadcast %c12_i32_143 : i32 to vector<32x12xi32>
    %270 = arith.select %268, %264, %269 : vector<32x12xi1>, vector<32x12xi32>
    %cst_144 = arith.constant dense<2147483647> : vector<32xi32>
    %271 = vector.multi_reduction <minsi>, %270, %cst_144 [1] : vector<32x12xi32> to vector<32xi32>
    %272 = vector.shape_cast %271 : vector<32xi32> to vector<32x1xi32>
    %273 = vector.broadcast %272 : vector<32x1xi32> to vector<32x12xi32>
    %274 = arith.cmpi eq, %264, %273 : vector<32x12xi32>
    %275 = arith.extui %274 : vector<32x12xi1> to vector<32x12xi32>
    %276 = arith.sitofp %275 : vector<32x12xi32> to vector<32x12xf32>
    %cst_145 = arith.constant dense<0.000000e+00> : vector<32x16xf32>
    %277 = tpu.matmul %276, %16, %cst_145 {dimension_numbers = #tpu.dot_dimension_numbers<[1], [0], [0], [1], [0, 0, 1, 1], [], []>} : vector<32x12xf32>, vector<12x16xf32>, vector<32x16xf32> -> vector<32x16xf32>
    %278 = arith.subf %277, %243 : vector<32x16xf32>
    %279 = arith.mulf %278, %278 : vector<32x16xf32>
    %cst_146 = arith.constant dense<0.000000e+00> : vector<32xf32>
    %280 = vector.multi_reduction <add>, %279, %cst_146 [1] : vector<32x16xf32> to vector<32xf32>
    %281 = vector.shape_cast %280 : vector<32xf32> to vector<32x1xf32>
    %cst_147 = arith.constant dense<0.000000e+00> : vector<1xf32>
    %282 = vector.multi_reduction <add>, %281, %cst_147 [0] : vector<32x1xf32> to vector<1xf32>
    %283 = vector.shape_cast %282 : vector<1xf32> to vector<1x1xf32>
    %cst_148 = arith.constant dense<0.000000e+00> : vector<32x32xf32>
    %284 = tpu.matmul %235, %18, %cst_148 {dimension_numbers = #tpu.dot_dimension_numbers<[1], [0], [0], [1], [0, 0, 1, 1], [], []>} : vector<32x32xf32>, vector<32x32xf32>, vector<32x32xf32> -> vector<32x32xf32>
    %cst_149 = arith.constant dense<0.000000e+00> : vector<32x32xf32>
    %285 = tpu.matmul %277, %19, %cst_149 {dimension_numbers = #tpu.dot_dimension_numbers<[1], [0], [0], [1], [0, 0, 1, 1], [], []>} : vector<32x16xf32>, vector<16x32xf32>, vector<32x32xf32> -> vector<32x32xf32>
    %286 = arith.addf %284, %285 : vector<32x32xf32>
    %287 = vector.broadcast %20 : vector<1x32xf32> to vector<32x32xf32>
    %288 = arith.addf %286, %287 : vector<32x32xf32>
    %cst_150 = arith.constant 0.000000e+00 : f32
    %289 = vector.broadcast %cst_150 : f32 to vector<32x32xf32>
    %290 = arith.cmpf oge, %288, %289 : vector<32x32xf32>
    %cst_151 = arith.constant 1.000000e-01 : f32
    %291 = vector.broadcast %cst_151 : f32 to vector<32x32xf32>
    %292 = arith.mulf %291, %288 : vector<32x32xf32>
    %293 = arith.select %290, %288, %292 : vector<32x32xi1>, vector<32x32xf32>
    %cst_152 = arith.constant dense<0.000000e+00> : vector<32x16xf32>
    %294 = tpu.matmul %293, %14, %cst_152 {dimension_numbers = #tpu.dot_dimension_numbers<[1], [0], [0], [1], [0, 0, 1, 1], [], []>} : vector<32x32xf32>, vector<32x16xf32>, vector<32x16xf32> -> vector<32x16xf32>
    %295 = vector.broadcast %15 : vector<1x16xf32> to vector<32x16xf32>
    %296 = arith.addf %294, %295 : vector<32x16xf32>
    %297 = arith.mulf %17, %17 : vector<10x16xf32>
    %cst_153 = arith.constant dense<0.000000e+00> : vector<10xf32>
    %298 = vector.multi_reduction <add>, %297, %cst_153 [1] : vector<10x16xf32> to vector<10xf32>
    %299 = vector.shape_cast %298 : vector<10xf32> to vector<10x1xf32>
    %300 = tpu.transpose %299, [1, 0] : vector<10x1xf32> -> vector<1x10xf32>
    %cst_154 = arith.constant dense<0.000000e+00> : vector<32x10xf32>
    %301 = tpu.matmul %296, %17, %cst_154 {dimension_numbers = #tpu.dot_dimension_numbers<[1], [1], [0], [0], [0, 0, 1, 0], [], []>} : vector<32x16xf32>, vector<10x16xf32>, vector<32x10xf32> -> vector<32x10xf32>
    %cst_155 = arith.constant 2.000000e+00 : f32
    %302 = vector.broadcast %cst_155 : f32 to vector<32x10xf32>
    %303 = arith.mulf %302, %301 : vector<32x10xf32>
    %304 = vector.broadcast %300 : vector<1x10xf32> to vector<32x10xf32>
    %305 = arith.subf %304, %303 : vector<32x10xf32>
    %cst_156 = arith.constant 0.000000e+00 : f32
    %306 = vector.broadcast %cst_156 : f32 to vector<32x10xf32>
    %307 = arith.subf %306, %305 : vector<32x10xf32>
    %cst_157 = arith.constant dense<0xFF800000> : vector<32xf32>
    %308 = vector.multi_reduction <maximumf>, %307, %cst_157 [1] : vector<32x10xf32> to vector<32xf32>
    %309 = vector.shape_cast %308 : vector<32xf32> to vector<32x1xf32>
    %310 = vector.broadcast %309 : vector<32x1xf32> to vector<32x10xf32>
    %311 = arith.subf %307, %310 : vector<32x10xf32>
    %312 = math.exp %311 : vector<32x10xf32>
    %cst_158 = arith.constant dense<0.000000e+00> : vector<32xf32>
    %313 = vector.multi_reduction <add>, %312, %cst_158 [1] : vector<32x10xf32> to vector<32xf32>
    %314 = vector.shape_cast %313 : vector<32xf32> to vector<32x1xf32>
    %315 = vector.broadcast %314 : vector<32x1xf32> to vector<32x10xf32>
    %316 = arith.divf %312, %315 : vector<32x10xf32>
    %317 = tpu.iota {dimensions = array<i32: 1>} : vector<32x10xi32>
    %cst_159 = arith.constant dense<0x7F800000> : vector<32xf32>
    %318 = vector.multi_reduction <minimumf>, %305, %cst_159 [1] : vector<32x10xf32> to vector<32xf32>
    %319 = vector.shape_cast %318 : vector<32xf32> to vector<32x1xf32>
    %320 = vector.broadcast %319 : vector<32x1xf32> to vector<32x10xf32>
    %321 = arith.cmpf oeq, %305, %320 : vector<32x10xf32>
    %c10_i32_160 = arith.constant 10 : i32
    %322 = vector.broadcast %c10_i32_160 : i32 to vector<32x10xi32>
    %323 = arith.select %321, %317, %322 : vector<32x10xi1>, vector<32x10xi32>
    %cst_161 = arith.constant dense<2147483647> : vector<32xi32>
    %324 = vector.multi_reduction <minsi>, %323, %cst_161 [1] : vector<32x10xi32> to vector<32xi32>
    %325 = vector.shape_cast %324 : vector<32xi32> to vector<32x1xi32>
    %326 = vector.broadcast %325 : vector<32x1xi32> to vector<32x10xi32>
    %327 = arith.cmpi eq, %317, %326 : vector<32x10xi32>
    %328 = arith.extui %327 : vector<32x10xi1> to vector<32x10xi32>
    %329 = arith.sitofp %328 : vector<32x10xi32> to vector<32x10xf32>
    %cst_162 = arith.constant dense<0.000000e+00> : vector<32x16xf32>
    %330 = tpu.matmul %329, %17, %cst_162 {dimension_numbers = #tpu.dot_dimension_numbers<[1], [0], [0], [1], [0, 0, 1, 1], [], []>} : vector<32x10xf32>, vector<10x16xf32>, vector<32x16xf32> -> vector<32x16xf32>
    %331 = arith.subf %330, %296 : vector<32x16xf32>
    %332 = arith.mulf %331, %331 : vector<32x16xf32>
    %cst_163 = arith.constant dense<0.000000e+00> : vector<32xf32>
    %333 = vector.multi_reduction <add>, %332, %cst_163 [1] : vector<32x16xf32> to vector<32xf32>
    %334 = vector.shape_cast %333 : vector<32xf32> to vector<32x1xf32>
    %cst_164 = arith.constant dense<0.000000e+00> : vector<1xf32>
    %335 = vector.multi_reduction <add>, %334, %cst_164 [0] : vector<32x1xf32> to vector<1xf32>
    %336 = vector.shape_cast %335 : vector<1xf32> to vector<1x1xf32>
    %cst_165 = arith.constant dense<0.000000e+00> : vector<32x128xf32>
    %337 = tpu.matmul %277, %21, %cst_165 {dimension_numbers = #tpu.dot_dimension_numbers<[1], [0], [0], [1], [0, 0, 1, 1], [], []>} : vector<32x16xf32>, vector<16x128xf32>, vector<32x128xf32> -> vector<32x128xf32>
    %cst_166 = arith.constant dense<0.000000e+00> : vector<32x128xf32>
    %338 = tpu.matmul %330, %22, %cst_166 {dimension_numbers = #tpu.dot_dimension_numbers<[1], [0], [0], [1], [0, 0, 1, 1], [], []>} : vector<32x16xf32>, vector<16x128xf32>, vector<32x128xf32> -> vector<32x128xf32>
    %339 = arith.addf %337, %338 : vector<32x128xf32>
    %340 = vector.broadcast %23 : vector<1x128xf32> to vector<32x128xf32>
    %341 = arith.addf %339, %340 : vector<32x128xf32>
    %342 = vector.extract_strided_slice %341 {offsets = [0, 0], sizes = [32, 32], strides = [1, 1]} : vector<32x128xf32> to vector<32x32xf32>
    %cst_167 = arith.constant dense<0.000000e+00> : vector<32x32xf32>
    %343 = tpu.matmul %342, %24, %cst_167 {dimension_numbers = #tpu.dot_dimension_numbers<[1], [0], [0], [1], [0, 0, 1, 1], [], []>} : vector<32x32xf32>, vector<32x32xf32>, vector<32x32xf32> -> vector<32x32xf32>
    %344 = vector.broadcast %25 : vector<1x32xf32> to vector<32x32xf32>
    %345 = arith.addf %343, %344 : vector<32x32xf32>
    %cst_168 = arith.constant 0.000000e+00 : f32
    %346 = vector.broadcast %cst_168 : f32 to vector<32x32xf32>
    %347 = arith.cmpf oge, %345, %346 : vector<32x32xf32>
    %cst_169 = arith.constant 1.000000e-01 : f32
    %348 = vector.broadcast %cst_169 : f32 to vector<32x32xf32>
    %349 = arith.mulf %348, %345 : vector<32x32xf32>
    %350 = arith.select %347, %345, %349 : vector<32x32xi1>, vector<32x32xf32>
    %cst_170 = arith.constant dense<0.000000e+00> : vector<32x32xf32>
    %351 = tpu.matmul %350, %26, %cst_170 {dimension_numbers = #tpu.dot_dimension_numbers<[1], [0], [0], [1], [0, 0, 1, 1], [], []>} : vector<32x32xf32>, vector<32x32xf32>, vector<32x32xf32> -> vector<32x32xf32>
    %352 = vector.broadcast %27 : vector<1x32xf32> to vector<32x32xf32>
    %353 = arith.addf %351, %352 : vector<32x32xf32>
    %354 = arith.addf %353, %342 : vector<32x32xf32>
    %cst_171 = arith.constant dense<0.000000e+00> : vector<32x48xf32>
    %355 = tpu.matmul %354, %28, %cst_171 {dimension_numbers = #tpu.dot_dimension_numbers<[1], [0], [0], [1], [0, 0, 1, 1], [], []>} : vector<32x32xf32>, vector<32x48xf32>, vector<32x48xf32> -> vector<32x48xf32>
    %356 = vector.broadcast %29 : vector<1x48xf32> to vector<32x48xf32>
    %357 = arith.addf %355, %356 : vector<32x48xf32>
    %cst_172 = arith.constant 0.000000e+00 : f32
    %358 = vector.broadcast %cst_172 : f32 to vector<32x48xf32>
    %359 = arith.cmpf oge, %357, %358 : vector<32x48xf32>
    %cst_173 = arith.constant 1.000000e-01 : f32
    %360 = vector.broadcast %cst_173 : f32 to vector<32x48xf32>
    %361 = arith.mulf %360, %357 : vector<32x48xf32>
    %362 = arith.select %359, %357, %361 : vector<32x48xi1>, vector<32x48xf32>
    %cst_174 = arith.constant dense<0.000000e+00> : vector<32x48xf32>
    %363 = tpu.matmul %362, %30, %cst_174 {dimension_numbers = #tpu.dot_dimension_numbers<[1], [0], [0], [1], [0, 0, 1, 1], [], []>} : vector<32x48xf32>, vector<48x48xf32>, vector<32x48xf32> -> vector<32x48xf32>
    %364 = vector.broadcast %31 : vector<1x48xf32> to vector<32x48xf32>
    %365 = arith.addf %363, %364 : vector<32x48xf32>
    %cst_175 = arith.constant dense<0.000000e+00> : vector<32x48xf32>
    %366 = tpu.matmul %354, %32, %cst_175 {dimension_numbers = #tpu.dot_dimension_numbers<[1], [0], [0], [1], [0, 0, 1, 1], [], []>} : vector<32x32xf32>, vector<32x48xf32>, vector<32x48xf32> -> vector<32x48xf32>
    %367 = vector.broadcast %33 : vector<1x48xf32> to vector<32x48xf32>
    %368 = arith.addf %366, %367 : vector<32x48xf32>
    %369 = arith.addf %365, %368 : vector<32x48xf32>
    %370 = arith.subf %369, %208 : vector<32x48xf32>
    %371 = arith.mulf %370, %370 : vector<32x48xf32>
    %cst_176 = arith.constant dense<0.000000e+00> : vector<32xf32>
    %372 = vector.multi_reduction <add>, %371, %cst_176 [1] : vector<32x48xf32> to vector<32xf32>
    %373 = vector.shape_cast %372 : vector<32xf32> to vector<32x1xf32>
    %cst_177 = arith.constant dense<0.000000e+00> : vector<1xf32>
    %374 = vector.multi_reduction <add>, %373, %cst_177 [0] : vector<32x1xf32> to vector<1xf32>
    %375 = vector.shape_cast %374 : vector<1xf32> to vector<1x1xf32>
    %c0_178 = arith.constant 0 : index
    %c0_179 = arith.constant 0 : index
    %376 = vector.load %arg37[%c0_178, %c0_179] : memref<32x128xf32, #tpu.memory_space<vmem>>, vector<32x128xf32>
    tpu.vector_store %arg37[%c0_178, %c0_179], %170 {strides = array<i32>} : memref<32x128xf32, #tpu.memory_space<vmem>>, vector<32x128xf32>,
    %377 = arith.addf %112, %283 : vector<1x1xf32>
    %378 = arith.addf %165, %336 : vector<1x1xf32>
    %379 = arith.addf %204, %375 : vector<1x1xf32>
    %380 = arith.addf %92, %263 : vector<32x12xf32>
    %cst_180 = arith.constant 5.000000e-01 : f32
    %381 = vector.broadcast %cst_180 : f32 to vector<32x12xf32>
    %382 = arith.mulf %381, %380 : vector<32x12xf32>
    %cst_181 = arith.constant 9.99999996E-13 : f32
    %383 = vector.broadcast %cst_181 : f32 to vector<32x12xf32>
    %384 = arith.maximumf %382, %383 : vector<32x12xf32>
    %385 = math.log %384 : vector<32x12xf32>
    %cst_182 = arith.constant 9.99999996E-13 : f32
    %386 = vector.broadcast %cst_182 : f32 to vector<32x12xf32>
    %387 = arith.maximumf %92, %386 : vector<32x12xf32>
    %388 = math.log %387 : vector<32x12xf32>
    %cst_183 = arith.constant 0.000000e+00 : f32
    %389 = vector.broadcast %cst_183 : f32 to vector<32x12xf32>
    %390 = arith.cmpf ogt, %92, %389 : vector<32x12xf32>
    %391 = arith.subf %388, %385 : vector<32x12xf32>
    %392 = arith.mulf %92, %391 : vector<32x12xf32>
    %cst_184 = arith.constant 0.000000e+00 : f32
    %393 = vector.broadcast %cst_184 : f32 to vector<32x12xf32>
    %394 = arith.select %390, %392, %393 : vector<32x12xi1>, vector<32x12xf32>
    %cst_185 = arith.constant dense<0.000000e+00> : vector<32xf32>
    %395 = vector.multi_reduction <add>, %394, %cst_185 [1] : vector<32x12xf32> to vector<32xf32>
    %396 = vector.shape_cast %395 : vector<32xf32> to vector<32x1xf32>
    %cst_186 = arith.constant dense<0.000000e+00> : vector<1xf32>
    %397 = vector.multi_reduction <add>, %396, %cst_186 [0] : vector<32x1xf32> to vector<1xf32>
    %398 = vector.shape_cast %397 : vector<1xf32> to vector<1x1xf32>
    %cst_187 = arith.constant 9.99999996E-13 : f32
    %399 = vector.broadcast %cst_187 : f32 to vector<32x12xf32>
    %400 = arith.maximumf %263, %399 : vector<32x12xf32>
    %401 = math.log %400 : vector<32x12xf32>
    %cst_188 = arith.constant 0.000000e+00 : f32
    %402 = vector.broadcast %cst_188 : f32 to vector<32x12xf32>
    %403 = arith.cmpf ogt, %263, %402 : vector<32x12xf32>
    %404 = arith.subf %401, %385 : vector<32x12xf32>
    %405 = arith.mulf %263, %404 : vector<32x12xf32>
    %cst_189 = arith.constant 0.000000e+00 : f32
    %406 = vector.broadcast %cst_189 : f32 to vector<32x12xf32>
    %407 = arith.select %403, %405, %406 : vector<32x12xi1>, vector<32x12xf32>
    %cst_190 = arith.constant dense<0.000000e+00> : vector<32xf32>
    %408 = vector.multi_reduction <add>, %407, %cst_190 [1] : vector<32x12xf32> to vector<32xf32>
    %409 = vector.shape_cast %408 : vector<32xf32> to vector<32x1xf32>
    %cst_191 = arith.constant dense<0.000000e+00> : vector<1xf32>
    %410 = vector.multi_reduction <add>, %409, %cst_191 [0] : vector<32x1xf32> to vector<1xf32>
    %411 = vector.shape_cast %410 : vector<1xf32> to vector<1x1xf32>
    %412 = arith.addf %398, %411 : vector<1x1xf32>
    %cst_192 = arith.constant 5.000000e-01 : f32
    %413 = vector.broadcast %cst_192 : f32 to vector<1x1xf32>
    %414 = arith.mulf %413, %412 : vector<1x1xf32>
    %415 = arith.addf %145, %316 : vector<32x10xf32>
    %cst_193 = arith.constant 5.000000e-01 : f32
    %416 = vector.broadcast %cst_193 : f32 to vector<32x10xf32>
    %417 = arith.mulf %416, %415 : vector<32x10xf32>
    %cst_194 = arith.constant 9.99999996E-13 : f32
    %418 = vector.broadcast %cst_194 : f32 to vector<32x10xf32>
    %419 = arith.maximumf %417, %418 : vector<32x10xf32>
    %420 = math.log %419 : vector<32x10xf32>
    %cst_195 = arith.constant 9.99999996E-13 : f32
    %421 = vector.broadcast %cst_195 : f32 to vector<32x10xf32>
    %422 = arith.maximumf %145, %421 : vector<32x10xf32>
    %423 = math.log %422 : vector<32x10xf32>
    %cst_196 = arith.constant 0.000000e+00 : f32
    %424 = vector.broadcast %cst_196 : f32 to vector<32x10xf32>
    %425 = arith.cmpf ogt, %145, %424 : vector<32x10xf32>
    %426 = arith.subf %423, %420 : vector<32x10xf32>
    %427 = arith.mulf %145, %426 : vector<32x10xf32>
    %cst_197 = arith.constant 0.000000e+00 : f32
    %428 = vector.broadcast %cst_197 : f32 to vector<32x10xf32>
    %429 = arith.select %425, %427, %428 : vector<32x10xi1>, vector<32x10xf32>
    %cst_198 = arith.constant dense<0.000000e+00> : vector<32xf32>
    %430 = vector.multi_reduction <add>, %429, %cst_198 [1] : vector<32x10xf32> to vector<32xf32>
    %431 = vector.shape_cast %430 : vector<32xf32> to vector<32x1xf32>
    %cst_199 = arith.constant dense<0.000000e+00> : vector<1xf32>
    %432 = vector.multi_reduction <add>, %431, %cst_199 [0] : vector<32x1xf32> to vector<1xf32>
    %433 = vector.shape_cast %432 : vector<1xf32> to vector<1x1xf32>
    %cst_200 = arith.constant 9.99999996E-13 : f32
    %434 = vector.broadcast %cst_200 : f32 to vector<32x10xf32>
    %435 = arith.maximumf %316, %434 : vector<32x10xf32>
    %436 = math.log %435 : vector<32x10xf32>
    %cst_201 = arith.constant 0.000000e+00 : f32
    %437 = vector.broadcast %cst_201 : f32 to vector<32x10xf32>
    %438 = arith.cmpf ogt, %316, %437 : vector<32x10xf32>
    %439 = arith.subf %436, %420 : vector<32x10xf32>
    %440 = arith.mulf %316, %439 : vector<32x10xf32>
    %cst_202 = arith.constant 0.000000e+00 : f32
    %441 = vector.broadcast %cst_202 : f32 to vector<32x10xf32>
    %442 = arith.select %438, %440, %441 : vector<32x10xi1>, vector<32x10xf32>
    %cst_203 = arith.constant dense<0.000000e+00> : vector<32xf32>
    %443 = vector.multi_reduction <add>, %442, %cst_203 [1] : vector<32x10xf32> to vector<32xf32>
    %444 = vector.shape_cast %443 : vector<32xf32> to vector<32x1xf32>
    %cst_204 = arith.constant dense<0.000000e+00> : vector<1xf32>
    %445 = vector.multi_reduction <add>, %444, %cst_204 [0] : vector<32x1xf32> to vector<1xf32>
    %446 = vector.shape_cast %445 : vector<1xf32> to vector<1x1xf32>
    %447 = arith.addf %433, %446 : vector<1x1xf32>
    %cst_205 = arith.constant 5.000000e-01 : f32
    %448 = vector.broadcast %cst_205 : f32 to vector<1x1xf32>
    %449 = arith.mulf %448, %447 : vector<1x1xf32>
    %450 = tpu.iota {dimensions = array<i32: 1>} : vector<8x128xi32>
    %451 = tpu.iota {dimensions = array<i32: 0>} : vector<8x128xi32>
    %cst_206 = arith.constant 0.000000e+00 : f32
    %452 = vector.broadcast %cst_206 : f32 to vector<8x128xf32>
    %c0_i32 = arith.constant 0 : i32
    %453 = vector.broadcast %c0_i32 : i32 to vector<8x128xi32>
    %454 = arith.cmpi eq, %451, %453 : vector<8x128xi32>
    %c0_i32_207 = arith.constant 0 : i32
    %455 = vector.broadcast %c0_i32_207 : i32 to vector<8x128xi32>
    %456 = arith.cmpi eq, %450, %455 : vector<8x128xi32>
    %457 = arith.andi %454, %456 : vector<8x128xi1>
    %cst_208 = arith.constant 0.000000e+00 : f32
    %458 = vector.shape_cast %377 : vector<1x1xf32> to vector<1x1xf32>
    %459 = vector.broadcast %458 : vector<1x1xf32> to vector<8x128xf32>
    %460 = vector.broadcast %cst_208 : f32 to vector<8x128xf32>
    %461 = arith.select %457, %459, %460 : vector<8x128xi1>, vector<8x128xf32>
    %462 = arith.addf %452, %461 : vector<8x128xf32>
    %c0_i32_209 = arith.constant 0 : i32
    %463 = vector.broadcast %c0_i32_209 : i32 to vector<8x128xi32>
    %464 = arith.cmpi eq, %451, %463 : vector<8x128xi32>
    %c1_i32 = arith.constant 1 : i32
    %465 = vector.broadcast %c1_i32 : i32 to vector<8x128xi32>
    %466 = arith.cmpi eq, %450, %465 : vector<8x128xi32>
    %467 = arith.andi %464, %466 : vector<8x128xi1>
    %cst_210 = arith.constant 0.000000e+00 : f32
    %468 = vector.shape_cast %378 : vector<1x1xf32> to vector<1x1xf32>
    %469 = vector.broadcast %468 : vector<1x1xf32> to vector<8x128xf32>
    %470 = vector.broadcast %cst_210 : f32 to vector<8x128xf32>
    %471 = arith.select %467, %469, %470 : vector<8x128xi1>, vector<8x128xf32>
    %472 = arith.addf %462, %471 : vector<8x128xf32>
    %c0_i32_211 = arith.constant 0 : i32
    %473 = vector.broadcast %c0_i32_211 : i32 to vector<8x128xi32>
    %474 = arith.cmpi eq, %451, %473 : vector<8x128xi32>
    %c2_i32 = arith.constant 2 : i32
    %475 = vector.broadcast %c2_i32 : i32 to vector<8x128xi32>
    %476 = arith.cmpi eq, %450, %475 : vector<8x128xi32>
    %477 = arith.andi %474, %476 : vector<8x128xi1>
    %cst_212 = arith.constant 0.000000e+00 : f32
    %478 = vector.shape_cast %379 : vector<1x1xf32> to vector<1x1xf32>
    %479 = vector.broadcast %478 : vector<1x1xf32> to vector<8x128xf32>
    %480 = vector.broadcast %cst_212 : f32 to vector<8x128xf32>
    %481 = arith.select %477, %479, %480 : vector<8x128xi1>, vector<8x128xf32>
    %482 = arith.addf %472, %481 : vector<8x128xf32>
    %c0_i32_213 = arith.constant 0 : i32
    %483 = vector.broadcast %c0_i32_213 : i32 to vector<8x128xi32>
    %484 = arith.cmpi eq, %451, %483 : vector<8x128xi32>
    %c3_i32 = arith.constant 3 : i32
    %485 = vector.broadcast %c3_i32 : i32 to vector<8x128xi32>
    %486 = arith.cmpi eq, %450, %485 : vector<8x128xi32>
    %487 = arith.andi %484, %486 : vector<8x128xi1>
    %cst_214 = arith.constant 0.000000e+00 : f32
    %488 = vector.shape_cast %414 : vector<1x1xf32> to vector<1x1xf32>
    %489 = vector.broadcast %488 : vector<1x1xf32> to vector<8x128xf32>
    %490 = vector.broadcast %cst_214 : f32 to vector<8x128xf32>
    %491 = arith.select %487, %489, %490 : vector<8x128xi1>, vector<8x128xf32>
    %492 = arith.addf %482, %491 : vector<8x128xf32>
    %c0_i32_215 = arith.constant 0 : i32
    %493 = vector.broadcast %c0_i32_215 : i32 to vector<8x128xi32>
    %494 = arith.cmpi eq, %451, %493 : vector<8x128xi32>
    %c4_i32 = arith.constant 4 : i32
    %495 = vector.broadcast %c4_i32 : i32 to vector<8x128xi32>
    %496 = arith.cmpi eq, %450, %495 : vector<8x128xi32>
    %497 = arith.andi %494, %496 : vector<8x128xi1>
    %cst_216 = arith.constant 0.000000e+00 : f32
    %498 = vector.shape_cast %449 : vector<1x1xf32> to vector<1x1xf32>
    %499 = vector.broadcast %498 : vector<1x1xf32> to vector<8x128xf32>
    %500 = vector.broadcast %cst_216 : f32 to vector<8x128xf32>
    %501 = arith.select %497, %499, %500 : vector<8x128xi1>, vector<8x128xf32>
    %502 = arith.addf %492, %501 : vector<8x128xf32>
    %c0_217 = arith.constant 0 : index
    %c0_218 = arith.constant 0 : index
    %503 = vector.load %arg38[%c0_217, %c0_218] : memref<8x128xf32, #tpu.memory_space<vmem>>, vector<8x128xf32>
    tpu.vector_store %arg38[%c0_217, %c0_218], %502 {strides = array<i32>} : memref<8x128xf32, #tpu.memory_space<vmem>>, vector<8x128xf32>,
    return
  }
  func.func @transform_0(%arg0: i32) -> (i32, i32) {
    %c0_i32 = arith.constant 0 : i32
    %c0_i32_0 = arith.constant 0 : i32
    return %arg0, %c0_i32 : i32, i32
  }
  func.func @transform_1(%arg0: i32) -> (i32, i32) {
    %c1_i32 = arith.constant 1 : i32
    %0 = arith.addi %arg0, %c1_i32 : i32
    %c0_i32 = arith.constant 0 : i32
    %c0_i32_0 = arith.constant 0 : i32
    return %0, %c0_i32 : i32, i32
  }
  func.func @transform_2(%arg0: i32) -> (i32, i32) {
    %c0_i32 = arith.constant 0 : i32
    %c0_i32_0 = arith.constant 0 : i32
    %c0_i32_1 = arith.constant 0 : i32
    return %c0_i32, %c0_i32_0 : i32, i32
  }
  func.func @transform_3(%arg0: i32) -> (i32, i32) {
    %c0_i32 = arith.constant 0 : i32
    %c0_i32_0 = arith.constant 0 : i32
    %c0_i32_1 = arith.constant 0 : i32
    return %c0_i32, %c0_i32_0 : i32, i32
  }
  func.func @transform_4(%arg0: i32) -> (i32, i32) {
    %c0_i32 = arith.constant 0 : i32
    %c0_i32_0 = arith.constant 0 : i32
    %c0_i32_1 = arith.constant 0 : i32
    return %c0_i32, %c0_i32_0 : i32, i32
  }
  func.func @transform_5(%arg0: i32) -> (i32, i32) {
    %c0_i32 = arith.constant 0 : i32
    %c0_i32_0 = arith.constant 0 : i32
    %c0_i32_1 = arith.constant 0 : i32
    return %c0_i32, %c0_i32_0 : i32, i32
  }
  func.func @transform_6(%arg0: i32) -> (i32, i32) {
    %c0_i32 = arith.constant 0 : i32
    %c0_i32_0 = arith.constant 0 : i32
    %c0_i32_1 = arith.constant 0 : i32
    return %c0_i32, %c0_i32_0 : i32, i32
  }
  func.func @transform_7(%arg0: i32) -> (i32, i32) {
    %c0_i32 = arith.constant 0 : i32
    %c0_i32_0 = arith.constant 0 : i32
    %c0_i32_1 = arith.constant 0 : i32
    return %c0_i32, %c0_i32_0 : i32, i32
  }
  func.func @transform_8(%arg0: i32) -> (i32, i32) {
    %c0_i32 = arith.constant 0 : i32
    %c0_i32_0 = arith.constant 0 : i32
    %c0_i32_1 = arith.constant 0 : i32
    return %c0_i32, %c0_i32_0 : i32, i32
  }
  func.func @transform_9(%arg0: i32) -> (i32, i32) {
    %c0_i32 = arith.constant 0 : i32
    %c0_i32_0 = arith.constant 0 : i32
    %c0_i32_1 = arith.constant 0 : i32
    return %c0_i32, %c0_i32_0 : i32, i32
  }
  func.func @transform_10(%arg0: i32) -> (i32, i32) {
    %c0_i32 = arith.constant 0 : i32
    %c0_i32_0 = arith.constant 0 : i32
    %c0_i32_1 = arith.constant 0 : i32
    return %c0_i32, %c0_i32_0 : i32, i32
  }
  func.func @transform_11(%arg0: i32) -> (i32, i32) {
    %c0_i32 = arith.constant 0 : i32
    %c0_i32_0 = arith.constant 0 : i32
    %c0_i32_1 = arith.constant 0 : i32
    return %c0_i32, %c0_i32_0 : i32, i32
  }
  func.func @transform_12(%arg0: i32) -> (i32, i32) {
    %c0_i32 = arith.constant 0 : i32
    %c0_i32_0 = arith.constant 0 : i32
    %c0_i32_1 = arith.constant 0 : i32
    return %c0_i32, %c0_i32_0 : i32, i32
  }
  func.func @transform_13(%arg0: i32) -> (i32, i32) {
    %c0_i32 = arith.constant 0 : i32
    %c0_i32_0 = arith.constant 0 : i32
    %c0_i32_1 = arith.constant 0 : i32
    return %c0_i32, %c0_i32_0 : i32, i32
  }
  func.func @transform_14(%arg0: i32) -> (i32, i32) {
    %c0_i32 = arith.constant 0 : i32
    %c0_i32_0 = arith.constant 0 : i32
    %c0_i32_1 = arith.constant 0 : i32
    return %c0_i32, %c0_i32_0 : i32, i32
  }
  func.func @transform_15(%arg0: i32) -> (i32, i32) {
    %c0_i32 = arith.constant 0 : i32
    %c0_i32_0 = arith.constant 0 : i32
    %c0_i32_1 = arith.constant 0 : i32
    return %c0_i32, %c0_i32_0 : i32, i32
  }
  func.func @transform_16(%arg0: i32) -> (i32, i32) {
    %c0_i32 = arith.constant 0 : i32
    %c0_i32_0 = arith.constant 0 : i32
    %c0_i32_1 = arith.constant 0 : i32
    return %c0_i32, %c0_i32_0 : i32, i32
  }
  func.func @transform_17(%arg0: i32) -> (i32, i32) {
    %c0_i32 = arith.constant 0 : i32
    %c0_i32_0 = arith.constant 0 : i32
    %c0_i32_1 = arith.constant 0 : i32
    return %c0_i32, %c0_i32_0 : i32, i32
  }
  func.func @transform_18(%arg0: i32) -> (i32, i32) {
    %c0_i32 = arith.constant 0 : i32
    %c0_i32_0 = arith.constant 0 : i32
    %c0_i32_1 = arith.constant 0 : i32
    return %c0_i32, %c0_i32_0 : i32, i32
  }
  func.func @transform_19(%arg0: i32) -> (i32, i32) {
    %c0_i32 = arith.constant 0 : i32
    %c0_i32_0 = arith.constant 0 : i32
    %c0_i32_1 = arith.constant 0 : i32
    return %c0_i32, %c0_i32_0 : i32, i32
  }
  func.func @transform_20(%arg0: i32) -> (i32, i32) {
    %c0_i32 = arith.constant 0 : i32
    %c0_i32_0 = arith.constant 0 : i32
    %c0_i32_1 = arith.constant 0 : i32
    return %c0_i32, %c0_i32_0 : i32, i32
  }
  func.func @transform_21(%arg0: i32) -> (i32, i32) {
    %c0_i32 = arith.constant 0 : i32
    %c0_i32_0 = arith.constant 0 : i32
    %c0_i32_1 = arith.constant 0 : i32
    return %c0_i32, %c0_i32_0 : i32, i32
  }
  func.func @transform_22(%arg0: i32) -> (i32, i32) {
    %c0_i32 = arith.constant 0 : i32
    %c0_i32_0 = arith.constant 0 : i32
    %c0_i32_1 = arith.constant 0 : i32
    return %c0_i32, %c0_i32_0 : i32, i32
  }
  func.func @transform_23(%arg0: i32) -> (i32, i32) {
    %c0_i32 = arith.constant 0 : i32
    %c0_i32_0 = arith.constant 0 : i32
    %c0_i32_1 = arith.constant 0 : i32
    return %c0_i32, %c0_i32_0 : i32, i32
  }
  func.func @transform_24(%arg0: i32) -> (i32, i32) {
    %c0_i32 = arith.constant 0 : i32
    %c0_i32_0 = arith.constant 0 : i32
    %c0_i32_1 = arith.constant 0 : i32
    return %c0_i32, %c0_i32_0 : i32, i32
  }
  func.func @transform_25(%arg0: i32) -> (i32, i32) {
    %c0_i32 = arith.constant 0 : i32
    %c0_i32_0 = arith.constant 0 : i32
    %c0_i32_1 = arith.constant 0 : i32
    return %c0_i32, %c0_i32_0 : i32, i32
  }
  func.func @transform_26(%arg0: i32) -> (i32, i32) {
    %c0_i32 = arith.constant 0 : i32
    %c0_i32_0 = arith.constant 0 : i32
    %c0_i32_1 = arith.constant 0 : i32
    return %c0_i32, %c0_i32_0 : i32, i32
  }
  func.func @transform_27(%arg0: i32) -> (i32, i32) {
    %c0_i32 = arith.constant 0 : i32
    %c0_i32_0 = arith.constant 0 : i32
    %c0_i32_1 = arith.constant 0 : i32
    return %c0_i32, %c0_i32_0 : i32, i32
  }
  func.func @transform_28(%arg0: i32) -> (i32, i32) {
    %c0_i32 = arith.constant 0 : i32
    %c0_i32_0 = arith.constant 0 : i32
    %c0_i32_1 = arith.constant 0 : i32
    return %c0_i32, %c0_i32_0 : i32, i32
  }
  func.func @transform_29(%arg0: i32) -> (i32, i32) {
    %c0_i32 = arith.constant 0 : i32
    %c0_i32_0 = arith.constant 0 : i32
    %c0_i32_1 = arith.constant 0 : i32
    return %c0_i32, %c0_i32_0 : i32, i32
  }
  func.func @transform_30(%arg0: i32) -> (i32, i32) {
    %c0_i32 = arith.constant 0 : i32
    %c0_i32_0 = arith.constant 0 : i32
    %c0_i32_1 = arith.constant 0 : i32
    return %c0_i32, %c0_i32_0 : i32, i32
  }
  func.func @transform_31(%arg0: i32) -> (i32, i32) {
    %c0_i32 = arith.constant 0 : i32
    %c0_i32_0 = arith.constant 0 : i32
    %c0_i32_1 = arith.constant 0 : i32
    return %c0_i32, %c0_i32_0 : i32, i32
  }
  func.func @transform_32(%arg0: i32) -> (i32, i32) {
    %c0_i32 = arith.constant 0 : i32
    %c0_i32_0 = arith.constant 0 : i32
    %c0_i32_1 = arith.constant 0 : i32
    return %c0_i32, %c0_i32_0 : i32, i32
  }
  func.func @transform_33(%arg0: i32) -> (i32, i32) {
    %c0_i32 = arith.constant 0 : i32
    %c0_i32_0 = arith.constant 0 : i32
    %c0_i32_1 = arith.constant 0 : i32
    return %c0_i32, %c0_i32_0 : i32, i32
  }
  func.func @transform_34(%arg0: i32) -> (i32, i32) {
    %c0_i32 = arith.constant 0 : i32
    %c0_i32_0 = arith.constant 0 : i32
    %c0_i32_1 = arith.constant 0 : i32
    return %c0_i32, %c0_i32_0 : i32, i32
  }
  func.func @transform_35(%arg0: i32) -> (i32, i32) {
    %c0_i32 = arith.constant 0 : i32
    %c0_i32_0 = arith.constant 0 : i32
    %c0_i32_1 = arith.constant 0 : i32
    return %c0_i32, %c0_i32_0 : i32, i32
  }
  func.func @transform_36(%arg0: i32) -> (i32, i32) {
    %c0_i32 = arith.constant 0 : i32
    %c0_i32_0 = arith.constant 0 : i32
    return %arg0, %c0_i32 : i32, i32
  }
  func.func @transform_37(%arg0: i32) -> (i32, i32) {
    %c0_i32 = arith.constant 0 : i32
    %c0_i32_0 = arith.constant 0 : i32
    return %arg0, %c0_i32 : i32, i32
  }
}

</mosaic_0001>

<bundles_post_ra>
// kernel: forward.3
= control target key start
LH: loop header
LB: loop body
LE: loop exit
PB: predicated region body
PF: predicated region fallthrough
CT: control target
= control target key end

     0   :  { %s7416_s3 = smov 2   ;;  %s7417_s10 = smov 4   ;;  %vm274_vm0 = vcmask 392192   ;;  %vm493_vm3 = vcmask 261120   ;;  %vm1025_vm10 = vcmask 130048   ;;  %vm1029_vm12 = vcmask 125952   ;;  %s9004_s0 = inlined_call_operand.smem [shape: u32[38], index: -1, kind: input, shape index: {}] }
   0x1   :  { %s5723_s6 = sld [smem:[%s9004_s0 + %s7416_s3]]   ;;  %s7418_s14 = smov 6   ;;  %vm7665_vm11 = vmpackc.low %vm1025_vm10, %vm1025_vm10 }
   0x2   :  { %s7466_s9 = sld [smem:[%s9004_s0]]   ;;  %s7419_s18 = smov 3  }
   0x3   :  { %s7471_s13 = sld [smem:[%s9004_s0 + %s7417_s10]]   ;;  %s7420_s22 = smov 8  }
   0x4   :  { %s5727_s17 = sld [smem:[%s9004_s0 + %s7418_s14]]   ;;  %s7421_s26 = smov 5  }
   0x5   :  { %s7521_s21 = sld [smem:[%s9004_s0 + %s7419_s18]]   ;;  %s7422_s30 = smov 10  }
   0x6   :  { %s7543_s25 = sld [smem:[%s9004_s0 + %s7420_s22]]   ;;  %s7423_s4 = smov 12  }
   0x7   :  { %v175_v0 = vld [vmem:[%s5723_s6] sm:$0xff]  ;;  %v176_v1 = vld [vmem:[%s5723_s6 + $0x8] sm:$0xff]  ;;  %v177_v2 = vld [vmem:[%s5723_s6 + $0x10] sm:$0xff]  ;;  %s7557_s29 = sld [smem:[%s9004_s0 + %s7421_s26]]   ;;  %s7424_s8 = smov 7  }
   0x8   :  { %v7473_v3 = vpack.c.bf16 %v176_v1, %v175_v0  ;;  %v178_v4 = vld [vmem:[%s5723_s6 + $0x18] sm:$0xff]  ;;  %v179_v6 = vld [vmem:[%s5723_s6 + $0x20] sm:$0xff]  ;;  %v180_v7 = vld [vmem:[%s5723_s6 + $0x28] sm:$0xff]  ;;  %s7565_s3 = sld [smem:[%s9004_s0 + %s7422_s30]]   ;;  %s7425_s12 = smov 9  }
   0x9   :  { %v7475_v5 = vpack.c.bf16 %v178_v4, %v177_v2  ;;  %v264_v8 = vld [vmem:[%s7466_s9] sm:$0xff]  ;;  %v183_v10 = vld [vmem:[%s7471_s13 + $0x8] sm:$0xff]  ;;  %v184_v12 = vld [vmem:[%s7471_s13 + $0x10] sm:$0xff]  ;;  %v7488_v14 = vpack.c.bf16 %v180_v7, %v179_v6  ;;  %s5733_s7 = sld [smem:[%s9004_s0 + %s7423_s4]]   ;;  %s7426_s16 = smov 11  }
   0xa   :  { %6863 = vmatprep.subr.bf16.mxu0 %v7473_v3  ;;  %6310 = vmatprep.mubr.msk.f32.mxu0 %vm274_vm0, %v264_v8  ;;  %v182_v9 = vld [vmem:[%s7471_s13] sm:$0xff]  ;;  %v185_v13 = vld [vmem:[%s7471_s13 + $0x18] sm:$0xff]  ;;  %v265_v16 = vld [vmem:[%s7466_s9 + $0x8] sm:$0xff]  ;;  %s5728_s11 = sld [smem:[%s9004_s0 + %s7424_s8]]   ;;  %s7427_s20 = smov 14  }
   0xb   :  { %6865 = vmatpush3.bf16.msra.mxu0 %v7473_v3  ;;  %v7483_v11 = vpack.c.bf16 %v183_v10, %v182_v9  ;;  %v7490_v15 = vpack.c.bf16 %v185_v13, %v184_v12  ;;  %v266_v17 = vld [vmem:[%s7466_s9 + $0x10] sm:$0xff]  ;;  %v267_v18 = vld [vmem:[%s7466_s9 + $0x18] sm:$0xff]  ;;  %v186_v19 = vld [vmem:[%s7471_s13 + $0x20] sm:$0xff]  ;;  %s5730_s15 = sld [smem:[%s9004_s0 + %s7425_s12]]   ;;  %s7429_s30 = smov 13  }
   0xc   :  { %6867 = vmatprep.subr.bf16.mxu0 %v7475_v5  ;;  %v187_v20 = vld [vmem:[%s7471_s13 + $0x28] sm:$0xff]  ;;  %v189_v22 = vld [vmem:[%s5727_s17] sm:$0xff]  ;;  %v191_v34 = vld [vmem:[%s5727_s17 + $0x10] sm:$0xff]  ;;  %s7642_s19 = sld [smem:[%s9004_s0 + %s7426_s16]]   ;;  %s7430_s4 = smov 15  }
   0xd   :  { %6875 = vmatprep.subr.bf16.mxu1 %v7483_v11  ;;  %v7507_v21 = vpack.c.bf16 %v187_v20, %v186_v19  ;;  %v190_v23 = vld [vmem:[%s5727_s17 + $0x8] sm:$0xff]  ;;  %v5759_v25 = vld [vmem:[%s7521_s21] ss:$0 sm:$0xff]  ;;  %v192_v35 = vld [vmem:[%s5727_s17 + $0x18] sm:$0xff]  ;;  %s5735_s24 = sld [smem:[%s9004_s0 + %s7427_s20]]   ;;  %s7432_s8 = smov 21  }
   0xe   :  { %6877 = vmatpush3.bf16.msra.mxu1 %v7483_v11  ;;  %v7514_v24 = vpack.c.bf16 %v190_v23, %v189_v22  ;;  %v7545_v36 = vpack.c.bf16 %v192_v35, %v191_v34  ;;  %v194_v37 = vld [vmem:[%s7543_s25] sm:$0xff]  ;;  %v195_v38 = vld [vmem:[%s7543_s25 + $0x8] sm:$0xff]  ;;  %v196_v46 = vld [vmem:[%s7543_s25 + $0x10] sm:$0xff]  ;;  %s7434_s12 = smov 20   ;;  %s7435_s16 = smov 16  }
   0xf   :  { %6869 = vmatpush3.bf16.msra.mxu0 %v7475_v5  ;;  %6879 = vmatprep.subr.bf16.mxu1 %v7490_v15  ;;  %v7551_v39 = vpack.c.bf16 %v195_v38, %v194_v37  ;;  %v5764_v40 = vld [vmem:[%s7557_s29] ss:$0 sm:$0xff]  ;;  %v197_v47 = vld [vmem:[%s7543_s25 + $0x18] sm:$0xff]  ;;  %v199_v58 = vld [vmem:[%s7543_s25 + $0x28] sm:$0xff]  ;;  %s5737_s20 = sld [smem:[%s9004_s0 + %s7435_s16]]   ;;  %s7436_s22 = smov 19  }
  0x10   :  { %6871 = vmatprep.subr.bf16.mxu0 %v7488_v14  ;;  %v7567_v54 = vpack.c.bf16 %v197_v47, %v196_v46  ;;  %v198_v57 = vld [vmem:[%s7543_s25 + $0x20] sm:$0xff]  ;;  %v202_v0 = vld [vmem:[%s7565_s3 + $0x8] sm:$0xff]  ;;  %v203_v2 = vld [vmem:[%s7565_s3 + $0x10] sm:$0xff]  ;;  %s7428_s25 = smov 18   ;;  %s7437_s26 = smov 22  }
  0x11   :  { %v7575_v61 = vpack.c.bf16 %v199_v58, %v198_v57  ;;  %v201_v63 = vld [vmem:[%s7565_s3] sm:$0xff]  ;;  %v204_v4 = vld [vmem:[%s7565_s3 + $0x18] sm:$0xff]  ;;  %v207_v8 = vld [vmem:[%s5733_s7 + $0x8] sm:$0xff]  ;;  %s5739_s28 = sld [smem:[%s9004_s0 + %s7428_s25]]   ;;  %s7438_s1 = smov 17  }
  0x12   :  { %6881 = vmatpush3.bf16.msra.mxu1 %v7490_v15  ;;  %v7585_v1 = vpack.c.bf16 %v202_v0, %v201_v63  ;;  %v7598_v6 = vpack.c.bf16 %v204_v4, %v203_v2  ;;  %v206_v7 = vld [vmem:[%s5733_s7] sm:$0xff]  ;;  %s7681_s3 = sld [smem:[%s9004_s0 + %s7429_s30]]   ;;  %s7439_s6 = smov 24  }
  0x13   :  { %6873 = vmatpush3.bf16.msra.mxu0 %v7488_v14  ;;  %6883 = vmatprep.subr.bf16.mxu1 %v7507_v21  ;;  %v7605_v9 = vpack.c.bf16 %v207_v8, %v206_v7  ;;  %v5769_v10 = vld [vmem:[%s5728_s11] ss:$0 sm:$0xff]  ;;  %v213_v58 = vld [vmem:[%s5735_s24 + $0x10] sm:$0xff]  ;;  %s5742_s11 = sld [smem:[%s9004_s0 + %s7432_s8]]   ;;  %s7445_s8 = smov 30  }
  0x14   :  { %6887 = vmatprep.subr.bf16.mxu0 %v7514_v24  ;;  %v5774_v12 = vld [vmem:[%s5730_s15] ss:$0 sm:$0xff]  ;;  %s5741_s15 = sld [smem:[%s9004_s0 + %s7434_s12]]   ;;  %s7446_s12 = smov 27  }
  0x15   :  { %v5779_v35 = vld [vmem:[%s7642_s19] ss:$0 sm:$0xff]  ;;  %s5740_s25 = sld [smem:[%s9004_s0 + %s7436_s22]]   ;;  %s7447_s16 = smov 32  }
  0x16   :  { %6311 = vmatmul.mubr.msk.f32.vlgmr.msra.gmra.mrb[0].mxu0 %vm274_vm0, %v265_v16  ;;  %6885 = vmatpush3.bf16.msra.mxu1 %v7507_v21  ;;  %s7863_s30 = sld [smem:[%s9004_s0 + %s7437_s26]]   ;;  %s7448_s22 = smov 29  }
  0x17   :  { %6313 = vmatprep.mubr.msk.f32.mxu0 %vm274_vm0, %v266_v17  ;;  %6889 = vmatpush3.bf16.msra.mxu0 %v7514_v24  ;;  %v222_v63 = vld [vmem:[%s5739_s28 + $0x8] sm:$0xf]  ;;  %s7876_s5 = sld [smem:[%s9004_s0 + %s7438_s1]]   ;;  %s7444_s1 = smov 36  }
  0x18   :  { %6891 = vmatprep.subr.bf16.mxu0 %v7545_v36  ;;  %6915 = vmatprep.subr.bf16.mxu1 %v7605_v9  ;;  %v1024_v4 = vmul.f32 %v222_v63, %v222_v63  ;;  %s5745_s10 = sld [smem:[%s9004_s0 + %s7439_s6]]   ;;  %s7449_s26 = smov 1  }
  0x19   :  { %s5757_s6 = sld [smem:[%s9004_s0 + %s7444_s1]]  }
  0x1a   :  { %6314 = vmatmul.mubr.msk.f32.gmra.mrb[2].mxu0 %vm274_vm0, %v267_v18  ;;  %v7615_v18 = vadd.f32 %v5774_v12, %v5769_v10  ;;  %s5722_s2 = sld [smem:[%s9004_s0 + %s7449_s26]]  }
  0x1b   :  { %6893 = vmatpush3.bf16.msra.mxu0 %v7545_v36 }
  0x1c   :  { %6895 = vmatprep.subr.bf16.mxu0 %v7551_v39 }
  0xe9   :  { %v6312_v26 = vpop.f32.mrb[0].mxu0 }
  0xea   :  { %v353_v27 = vpop.f32.mrb[1].mxu0  ;;  %v7526_v29 = vadd.f32 %v6312_v26, %v5759_v25 }
  0xeb   :  { %v7524_v28 = vadd.f32 %v5759_v25, %v353_v27 }
  0xec   :  { %9060 = vst [vmem:[#allocation3_spill] sm:$0xff] %v7526_v29 }
  0xed   :  { %9059 = vst [vmem:[#allocation2_spill] sm:$0xff] %v7524_v28  ;;  %v6315_v30 = vpop.f32.mrb[2].mxu0  ;;  %6328 = vmatprep.mubr.msk.f32.mxu1 %vm274_vm0, %v7524_v28 }
  0xee   :  { %v7530_v31 = vadd.f32 %v6315_v30, %v5759_v25  ;;  %v363_v32 = vpop.f32.mrb[3].mxu0  ;;  %6329 = vmatmul.mubr.msk.f32.vlgmr.msra.gmra.mrb[0].mxu1 %vm274_vm0, %v7526_v29  ;;  %v208_v30 = vld [vmem:[%s5733_s7 + $0x10] sm:$0xff] }
  0xef   :  { %v7534_v33 = vadd.f32 %v5759_v25, %v363_v32  ;;  %6917 = vmatpush3.bf16.msra.mxu1 %v7605_v9  ;;  %v209_v32 = vld [vmem:[%s5733_s7 + $0x18] sm:$0xff]  ;;  %s7715_s7 = sld [smem:[%s9004_s0 + %s7430_s4]]   ;;  %s7450_s4 = smov 34  }
  0xf0   :  { %9061 = vst [vmem:[#allocation4_spill] sm:$0xff] %v7530_v31  ;;  %v7635_v34 = vpack.c.bf16 %v209_v32, %v208_v30  ;;  %s5755_s9 = sld [smem:[%s9004_s0 + %s7450_s4]]  }
  0xf1   :  { %9062 = vst [vmem:[#allocation5_spill] sm:$0xff] %v7534_v33  ;;  %6331 = vmatprep.mubr.msk.f32.mxu1 %vm274_vm0, %v7534_v33 }
  0xf2   :  { %6332 = vmatmul.mubr.msk.f32.gmra.mrb[2].mxu1 %vm274_vm0, %v7530_v31  ;;  %6919 = vmatprep.subr.bf16.mxu1 %v7635_v34 }
  0xf3   :  { %6921 = vmatpush3.bf16.msra.mxu1 %v7635_v34 }
 0x1c1   :  { %v6330_v41 = vpop.f32.mrb[0].mxu1 }
 0x1c2   :  { %v462_v42 = vadd.f32 %v6330_v41, %v5764_v40  ;;  %v456_v43 = vpop.f32.mrb[1].mxu1 }
 0x1c3   :  { %v457_v44 = vadd.f32 %v5764_v40, %v456_v43 }
 0x1c4   :  { %v480_v45 = vmul.f32 0.1, %v462_v42  ;;  %vm476_vm1 = vcmp.ge.f32.partialorder %v462_v42, 0.0 }
 0x1c5   :  { %vm475_vm2 = vcmp.ge.f32.partialorder %v457_v44, 0.0  ;;  %v479_v48 = vmul.f32 0.1, %v457_v44  ;;  %v6333_v49 = vpop.f32.mrb[2].mxu1 }
 0x1c6   :  { %v472_v50 = vadd.f32 %v6333_v49, %v5764_v40  ;;  %v466_v51 = vpop.f32.mrb[3].mxu1  ;;  %v484_v55 = vsel %vm476_vm1, %v462_v42, %v480_v45 }
 0x1c7   :  { %v467_v52 = vadd.f32 %v5764_v40, %v466_v51  ;;  %v483_v53 = vsel %vm475_vm2, %v457_v44, %v479_v48  ;;  %vm1184_vm2 = vcmask 97280  }
 0x1c8   :  { %v482_v56 = vmul.f32 0.1, %v472_v50  ;;  %6342 = vmatprep.mubr.msk.f32.mxu0 %vm493_vm3, %v483_v53  ;;  %vm478_vm4 = vcmp.ge.f32.partialorder %v472_v50, 0.0 }
 0x1c9   :  { %vm477_vm5 = vcmp.ge.f32.partialorder %v467_v52, 0.0  ;;  %v481_v59 = vmul.f32 0.1, %v467_v52  ;;  %6343 = vmatmul.mubr.msk.f32.vlgmr.msra.gmra.mrb[4].mxu0 %vm493_vm3, %v484_v55  ;;  %v211_v55 = vld [vmem:[%s5735_s24] sm:$0xff] }
 0x1ca   :  { %6897 = vmatpush3.bf16.msra.mxu0 %v7551_v39  ;;  %v486_v62 = vsel %vm478_vm4, %v472_v50, %v482_v56  ;;  %v212_v56 = vld [vmem:[%s5735_s24 + $0x8] sm:$0xff] }
 0x1cb   :  { %v485_v60 = vsel %vm477_vm5, %v467_v52, %v481_v59  ;;  %6899 = vmatprep.subr.bf16.mxu0 %v7567_v54  ;;  %v7652_v57 = vpack.c.bf16 %v212_v56, %v211_v55  ;;  %v214_v59 = vld [vmem:[%s5735_s24 + $0x18] sm:$0xff] }
 0x1cc   :  { %6345 = vmatprep.mubr.msk.f32.mxu0 %vm493_vm3, %v485_v60  ;;  %v7656_v60 = vpack.c.bf16 %v214_v59, %v213_v58  ;;  %v1172_v58 = vlaneseq }
 0x1cd   :  { %6346 = vmatmul.mubr.msk.f32.gmra.mrb[6].mxu0 %vm493_vm3, %v486_v62  ;;  %6923 = vmatprep.subr.bf16.mxu1 %v7652_v57  ;;  %v221_v62 = vld [vmem:[%s5739_s28] sm:$0xff] }
 0x1ce   :  { %6901 = vmatpush3.bf16.msra.mxu0 %v7567_v54  ;;  %6360 = vmatprep.mubr.msk.f32.mxu0 %vm274_vm0, %v7524_v28  ;;  %v1023_v2 = vmul.f32 %v221_v62, %v221_v62  ;;  %v7669_v7 = vpack.c.bf16 %v222_v63, %v221_v62  ;;  %v7734_v59 = vshrl.u32 %v1172_v58, 7 }
 0x1cf   :  { %6903 = vmatprep.subr.bf16.mxu0 %v7575_v61 }
 0x1d0   :  { %v1026_v8 = vsel %vm1025_vm10, %v1023_v2, 0.0  ;;  %9069 = vst [vmem:[#allocation10_spill] sm:$0xff] %v7734_v59  ;;  %v1174_v62 = vsub.s32 0, %v7734_v59 }
 0x1d1   :  { %1027 = vadd.xlane.f32.xlu0 %v1026_v8 }
 0x1d2   :  { %6905 = vmatpush3.bf16.msra.mxu0 %v7575_v61 }
 0x1d3   :  { %6907 = vmatprep.subr.bf16.mxu0 %v7585_v1 }
 0x1d5   :  { %6361 = vmatmul.mubr.msk.f32.vlgmr.msra.gmra.mrb[4].mxu0 %vm274_vm0, %v7526_v29 }
 0x1d6   :  { %6363 = vmatprep.mubr.msk.f32.mxu0 %vm274_vm0, %v7534_v33  ;;  %6909 = vmatpush3.bf16.msra.mxu0 %v7585_v1 }
 0x1d7   :  { %6911 = vmatprep.subr.bf16.mxu0 %v7598_v6 }
 0x1d9   :  { %6364 = vmatmul.mubr.msk.f32.gmra.mrb[6].mxu0 %vm274_vm0, %v7530_v31 }
 0x1da   :  { %6913 = vmatpush3.bf16.msra.mxu0 %v7598_v6 }
 0x1db   :  { %6932 = vmatprep.subr.msk.bf16.mxu0 %vm7665_vm11, %v7669_v7 }
 0x2a8   :  { %v6362_v13 = vpop.f32.mrb[4].mxu0 }
 0x2a9   :  { %v7190_v16 = vadd.f32 %v6362_v13, %v5769_v10  ;;  %v663_v17 = vpop.f32.mrb[5].mxu0 }
 0x2aa   :  { %v7192_v19 = vadd.f32 %v5769_v10, %v663_v17  ;;  %v1030_v10 = vsel %vm1029_vm12, %v1024_v4, 0.0 }
 0x2ab   :  { %v7619_v23 = vadd.f32 %v7190_v16, %v5774_v12  ;;  %1031 = vadd.xlane.f32.xlu0 %v1030_v10 }
 0x2ac   :  { %v7617_v20 = vadd.f32 %v7192_v19, %v5774_v12  ;;  %v6365_v22 = vpop.f32.mrb[6].mxu0  ;;  %v5784_v12 = vld [vmem:[%s7681_s3] ss:$0 sm:$0xff] }
 0x2ad   :  { %v673_v25 = vpop.f32.mrb[7].mxu0  ;;  %v7631_v27 = vadd.f32 %v7615_v18, %v6365_v22 }
 0x2ae   :  { %v7622_v26 = vadd.f32 %v7615_v18, %v673_v25  ;;  %6374 = vmatprep.mubr.msk.f32.mxu0 %vm493_vm3, %v7617_v20 }
 0x2af   :  { %6375 = vmatmul.mubr.msk.f32.vlgmr.msra.gmra.mrb[8].mxu0 %vm493_vm3, %v7619_v23 }
 0x2b0   :  { %6377 = vmatprep.mubr.msk.f32.mxu0 %vm493_vm3, %v7622_v26  ;;  %6935 = vmatpush3.bf16.xpose.msk.msra.mxu0 %vm7665_vm11, %v7669_v7 }
 0x2b3   :  { %6378 = vmatmul.mubr.msk.f32.gmra.mrb[10].mxu0 %vm493_vm3, %v7631_v27 }
 0x382   :  { %v6376_v37 = vpop.f32.mrb[8].mxu0 }
 0x383   :  { %v776_v38 = vadd.f32 %v6376_v37, %v5779_v35  ;;  %v770_v40 = vpop.f32.mrb[9].mxu0 }
 0x384   :  { %v771_v41 = vadd.f32 %v5779_v35, %v770_v40 }
 0x385   :  { %v794_v42 = vmul.f32 0.1, %v776_v38  ;;  %vm790_vm6 = vcmp.ge.f32.partialorder %v776_v38, 0.0 }
 0x386   :  { %vm789_vm7 = vcmp.ge.f32.partialorder %v771_v41, 0.0  ;;  %v793_v43 = vmul.f32 0.1, %v771_v41  ;;  %v6379_v44 = vpop.f32.mrb[10].mxu0 }
 0x387   :  { %v786_v45 = vadd.f32 %v6379_v44, %v5779_v35  ;;  %v780_v46 = vpop.f32.mrb[11].mxu0  ;;  %v798_v49 = vsel %vm790_vm6, %v776_v38, %v794_v42 }
 0x388   :  { %v781_v47 = vadd.f32 %v5779_v35, %v780_v46  ;;  %v797_v48 = vsel %vm789_vm7, %v771_v41, %v793_v43 }
 0x389   :  { %v796_v50 = vmul.f32 0.1, %v786_v45  ;;  %6388 = vmatprep.mubr.msk.f32.mxu1 %vm493_vm3, %v797_v48  ;;  %vm792_vm8 = vcmp.ge.f32.partialorder %v786_v45, 0.0 }
 0x38a   :  { %vm791_vm9 = vcmp.ge.f32.partialorder %v781_v47, 0.0  ;;  %v795_v51 = vmul.f32 0.1, %v781_v47  ;;  %6389 = vmatmul.mubr.msk.f32.vlgmr.msra.gmra.mrb[4].mxu1 %vm493_vm3, %v798_v49 }
 0x38b   :  { %v800_v53 = vsel %vm792_vm8, %v786_v45, %v796_v50  ;;  %6925 = vmatpush3.bf16.msra.mxu1 %v7652_v57  ;;  %v1028_v45 = vpop.xlane.xlu0 %1027 }
 0x38c   :  { %v799_v52 = vsel %vm791_vm9, %v781_v47, %v795_v51  ;;  %6927 = vmatprep.subr.bf16.mxu1 %v7656_v60  ;;  %1033 = vxpose.xlu1.b32.start [1/2] (short) (narrow) %v1028_v45, 8  ;;  %v5789_v47 = vld [vmem:[%s7715_s7] ss:$0 sm:$0xff] }
 0x38d   :  { %6391 = vmatprep.mubr.msk.f32.mxu1 %vm493_vm3, %v799_v52 }
 0x38e   :  { %6392 = vmatmul.mubr.msk.f32.gmra.mrb[6].mxu1 %vm493_vm3, %v800_v53 }
 0x38f   :  { %6929 = vmatpush3.bf16.msra.mxu1 %v7656_v60  ;;  %v1032_v46 = vpop.xlane.xlu0 %1031 }
 0x390   :  { %1034 = vxpose.xlu1.b32.end [2/2] (short) (narrow) %v1032_v46, 8 }
 0x40c   :  { %v1049_v63 = vpop.trf.xlu1 }
 0x40d   :  { %v7739_v2 = vrot.slane %v1049_v63, %v1174_v62 }
 0x45d   :  { %v6390_v13 = vpop.f32.mrb[4].mxu1 }
 0x45e   :  { %v891_v16 = vadd.f32 %v6390_v13, %v5784_v12  ;;  %v885_v17 = vpop.f32.mrb[5].mxu1 }
 0x45f   :  { %v886_v19 = vadd.f32 %v5784_v12, %v885_v17 }
 0x460   :  { %v7685_v22 = vadd.f32 %v7619_v23, %v891_v16 }
 0x461   :  { %v7688_v25 = vadd.f32 %v7617_v20, %v886_v19  ;;  %v6393_v30 = vpop.f32.mrb[6].mxu1 }
 0x462   :  { %v913_v32 = vmul.f32 0.1, %v7685_v22  ;;  %v901_v35 = vadd.f32 %v6393_v30, %v5784_v12  ;;  %v895_v37 = vpop.f32.mrb[7].mxu1  ;;  %vm909_vm13 = vcmp.ge.f32.partialorder %v7685_v22, 0.0 }
 0x463   :  { %v896_v38 = vadd.f32 %v5784_v12, %v895_v37  ;;  %vm908_vm14 = vcmp.ge.f32.partialorder %v7688_v25, 0.0  ;;  %v912_v40 = vmul.f32 0.1, %v7688_v25 }
 0x464   :  { %v7695_v41 = vadd.f32 %v7631_v27, %v901_v35  ;;  %v917_v42 = vsel %vm909_vm13, %v7685_v22, %v913_v32 }
 0x465   :  { %v7698_v23 = vadd.f32 %v7622_v26, %v896_v38  ;;  %v916_v20 = vsel %vm908_vm14, %v7688_v25, %v912_v40  ;;  %vm1335_vm14 = vcmask 1043456  }
 0x466   :  { %6402 = vmatprep.mubr.msk.f32.mxu1 %vm493_vm3, %v916_v20  ;;  %v915_v43 = vmul.f32 0.1, %v7695_v41  ;;  %vm911_vm1 = vcmp.ge.f32.partialorder %v7695_v41, 0.0 }
 0x467   :  { %6403 = vmatmul.mubr.msk.f32.vlgmr.msra.gmra.mrb[8].mxu1 %vm493_vm3, %v917_v42  ;;  %vm910_vm15 = vcmp.ge.f32.partialorder %v7698_v23, 0.0  ;;  %v914_v44 = vmul.f32 0.1, %v7698_v23 }
 0x468   :  { %v919_v26 = vsel %vm911_vm1, %v7695_v41, %v915_v43  ;;  %v7761_v43 = vand.u32 127, %v1172_v58 }
 0x469   :  { %v918_v27 = vsel %vm910_vm15, %v7698_v23, %v914_v44  ;;  %vm7431_vm15 = vmmov 1  }
 0x46a   :  { %6405 = vmatprep.mubr.msk.f32.mxu1 %vm493_vm3, %v918_v27  ;;  %vm7776_vm1 = vmpackc.low %vm1335_vm14, %vm7431_vm15 }
 0x46b   :  { %6406 = vmatmul.mubr.msk.f32.gmra.mrb[10].mxu1 %vm493_vm3, %v919_v26  ;;  %6938 = vmatprep.subr.msk.bf16.mxu1 %vm7776_vm1, %v7669_v7 }
 0x46c   :  { %6941 = vmatpush3.bf16.msk.msra.mxu1 %vm7776_vm1, %v7669_v7 }
 0x53a   :  { %v6404_v48 = vpop.f32.mrb[8].mxu1 }
 0x53b   :  { %v1004_v49 = vpop.f32.mrb[9].mxu1  ;;  %v7720_v51 = vadd.f32 %v6404_v48, %v5789_v47 }
 0x53c   :  { %v7718_v50 = vadd.f32 %v5789_v47, %v1004_v49 }
 0x53d   :  { %9066 = vst [vmem:[#allocation7_spill] sm:$0xff] %v7720_v51 }
 0x53e   :  { %9065 = vst [vmem:[#allocation6_spill] sm:$0xff] %v7718_v50  ;;  %v6407_v52 = vpop.f32.mrb[10].mxu1  ;;  %6412 = vmatprep.mubr.msk.f32.mxu0 %vm1025_vm10, %v7718_v50 }
 0x53f   :  { %v1014_v53 = vpop.f32.mrb[11].mxu1  ;;  %6413 = vmatmul.mubr.msk.f32.vlgmr.msra.gmra.mrb[12].mxu0 %vm1025_vm10, %v7720_v51  ;;  %v7728_v56 = vadd.f32 %v6407_v52, %v5789_v47 }
 0x540   :  { %v7726_v55 = vadd.f32 %v5789_v47, %v1014_v53 }
 0x541   :  { %9068 = vst [vmem:[#allocation9_spill] sm:$0xff] %v7728_v56 }
 0x542   :  { %9067 = vst [vmem:[#allocation8_spill] sm:$0xff] %v7726_v55  ;;  %6415 = vmatprep.mubr.msk.f32.mxu0 %vm1025_vm10, %v7726_v55 }
 0x543   :  { %6416 = vmatmul.mubr.msk.f32.gmra.mrb[14].mxu0 %vm1025_vm10, %v7728_v56 }
 0x612   :  { %v6414_v4 = vpop.f32.mrb[12].mxu0 }
 0x613   :  { %v1169_v8 = vmul.f32 2.0, %v6414_v4  ;;  %v1149_v10 = vpop.f32.mrb[13].mxu0 }
 0x614   :  { %v1168_v12 = vmul.f32 2.0, %v1149_v10 }
 0x615   :  { %v7742_v13 = vsub.f32 %v7739_v2, %v1169_v8 }
 0x616   :  { %v7745_v16 = vsub.f32 %v7739_v2, %v1168_v12  ;;  %v6417_v17 = vpop.f32.mrb[14].mxu0 }
 0x617   :  { %v1159_v19 = vpop.f32.mrb[15].mxu0  ;;  %v1234_v30 = vsel %vm1184_vm2, %v7742_v13, inf  ;;  %v1171_v32 = vmul.f32 2.0, %v6417_v17 }
 0x618   :  { %v1170_v35 = vmul.f32 2.0, %v1159_v19  ;;  %1235 = vmin.xlane.f32.xlu1 %v1234_v30  ;;  %v1231_v37 = vsel %vm1184_vm2, %v7745_v16, inf }
 0x619   :  { %1232 = vmin.xlane.f32.xlu0 %v1231_v37  ;;  %v7755_v40 = vsub.f32 %v7739_v2, %v1171_v32 }
 0x61a   :  { %v7752_v38 = vsub.f32 %v7739_v2, %v1170_v35 }
 0x61b   :  { %v1240_v42 = vsel %vm1184_vm2, %v7755_v40, inf }
 0x61c   :  { %v1237_v20 = vsel %vm1184_vm2, %v7752_v38, inf }
 0x61d   :  { %1238 = vmin.xlane.f32.xlu0 %v1237_v20 }
 0x621   :  { %1241 = vmin.xlane.f32.xlu0 %v1240_v42 }
 0x6a5   :  { %v1236_v44 = vpop.xlane.xlu1 %1235 }
 0x6a6   :  { %vm1244_vm4 = vcmp.eq.f32.partialorder %v7742_v13, %v1236_v44  ;;  %v1233_v27 = vpop.xlane.xlu0 %1232 }
 0x6a7   :  { %v1248_v26 = vsel %vm1244_vm4, %v7761_v43, 12  ;;  %vm1243_vm5 = vcmp.eq.f32.partialorder %v7745_v16, %v1233_v27 }
 0x6a8   :  { %v1247_v45 = vsel %vm1243_vm5, %v7761_v43, 12  ;;  %v1266_v46 = vsel %vm1184_vm2, %v1248_v26, 2147483647 }
 0x6a9   :  { %v1268_v47 = vshra.s32 %v1266_v46, 16  ;;  %v1251_v48 = vsel %vm1184_vm2, %v1247_v45, 2147483647  ;;  %v1267_v35 = vand.u32 65535, %v1266_v46 }
 0x6aa   :  { %v1239_v49 = vpop.xlane.xlu0 %1238  ;;  %v1253_v53 = vshra.s32 %v1251_v48, 16  ;;  %v1252_v42 = vand.u32 65535, %v1251_v48 }
 0x6ab   :  { %vm1245_vm6 = vcmp.eq.f32.partialorder %v7752_v38, %v1239_v49  ;;  %v1270_v52 = vcvt.s32.f32 %v1268_v47  ;;  %v1269_v20 = vcvt.s32.f32 %v1267_v35 }
 0x6ac   :  { %v1249_v58 = vsel %vm1245_vm6, %v7761_v43, 12  ;;  %v1255_v8 = vcvt.s32.f32 %v1253_v53  ;;  %v1254_v26 = vcvt.s32.f32 %v1252_v42 }
 0x6ad   :  { %1271 = vmin.xlane.f32.xlu0 %v1270_v52  ;;  %v1281_v63 = vsel %vm1184_vm2, %v1249_v58, 2147483647 }
 0x6ae   :  { %v1242_v4 = vpop.xlane.xlu0 %1241  ;;  %v1283_v10 = vshra.s32 %v1281_v63, 16  ;;  %v1282_v45 = vand.u32 65535, %v1281_v63  ;;  %v230_v63 = vld [vmem:[%s5742_s11 + $0x8] sm:$0xff] }
 0x6af   :  { %vm1246_vm7 = vcmp.eq.f32.partialorder %v7755_v40, %v1242_v4 }
 0x6b0   :  { %v1250_v12 = vsel %vm1246_vm7, %v7761_v43, 12  ;;  %v1285_v19 = vcvt.s32.f32 %v1283_v10  ;;  %v1284_v53 = vcvt.s32.f32 %v1282_v45 }
 0x6b1   :  { %1256 = vmin.xlane.f32.xlu0 %v1255_v8  ;;  %v1296_v17 = vsel %vm1184_vm2, %v1250_v12, 2147483647 }
 0x6b2   :  { %v1298_v30 = vshra.s32 %v1296_v17, 16  ;;  %v1297_v58 = vand.u32 65535, %v1296_v17 }
 0x6b4   :  { %v1300_v32 = vcvt.s32.f32 %v1298_v30  ;;  %v1299_v46 = vcvt.s32.f32 %v1297_v58 }
 0x6b5   :  { %1286 = vmin.xlane.f32.xlu0 %v1285_v19 }
 0x6b9   :  { %1301 = vmin.xlane.f32.xlu0 %v1300_v32 }
 0x73a   :  { %v1272_v37 = vpop.xlane.xlu0 %1271 }
 0x73b   :  { %vm1273_vm8 = vcmp.eq.f32.partialorder %v1270_v52, %v1272_v37  ;;  %v229_v52 = vld [vmem:[%s5742_s11] sm:$0xff]  ;;  %v1278_v17 = vcvt.f32.s32 %v1272_v37  ;;  %s7440_s11 = smov 23  }
 0x73c   :  { %v1274_v44 = vsel %vm1273_vm8, %v1269_v20, inf  ;;  %vm1776_vm8 = vcmask 123904   ;;  %s5744_s14 = sld [smem:[%s9004_s0 + %s7440_s11]]  }
 0x73d   :  { %1275 = vmin.xlane.f32.xlu0 %v1274_v44  ;;  %v1279_v35 = vshll.u32 %v1278_v17, 16  ;;  %s8046_s11 = sld [smem:[%s9004_s0 + %s7445_s8]]  }
 0x73e   :  { %v1257_v27 = vpop.xlane.xlu0 %1256 }
 0x73f   :  { %vm1258_vm9 = vcmp.eq.f32.partialorder %v1255_v8, %v1257_v27  ;;  %v7789_v8 = vpack.c.bf16 %v230_v63, %v229_v52  ;;  %v1263_v30 = vcvt.f32.s32 %v1257_v27 }
 0x740   :  { %v1259_v47 = vsel %vm1258_vm9, %v1254_v26, inf }
 0x741   :  { %1260 = vmin.xlane.f32.xlu0 %v1259_v47  ;;  %6943 = vmatprep.subr.bf16.mxu0 %v7789_v8  ;;  %v1264_v44 = vshll.u32 %v1263_v30, 16 }
 0x742   :  { %v1287_v49 = vpop.xlane.xlu0 %1286  ;;  %6945 = vmatpush3.bf16.msra.mxu0 %v7789_v8 }
 0x743   :  { %vm1288_vm12 = vcmp.eq.f32.partialorder %v1285_v19, %v1287_v49  ;;  %v1293_v26 = vcvt.f32.s32 %v1287_v49 }
 0x744   :  { %v1289_v4 = vsel %vm1288_vm12, %v1284_v53, inf }
 0x745   :  { %1290 = vmin.xlane.f32.xlu0 %v1289_v4  ;;  %v1294_v58 = vshll.u32 %v1293_v26, 16 }
 0x746   :  { %v1302_v10 = vpop.xlane.xlu0 %1301 }
 0x747   :  { %vm1303_vm13 = vcmp.eq.f32.partialorder %v1300_v32, %v1302_v10  ;;  %v1308_v4 = vcvt.f32.s32 %v1302_v10 }
 0x748   :  { %v1304_v12 = vsel %vm1303_vm13, %v1299_v46, inf }
 0x749   :  { %1305 = vmin.xlane.f32.xlu1 %v1304_v12  ;;  %v9005_v12 = vmov 0.0   ;;  %v1309_v49 = vshll.u32 %v1308_v4, 16 }
 0x7ca   :  { %v1276_v19 = vpop.xlane.xlu0 %1275 }
 0x7cb   :  { %v1277_v32 = vcvt.f32.s32 %v1276_v19 }
 0x7cd   :  { %v1280_v20 = vadd.s32 %v1279_v35, %v1277_v32  ;;  %v225_v32 = vld [vmem:[%s5741_s15] sm:$0xff]  ;;  %v226_v35 = vld [vmem:[%s5741_s15 + $0x8] sm:$0xff] }
 0x7ce   :  { %v1261_v42 = vpop.xlane.xlu0 %1260 }
 0x7cf   :  { %v1262_v45 = vcvt.f32.s32 %v1261_v42  ;;  %vm1312_vm4 = vcmp.eq.s32.totalorder %v7761_v43, %v1280_v20  ;;  %v7808_v20 = vpack.c.bf16 %v226_v35, %v225_v32  ;;  %v216_v42 = vld [vmem:[%s5737_s20] sm:$0xff] }
 0x7d0   :  { %v5801_v27 = vsel %vm1312_vm4, 1.0, %v9005_v12  ;;  %vm1931_vm4 = vcmask 80896  }
 0x7d1   :  { %v1265_v47 = vadd.s32 %v1264_v44, %v1262_v45  ;;  %6947 = vmatprep.subr.bf16.mxu0 %v7808_v20  ;;  %v217_v44 = vld [vmem:[%s5737_s20 + $0x8] sm:$0xff]  ;;  %v227_v45 = vld [vmem:[%s5741_s15 + $0x10] sm:$0xff] }
 0x7d2   :  { %v1291_v53 = vpop.xlane.xlu0 %1290  ;;  %v7814_v26 = vpack.c.bf16 %v217_v44, %v216_v42 }
 0x7d3   :  { %v1292_v46 = vcvt.f32.s32 %v1291_v53  ;;  %vm1311_vm5 = vcmp.eq.s32.totalorder %v7761_v43, %v1265_v47  ;;  %v228_v47 = vld [vmem:[%s5741_s15 + $0x18] sm:$0xff]  ;;  %s7441_s15 = smov 26  }
 0x7d4   :  { %v5800_v37 = vsel %vm1311_vm5, 1.0, %v9005_v12  ;;  %6955 = vmatprep.subr.bf16.mxu1 %v7814_v26  ;;  %v7822_v4 = vpack.c.bf16 %v228_v47, %v227_v45  ;;  %s5747_s18 = sld [smem:[%s9004_s0 + %s7441_s15]]  }
 0x7d5   :  { %v1295_v52 = vadd.s32 %v1294_v58, %v1292_v46  ;;  %6422 = vmatprep.mubr.msk.f32.mxu1 %vm1184_vm2, %v5800_v37  ;;  %s8057_s15 = sld [smem:[%s9004_s0 + %s7446_s12]]  }
 0x7d6   :  { %v1306_v63 = vpop.xlane.xlu1 %1305  ;;  %6423 = vmatmul.mubr.msk.f32.vlgmr.msra.gmra.mrb[12].mxu1 %vm1184_vm2, %v5801_v27  ;;  %v218_v27 = vld [vmem:[%s5737_s20 + $0x10] sm:$0xff] }
 0x7d7   :  { %v1307_v17 = vcvt.f32.s32 %v1306_v63  ;;  %vm1313_vm6 = vcmp.eq.s32.totalorder %v7761_v43, %v1295_v52  ;;  %6957 = vmatpush3.bf16.msra.mxu1 %v7814_v26  ;;  %v219_v52 = vld [vmem:[%s5737_s20 + $0x18] sm:$0xff]  ;;  %s7442_s20 = smov 28  }
 0x7d8   :  { %v5802_v10 = vsel %vm1313_vm6, 1.0, %v9005_v12  ;;  %v7847_v63 = vpack.c.bf16 %v219_v52, %v218_v27  ;;  %s5749_s24 = sld [smem:[%s9004_s0 + %s7442_s20]]  }
 0x7d9   :  { %v1310_v19 = vadd.s32 %v1309_v49, %v1307_v17  ;;  %6425 = vmatprep.mubr.msk.f32.mxu1 %vm1184_vm2, %v5802_v10  ;;  %s8074_s20 = sld [smem:[%s9004_s0 + %s7447_s16]]  }
 0x7da   :  { %6959 = vmatprep.subr.bf16.mxu1 %v7847_v63 }
 0x7db   :  { %vm1314_vm7 = vcmp.eq.s32.totalorder %v7761_v43, %v1310_v19  ;;  %6961 = vmatpush3.bf16.msra.mxu1 %v7847_v63  ;;  %v5817_v19 = vld [vmem:[%s7863_s30] ss:$0 sm:$0xff] }
 0x7dc   :  { %v5803_v30 = vsel %vm1314_vm7, 1.0, %v9005_v12 }
 0x7dd   :  { %6426 = vmatmul.mubr.msk.f32.gmra.mrb[14].mxu1 %vm1184_vm2, %v5803_v30 }
 0x8a9   :  { %v7818_v53 = vpop.f32.mrb[12].mxu1 }
 0x8aa   :  { %9072 = vst [vmem:[#allocation11_spill] sm:$0xff] %v7818_v53  ;;  %v7820_v58 = vpop.f32.mrb[13].mxu1 }
 0x8ab   :  { %9073 = vst [vmem:[#allocation12_spill] sm:$0xff] %v7820_v58  ;;  %6432 = vmatprep.mubr.msk.f32.mxu0 %vm1025_vm10, %v7820_v58 }
 0x8ac   :  { %6433 = vmatmul.mubr.msk.f32.vlgmr.msra.gmra.mrb[16].mxu0 %vm1025_vm10, %v7818_v53 }
 0x8ad   :  { %6949 = vmatpush3.bf16.msra.mxu0 %v7808_v20 }
 0x8ae   :  { %6951 = vmatprep.subr.bf16.mxu0 %v7822_v4 }
 0x8b0   :  { %v7830_v46 = vpop.f32.mrb[14].mxu1 }
 0x8b1   :  { %9074 = vst [vmem:[#allocation13_spill] sm:$0xff] %v7830_v46  ;;  %v7832_v37 = vpop.f32.mrb[15].mxu1  ;;  %6953 = vmatpush3.bf16.msra.mxu0 %v7822_v4 }
 0x8b2   :  { %9075 = vst [vmem:[#allocation14_spill] sm:$0xff] %v7832_v37  ;;  %6435 = vmatprep.mubr.msk.f32.mxu0 %vm1025_vm10, %v7832_v37 }
 0x8b3   :  { %6436 = vmatmul.mubr.msk.f32.gmra.mrb[18].mxu0 %vm1025_vm10, %v7830_v46 }
 0x8b4   :  { %6446 = vmatprep.mubr.msk.f32.mxu0 %vm493_vm3, %v7688_v25  ;;  %v224_v25 = vld [vmem:[%s5740_s25 + $0x8] sm:$0x3] }
 0x8b5   :  { %v1772_v49 = vmul.f32 %v224_v25, %v224_v25 }
 0x8b7   :  { %6447 = vmatmul.mubr.msk.f32.vlgmr.msra.gmra.mrb[16].mxu0 %vm493_vm3, %v7685_v22  ;;  %v223_v22 = vld [vmem:[%s5740_s25] sm:$0xff]  ;;  %v1777_v10 = vsel %vm1776_vm8, %v1772_v49, 0.0  ;;  %s7443_s25 = smov 25  }
 0x8b8   :  { %6449 = vmatprep.mubr.msk.f32.mxu0 %vm493_vm3, %v7698_v23  ;;  %v1771_v23 = vmul.f32 %v223_v22, %v223_v22  ;;  %v7854_v17 = vpack.c.bf16 %v224_v25, %v223_v22  ;;  %1778 = vadd.xlane.f32.xlu1 %v1777_v10  ;;  %s8012_s28 = sld [smem:[%s9004_s0 + %s7443_s25]]  }
 0x8b9   :  { %s8085_s25 = sld [smem:[%s9004_s0 + %s7448_s22]]  }
 0x8ba   :  { %6964 = vmatprep.subr.msk.bf16.mxu1 %vm7665_vm11, %v7854_v17 }
 0x8bb   :  { %6450 = vmatmul.mubr.msk.f32.gmra.mrb[18].mxu0 %vm493_vm3, %v7695_v41  ;;  %v1773_v41 = vsel %vm1025_vm10, %v1771_v23, 0.0 }
 0x8bc   :  { %1774 = vadd.xlane.f32.xlu0 %v1773_v41 }
 0x98a   :  { %v6448_v30 = vpop.f32.mrb[16].mxu0 }
 0x98b   :  { %v1653_v32 = vadd.f32 %v6448_v30, %v5817_v19  ;;  %v1627_v35 = vpop.f32.mrb[17].mxu0 }
 0x98c   :  { %v1652_v42 = vadd.f32 %v5817_v19, %v1627_v35  ;;  %v5818_v35 = vld [vmem:[%s7876_s5] ss:$0 sm:$0xff] }
 0x98d   :  { %v1661_v44 = vmul.f32 0.1, %v1653_v32  ;;  %vm1657_vm9 = vcmp.ge.f32.partialorder %v1653_v32, 0.0 }
 0x98e   :  { %vm1656_vm12 = vcmp.ge.f32.partialorder %v1652_v42, 0.0  ;;  %v1660_v45 = vmul.f32 0.1, %v1652_v42  ;;  %v6451_v47 = vpop.f32.mrb[18].mxu0 }
 0x98f   :  { %v1655_v27 = vadd.f32 %v6451_v47, %v5817_v19  ;;  %v1637_v52 = vpop.f32.mrb[19].mxu0  ;;  %v1665_v23 = vsel %vm1657_vm9, %v1653_v32, %v1661_v44  ;;  %v1779_v32 = vpop.xlane.xlu1 %1778 }
 0x990   :  { %v1654_v22 = vadd.f32 %v5817_v19, %v1637_v52  ;;  %v1664_v25 = vsel %vm1656_vm12, %v1652_v42, %v1660_v45  ;;  %v1775_v19 = vpop.xlane.xlu0 %1774 }
 0x991   :  { %v1663_v49 = vmul.f32 0.1, %v1655_v27  ;;  %6460 = vmatprep.mubr.msk.f32.mxu1 %vm493_vm3, %v1664_v25  ;;  %vm1659_vm13 = vcmp.ge.f32.partialorder %v1655_v27, 0.0  ;;  %1780 = vxpose.xlu0.b32.start [1/2] (short) (narrow) %v1775_v19, 8 }
 0x992   :  { %vm1658_vm14 = vcmp.ge.f32.partialorder %v1654_v22, 0.0  ;;  %v1662_v41 = vmul.f32 0.1, %v1654_v22  ;;  %6461 = vmatmul.mubr.msk.f32.vlgmr.msra.gmra.mrb[16].mxu1 %vm493_vm3, %v1665_v23 }
 0x993   :  { %6967 = vmatpush3.bf16.xpose.msk.msra.mxu1 %vm7665_vm11, %v7854_v17  ;;  %v1667_v30 = vsel %vm1659_vm13, %v1655_v27, %v1663_v49 }
 0x994   :  { %v1666_v10 = vsel %vm1658_vm14, %v1654_v22, %v1662_v41 }
 0x995   :  { %6463 = vmatprep.mubr.msk.f32.mxu1 %vm493_vm3, %v1666_v10  ;;  %1781 = vxpose.xlu0.b32.end [2/2] (short) (narrow) %v1779_v32, 8 }
 0x996   :  { %6464 = vmatmul.mubr.msk.f32.gmra.mrb[18].mxu1 %vm493_vm3, %v1667_v30 }
 0xa11   :  { %v1796_v23 = vpop.trf.xlu0 }
 0xa12   :  { %v7897_v49 = vrot.slane %v1796_v23, %v1174_v62 }
 0xa65   :  { %v6462_v42 = vpop.f32.mrb[16].mxu1 }
 0xa66   :  { %v1752_v44 = vpop.f32.mrb[17].mxu1  ;;  %v7881_v47 = vadd.f32 %v6462_v42, %v5818_v35 }
 0xa67   :  { %v7879_v45 = vadd.f32 %v5818_v35, %v1752_v44 }
 0xa68   :  { %9077 = vst [vmem:[#allocation16_spill] sm:$0xff] %v7881_v47 }
 0xa69   :  { %9076 = vst [vmem:[#allocation15_spill] sm:$0xff] %v7879_v45  ;;  %v6465_v27 = vpop.f32.mrb[18].mxu1  ;;  %6470 = vmatprep.mubr.msk.f32.mxu1 %vm1025_vm10, %v7879_v45 }
 0xa6a   :  { %v1762_v52 = vpop.f32.mrb[19].mxu1  ;;  %6471 = vmatmul.mubr.msk.f32.vlgmr.msra.gmra.mrb[20].mxu1 %vm1025_vm10, %v7881_v47  ;;  %v7889_v25 = vadd.f32 %v6465_v27, %v5818_v35 }
 0xa6b   :  { %v7887_v22 = vadd.f32 %v5818_v35, %v1762_v52 }
 0xa6c   :  { %9079 = vst [vmem:[#allocation18_spill] sm:$0xff] %v7889_v25 }
 0xa6d   :  { %9078 = vst [vmem:[#allocation17_spill] sm:$0xff] %v7887_v22  ;;  %6473 = vmatprep.mubr.msk.f32.mxu1 %vm1025_vm10, %v7887_v22 }
 0xa6e   :  { %6474 = vmatmul.mubr.msk.f32.gmra.mrb[22].mxu1 %vm1025_vm10, %v7889_v25 }
 0xb3d   :  { %v6472_v41 = vpop.f32.mrb[20].mxu1 }
 0xb3e   :  { %v1916_v10 = vmul.f32 2.0, %v6472_v41  ;;  %v1896_v30 = vpop.f32.mrb[21].mxu1 }
 0xb3f   :  { %v1915_v19 = vmul.f32 2.0, %v1896_v30 }
 0xb40   :  { %v7900_v32 = vsub.f32 %v7897_v49, %v1916_v10 }
 0xb41   :  { %v6475_v35 = vpop.f32.mrb[22].mxu1  ;;  %v7903_v42 = vsub.f32 %v7897_v49, %v1915_v19 }
 0xb42   :  { %v1906_v44 = vpop.f32.mrb[23].mxu1  ;;  %v1979_v27 = vsel %vm1931_vm4, %v7900_v32, inf  ;;  %v1918_v62 = vmul.f32 2.0, %v6475_v35 }
 0xb43   :  { %v1917_v52 = vmul.f32 2.0, %v1906_v44  ;;  %1980 = vmin.xlane.f32.xlu1 %v1979_v27  ;;  %v1976_v41 = vsel %vm1931_vm4, %v7903_v42, inf }
 0xb44   :  { %v7913_v10 = vsub.f32 %v7897_v49, %v1918_v62 }
 0xb45   :  { %v7908_v23 = vsub.f32 %v7897_v49, %v1917_v52 }
 0xb46   :  { %v1985_v19 = vsel %vm1931_vm4, %v7913_v10, inf }
 0xb47   :  { %1977 = vmin.xlane.f32.xlu1 %v1976_v41  ;;  %v1982_v30 = vsel %vm1931_vm4, %v7908_v23, inf }
 0xb4b   :  { %1983 = vmin.xlane.f32.xlu1 %v1982_v30 }
 0xb4f   :  { %1986 = vmin.xlane.f32.xlu1 %v1985_v19 }
 0xbd0   :  { %v1981_v44 = vpop.xlane.xlu1 %1980 }
 0xbd1   :  { %vm1989_vm5 = vcmp.eq.f32.partialorder %v7900_v32, %v1981_v44 }
 0xbd2   :  { %v1993_v35 = vsel %vm1989_vm5, %v7761_v43, 10  ;;  %vm2080_vm5 = vcmask 1041408  }
 0xbd3   :  { %v2011_v27 = vsel %vm1931_vm4, %v1993_v35, 2147483647 }
 0xbd4   :  { %v1978_v52 = vpop.xlane.xlu1 %1977  ;;  %v2013_v41 = vshra.s32 %v2011_v27, 16 }
 0xbd5   :  { %vm1988_vm6 = vcmp.eq.f32.partialorder %v7903_v42, %v1978_v52 }
 0xbd6   :  { %v1992_v62 = vsel %vm1988_vm6, %v7761_v43, 10  ;;  %v2015_v12 = vcvt.s32.f32 %v2013_v41  ;;  %vm7932_vm6 = vmpackc.low %vm2080_vm5, %vm7431_vm15 }
 0xbd7   :  { %v1996_v30 = vsel %vm1931_vm4, %v1992_v62, 2147483647  ;;  %6970 = vmatprep.subr.msk.bf16.mxu0 %vm7932_vm6, %v7854_v17 }
 0xbd8   :  { %2016 = vmin.xlane.f32.xlu1 %v2015_v12  ;;  %v1984_v59 = vpop.xlane.xlu1 %1983  ;;  %v1998_v31 = vshra.s32 %v1996_v30, 16  ;;  %6973 = vmatpush3.bf16.msk.msra.mxu0 %vm7932_vm6, %v7854_v17 }
 0xbd9   :  { %vm1990_vm7 = vcmp.eq.f32.partialorder %v7908_v23, %v1984_v59  ;;  %v2012_v59 = vand.u32 65535, %v2011_v27 }
 0xbda   :  { %v1994_v19 = vsel %vm1990_vm7, %v7761_v43, 10  ;;  %v2000_v44 = vcvt.s32.f32 %v1998_v31  ;;  %v1997_v31 = vand.u32 65535, %v1996_v30 }
 0xbdb   :  { %v2026_v33 = vsel %vm1931_vm4, %v1994_v19, 2147483647  ;;  %v2014_v55 = vcvt.s32.f32 %v2012_v59 }
 0xbdc   :  { %2001 = vmin.xlane.f32.xlu1 %v2000_v44  ;;  %v1987_v35 = vpop.xlane.xlu1 %1986  ;;  %v2028_v56 = vshra.s32 %v2026_v33, 16  ;;  %v1999_v45 = vcvt.s32.f32 %v1997_v31  ;;  %v2027_v47 = vand.u32 65535, %v2026_v33  ;;  %v235_v33 = vld [vmem:[%s5745_s10 + $0x8] sm:$0xff] }
 0xbdd   :  { %vm1991_vm8 = vcmp.eq.f32.partialorder %v7913_v10, %v1987_v35 }
 0xbde   :  { %v1995_v52 = vsel %vm1991_vm8, %v7761_v43, 10  ;;  %v2030_v41 = vcvt.s32.f32 %v2028_v56  ;;  %v2029_v50 = vcvt.s32.f32 %v2027_v47 }
 0xbdf   :  { %v2041_v62 = vsel %vm1931_vm4, %v1995_v52, 2147483647 }
 0xbe0   :  { %2031 = vmin.xlane.f32.xlu1 %v2030_v41  ;;  %v2043_v25 = vshra.s32 %v2041_v62, 16  ;;  %v2042_v52 = vand.u32 65535, %v2041_v62 }
 0xbe2   :  { %v2045_v28 = vcvt.s32.f32 %v2043_v25  ;;  %v2044_v27 = vcvt.s32.f32 %v2042_v52 }
 0xbe4   :  { %2046 = vmin.xlane.f32.xlu1 %v2045_v28 }
 0xc65   :  { %v2017_v29 = vpop.xlane.xlu1 %2016 }
 0xc66   :  { %vm2018_vm9 = vcmp.eq.f32.partialorder %v2015_v12, %v2017_v29 }
 0xc67   :  { %v2019_v19 = vsel %vm2018_vm9, %v2014_v55, inf }
 0xc68   :  { %2020 = vmin.xlane.f32.xlu1 %v2019_v19 }
 0xc69   :  { %v2002_v22 = vpop.xlane.xlu1 %2001 }
 0xc6a   :  { %vm2003_vm12 = vcmp.eq.f32.partialorder %v2000_v44, %v2002_v22 }
 0xc6b   :  { %v2004_v35 = vsel %vm2003_vm12, %v1999_v45, inf  ;;  %v2008_v45 = vcvt.f32.s32 %v2002_v22 }
 0xc6c   :  { %2005 = vmin.xlane.f32.xlu1 %v2004_v35 }
 0xc6d   :  { %v2032_v56 = vpop.xlane.xlu1 %2031  ;;  %v2009_v62 = vshll.u32 %v2008_v45, 16 }
 0xc6e   :  { %vm2033_vm13 = vcmp.eq.f32.partialorder %v2030_v41, %v2032_v56  ;;  %v2038_v31 = vcvt.f32.s32 %v2032_v56 }
 0xc6f   :  { %v2034_v51 = vsel %vm2033_vm13, %v2029_v50, inf }
 0xc70   :  { %2035 = vmin.xlane.f32.xlu1 %v2034_v51  ;;  %v2023_v51 = vcvt.f32.s32 %v2017_v29 }
 0xc71   :  { %v2047_v25 = vpop.xlane.xlu1 %2046 }
 0xc72   :  { %vm2048_vm14 = vcmp.eq.f32.partialorder %v2045_v28, %v2047_v25  ;;  %v234_v28 = vld [vmem:[%s5745_s10] sm:$0xff]  ;;  %v2024_v30 = vshll.u32 %v2023_v51, 16  ;;  %s7451_s10 = smov 31  }
 0xc73   :  { %v2049_v59 = vsel %vm2048_vm14, %v2044_v27, inf  ;;  %v7945_v50 = vpack.c.bf16 %v235_v33, %v234_v28  ;;  %v2039_v27 = vshll.u32 %v2038_v31, 16  ;;  %v9082_v33 = vmov 0.0   ;;  %v237_v31 = vld [vmem:[%s5747_s18] sm:$0xff]  ;;  %s8148_s13 = sld [smem:[%s9004_s0 + %s7451_s10]]  }
 0xc74   :  { %2050 = vmin.xlane.f32.xlu1 %v2049_v59  ;;  %v2053_v59 = vcvt.f32.s32 %v2047_v25 }
 0xc75   :  { %6975 = vmatprep.subr.bf16.mxu1 %v7945_v50 }
 0xc76   :  { %6977 = vmatpush3.bf16.msra.mxu1 %v7945_v50  ;;  %v2054_v51 = vshll.u32 %v2053_v59, 16 }
 0xcf5   :  { %v2021_v12 = vpop.xlane.xlu1 %2020 }
 0xcf6   :  { %v2022_v47 = vcvt.f32.s32 %v2021_v12 }
 0xcf8   :  { %v2025_v44 = vadd.s32 %v2024_v30, %v2022_v47 }
 0xcf9   :  { %v2006_v41 = vpop.xlane.xlu1 %2005 }
 0xcfa   :  { %v2007_v19 = vcvt.f32.s32 %v2006_v41  ;;  %vm2057_vm15 = vcmp.eq.s32.totalorder %v7761_v43, %v2025_v44  ;;  %v232_v44 = vld [vmem:[%s5744_s14] sm:$0xff]  ;;  %v233_v41 = vld [vmem:[%s5744_s14 + $0x8] sm:$0xff] }
 0xcfb   :  { %v5830_v22 = vsel %vm2057_vm15, 1.0, %v9082_v33 }
 0xcfc   :  { %v2010_v35 = vadd.s32 %v2009_v62, %v2007_v19  ;;  %v7964_v62 = vpack.c.bf16 %v233_v41, %v232_v44  ;;  %v238_v19 = vld [vmem:[%s5747_s18 + $0x8] sm:$0xff] }
 0xcfd   :  { %v2036_v52 = vpop.xlane.xlu1 %2035 }
 0xcfe   :  { %v2037_v28 = vcvt.f32.s32 %v2036_v52  ;;  %vm2056_vm7 = vcmp.eq.s32.totalorder %v7761_v43, %v2010_v35  ;;  %6979 = vmatprep.subr.bf16.mxu1 %v7964_v62  ;;  %v7970_v35 = vpack.c.bf16 %v238_v19, %v237_v31 }
 0xcff   :  { %v5829_v29 = vsel %vm2056_vm7, 1.0, %v9082_v33 }
 0xd00   :  { %v2040_v12 = vadd.s32 %v2039_v27, %v2037_v28  ;;  %6480 = vmatprep.mubr.msk.f32.mxu0 %vm1931_vm4, %v5829_v29  ;;  %6983 = vmatprep.subr.bf16.mxu0 %v7970_v35  ;;  %v239_v29 = vld [vmem:[%s5747_s18 + $0x10] sm:$0xff] }
 0xd01   :  { %6481 = vmatmul.mubr.msk.f32.vlgmr.msra.gmra.mrb[20].mxu0 %vm1931_vm4, %v5830_v22  ;;  %v2051_v56 = vpop.xlane.xlu1 %2050  ;;  %v240_v22 = vld [vmem:[%s5747_s18 + $0x18] sm:$0xff] }
 0xd02   :  { %v2052_v45 = vcvt.f32.s32 %v2051_v56  ;;  %vm2058_vm8 = vcmp.eq.s32.totalorder %v7761_v43, %v2040_v12  ;;  %6985 = vmatpush3.bf16.msra.mxu0 %v7970_v35  ;;  %v7999_v12 = vpack.c.bf16 %v240_v22, %v239_v29  ;;  %v242_v56 = vld [vmem:[%s5749_s24] sm:$0xff] }
 0xd03   :  { %v5831_v47 = vsel %vm2058_vm8, 1.0, %v9082_v33 }
 0xd04   :  { %v2055_v25 = vadd.s32 %v2054_v51, %v2052_v45  ;;  %6483 = vmatprep.mubr.msk.f32.mxu0 %vm1931_vm4, %v5831_v47  ;;  %9087 = vst [vmem:[#allocation23_spill] sm:$0xff] %v7999_v12  ;;  %6987 = vmatprep.subr.bf16.mxu0 %v7999_v12  ;;  %v243_v51 = vld [vmem:[%s5749_s24 + $0x8] sm:$0xff]  ;;  %v5846_v47 = vld [vmem:[%s8012_s28] ss:$0 sm:$0xff] }
 0xd05   :  { %v8006_v45 = vpack.c.bf16 %v243_v51, %v242_v56  ;;  %v244_v56 = vld [vmem:[%s5749_s24 + $0x10] sm:$0xff]  ;;  %v245_v51 = vld [vmem:[%s5749_s24 + $0x18] sm:$0xff] }
 0xd06   :  { %vm2059_vm9 = vcmp.eq.s32.totalorder %v7761_v43, %v2055_v25  ;;  %6989 = vmatpush3.bf16.msra.mxu0 %v7999_v12 }
 0xd07   :  { %v5832_v30 = vsel %vm2059_vm9, 1.0, %v9082_v33  ;;  %9088 = vst [vmem:[#allocation24_spill] sm:$0xff] %v8006_v45  ;;  %6991 = vmatprep.subr.bf16.mxu0 %v8006_v45 }
 0xd08   :  { %6484 = vmatmul.mubr.msk.f32.gmra.mrb[22].mxu0 %vm1931_vm4, %v5832_v30 }
 0xdd4   :  { %v7974_v52 = vpop.f32.mrb[20].mxu0 }
 0xdd5   :  { %9083 = vst [vmem:[#allocation19_spill] sm:$0xff] %v7974_v52  ;;  %v7976_v27 = vpop.f32.mrb[21].mxu0 }
 0xdd6   :  { %9084 = vst [vmem:[#allocation20_spill] sm:$0xff] %v7976_v27  ;;  %6490 = vmatprep.mubr.msk.f32.mxu1 %vm1025_vm10, %v7976_v27 }
 0xdd7   :  { %6491 = vmatmul.mubr.msk.f32.vlgmr.msra.gmra.mrb[24].mxu1 %vm1025_vm10, %v7974_v52 }
 0xdd8   :  { %6981 = vmatpush3.bf16.msra.mxu1 %v7964_v62 }
 0xddb   :  { %v7983_v59 = vpop.f32.mrb[22].mxu0 }
 0xddc   :  { %9085 = vst [vmem:[#allocation21_spill] sm:$0xff] %v7983_v59  ;;  %v7985_v28 = vpop.f32.mrb[23].mxu0 }
 0xddd   :  { %9086 = vst [vmem:[#allocation22_spill] sm:$0xff] %v7985_v28  ;;  %6493 = vmatprep.mubr.msk.f32.mxu1 %vm1025_vm10, %v7985_v28 }
 0xdde   :  { %6494 = vmatmul.mubr.msk.f32.gmra.mrb[26].mxu1 %vm1025_vm10, %v7983_v59 }
 0xddf   :  { %6500 = vmatprep.mubr.msk.f32.mxu1 %vm1025_vm10, %v7820_v58 }
 0xde2   :  { %6501 = vmatmul.mubr.msk.f32.vlgmr.msra.gmra.mrb[24].mxu1 %vm1025_vm10, %v7818_v53 }
 0xde3   :  { %6503 = vmatprep.mubr.msk.f32.mxu1 %vm1025_vm10, %v7832_v37 }
 0xde6   :  { %6504 = vmatmul.mubr.msk.f32.gmra.mrb[26].mxu1 %vm1025_vm10, %v7830_v46 }
 0xeb5   :  { %v6502_v25 = vpop.f32.mrb[24].mxu1 }
 0xeb6   :  { %v8018_v30 = vadd.f32 %v6502_v25, %v5846_v47  ;;  %v2360_v44 = vpop.f32.mrb[25].mxu1  ;;  %v8039_v25 = vpack.c.bf16 %v245_v51, %v244_v56 }
 0xeb7   :  { %v8020_v41 = vadd.f32 %v5846_v47, %v2360_v44  ;;  %v248_v44 = vld [vmem:[%s8046_s11 + $0x8] sm:$0xff] }
 0xeb8   :  { %5438 = vst [vmem:[%s5757_s6 + $0x8] sm:$0xff] %v8018_v30  ;;  %9089 = vst [vmem:[#allocation25_spill] sm:$0xff] %v8039_v25 }
 0xeb9   :  { %5437 = vst [vmem:[%s5757_s6] sm:$0xff] %v8020_v41  ;;  %v6505_v31 = vpop.f32.mrb[26].mxu1  ;;  %6514 = vmatprep.mubr.msk.f32.mxu0 %vm493_vm3, %v8020_v41 }
 0xeba   :  { %v8026_v19 = vadd.f32 %v6505_v31, %v5846_v47  ;;  %v2370_v29 = vpop.f32.mrb[27].mxu1  ;;  %6515 = vmatmul.mubr.msk.f32.vlgmr.msra.gmra.mrb[24].mxu0 %vm493_vm3, %v8018_v30 }
 0xebb   :  { %v8030_v22 = vadd.f32 %v5846_v47, %v2370_v29  ;;  %6993 = vmatpush3.bf16.msra.mxu0 %v8006_v45  ;;  %v247_v47 = vld [vmem:[%s8046_s11] sm:$0xff]  ;;  %v250_v45 = vld [vmem:[%s8046_s11 + $0x18] sm:$0xff] }
 0xebc   :  { %5440 = vst [vmem:[%s5757_s6 + $0x18] sm:$0xff] %v8026_v19  ;;  %6995 = vmatprep.subr.bf16.mxu0 %v8039_v25  ;;  %v8050_v31 = vpack.c.bf16 %v248_v44, %v247_v47  ;;  %v5847_v29 = vld [vmem:[%s8057_s15] ss:$0 sm:$0xff] }
 0xebd   :  { %5439 = vst [vmem:[%s5757_s6 + $0x10] sm:$0xff] %v8030_v22  ;;  %6517 = vmatprep.mubr.msk.f32.mxu0 %vm493_vm3, %v8030_v22 }
 0xebe   :  { %6518 = vmatmul.mubr.msk.f32.gmra.mrb[26].mxu0 %vm493_vm3, %v8026_v19  ;;  %9090 = vst [vmem:[#allocation26_spill] sm:$0xff] %v8050_v31  ;;  %6999 = vmatprep.subr.bf16.mxu1 %v8050_v31 }
 0xebf   :  { %6997 = vmatpush3.bf16.msra.mxu0 %v8039_v25  ;;  %7001 = vmatpush3.bf16.msra.mxu1 %v8050_v31 }
 0xf8d   :  { %v6516_v56 = vpop.f32.mrb[24].mxu0 }
 0xf8e   :  { %v2479_v51 = vadd.f32 %v6516_v56, %v5847_v29  ;;  %v2473_v25 = vpop.f32.mrb[25].mxu0 }
 0xf8f   :  { %v2474_v46 = vadd.f32 %v5847_v29, %v2473_v25 }
 0xf90   :  { %v2497_v59 = vmul.f32 0.1, %v2479_v51  ;;  %vm2493_vm12 = vcmp.ge.f32.partialorder %v2479_v51, 0.0 }
 0xf91   :  { %vm2492_vm13 = vcmp.ge.f32.partialorder %v2474_v46, 0.0  ;;  %v2496_v47 = vmul.f32 0.1, %v2474_v46  ;;  %v6519_v44 = vpop.f32.mrb[26].mxu0 }
 0xf92   :  { %v2489_v37 = vadd.f32 %v6519_v44, %v5847_v29  ;;  %v2483_v31 = vpop.f32.mrb[27].mxu0  ;;  %v2501_v52 = vsel %vm2493_vm12, %v2479_v51, %v2497_v59  ;;  %v249_v44 = vld [vmem:[%s8046_s11 + $0x10] sm:$0xff] }
 0xf93   :  { %v2484_v28 = vadd.f32 %v5847_v29, %v2483_v31  ;;  %v2500_v27 = vsel %vm2492_vm13, %v2474_v46, %v2496_v47  ;;  %v8066_v12 = vpack.c.bf16 %v250_v45, %v249_v44 }
 0xf94   :  { %v2499_v58 = vmul.f32 0.1, %v2489_v37  ;;  %6528 = vmatprep.mubr.msk.f32.mxu0 %vm493_vm3, %v2500_v27  ;;  %vm2495_vm14 = vcmp.ge.f32.partialorder %v2489_v37, 0.0 }
 0xf95   :  { %vm2494_vm5 = vcmp.ge.f32.partialorder %v2484_v28, 0.0  ;;  %v2498_v56 = vmul.f32 0.1, %v2484_v28  ;;  %6529 = vmatmul.mubr.msk.f32.vlgmr.msra.gmra.mrb[28].mxu0 %vm493_vm3, %v2501_v52  ;;  %7003 = vmatprep.subr.bf16.mxu1 %v8066_v12 }
 0xf96   :  { %v2503_v53 = vsel %vm2495_vm14, %v2489_v37, %v2499_v58  ;;  %7005 = vmatpush3.bf16.msra.mxu1 %v8066_v12  ;;  %v252_v58 = vld [vmem:[%s8074_s20] sm:$0xff] }
 0xf97   :  { %v2502_v25 = vsel %vm2494_vm5, %v2484_v28, %v2498_v56  ;;  %7027 = vmatprep.subr.bf16.mxu1 %v7473_v3  ;;  %v5852_v37 = vld [vmem:[%s8085_s25] ss:$0 sm:$0xff] }
 0xf98   :  { %6531 = vmatprep.mubr.msk.f32.mxu0 %vm493_vm3, %v2502_v25 }
 0xf99   :  { %6532 = vmatmul.mubr.msk.f32.gmra.mrb[30].mxu0 %vm493_vm3, %v2503_v53  ;;  %v253_v53 = vld [vmem:[%s8074_s20 + $0x8] sm:$0xff] }
 0xf9a   :  { %v8078_v46 = vpack.c.bf16 %v253_v53, %v252_v58  ;;  %v260_v53 = vld [vmem:[%s5755_s9 + $0x8] sm:$0xff] }
 0xf9c   :  { %7007 = vmatprep.subr.bf16.mxu0 %v8078_v46 }
 0xf9d   :  { %7009 = vmatpush3.bf16.msra.mxu0 %v8078_v46 }
0x1068   :  { %v6530_v52 = vpop.f32.mrb[28].mxu0 }
0x1069   :  { %v2594_v27 = vadd.f32 %v6530_v52, %v5852_v37  ;;  %v2588_v59 = vpop.f32.mrb[29].mxu0  ;;  %v5857_v52 = vld [vmem:[%s8148_s13] ss:$0 sm:$0xff] }
0x106a   :  { %v2589_v28 = vadd.f32 %v5852_v37, %v2588_v59 }
0x106b   :  { %v8095_v29 = vadd.f32 %v2594_v27, %v8018_v30  ;;  %v5872_v30 = vld [vmem:[%s5722_s2 + $0x20] sm:$0xff] }
0x106c   :  { %v8092_v45 = vadd.f32 %v2589_v28, %v8020_v41  ;;  %v6533_v31 = vpop.f32.mrb[30].mxu0 }
0x106d   :  { %v2604_v51 = vadd.f32 %v6533_v31, %v5852_v37  ;;  %v2598_v47 = vpop.f32.mrb[31].mxu0 }
0x106e   :  { %v2599_v56 = vadd.f32 %v5852_v37, %v2598_v47  ;;  %6542 = vmatprep.mubr.msk.f32.mxu1 %vm493_vm3, %v8092_v45  ;;  %v261_v47 = vld [vmem:[%s5755_s9 + $0x10] sm:$0xff] }
0x106f   :  { %6543 = vmatmul.mubr.msk.f32.vlgmr.msra.gmra.mrb[28].mxu1 %vm493_vm3, %v8095_v29  ;;  %v8106_v41 = vadd.f32 %v2604_v51, %v8026_v19  ;;  %v5874_v19 = vld [vmem:[%s5722_s2 + $0x30] sm:$0xff] }
0x1070   :  { %v8102_v25 = vadd.f32 %v2599_v56, %v8030_v22  ;;  %7029 = vmatpush3.bf16.msra.mxu1 %v7473_v3  ;;  %v5873_v3 = vld [vmem:[%s5722_s2 + $0x28] sm:$0xff]  ;;  %v5875_v22 = vld [vmem:[%s5722_s2 + $0x38] sm:$0xff] }
0x1071   :  { %7031 = vmatprep.subr.bf16.mxu1 %v7475_v5  ;;  %v262_v56 = vld [vmem:[%s5755_s9 + $0x18] sm:$0xff] }
0x1072   :  { %6545 = vmatprep.mubr.msk.f32.mxu1 %vm493_vm3, %v8102_v25 }
0x1073   :  { %6546 = vmatmul.mubr.msk.f32.gmra.mrb[30].mxu1 %vm493_vm3, %v8106_v41 }
0x1074   :  { %7033 = vmatpush3.bf16.msra.mxu1 %v7475_v5  ;;  %6592 = vmatprep.mubr.msk.f32.mxu1 %vm274_vm0, %v5872_v30  ;;  %v254_v5 = vld [vmem:[%s8074_s20 + $0x10] sm:$0xff] }
0x1075   :  { %7035 = vmatprep.subr.bf16.mxu1 %v7488_v14 }
0x1078   :  { %7037 = vmatpush3.bf16.msra.mxu1 %v7488_v14  ;;  %v255_v14 = vld [vmem:[%s8074_s20 + $0x18] sm:$0xff] }
0x1079   :  { %7039 = vmatprep.subr.bf16.mxu1 %v7483_v11  ;;  %v8129_v44 = vpack.c.bf16 %v255_v14, %v254_v5 }
0x107b   :  { %6593 = vmatmul.mubr.msk.f32.vlgmr.msra.gmra.mrb[32].mxu1 %vm274_vm0, %v5873_v3  ;;  %7011 = vmatprep.subr.bf16.mxu0 %v8129_v44 }
0x107c   :  { %6595 = vmatprep.mubr.msk.f32.mxu1 %vm274_vm0, %v5874_v19  ;;  %7041 = vmatpush3.bf16.msra.mxu1 %v7483_v11  ;;  %v256_v11 = vld [vmem:[%s8074_s20 + $0x20] sm:$0xff] }
0x107d   :  { %7043 = vmatprep.subr.bf16.mxu1 %v7490_v15  ;;  %7013 = vmatpush3.bf16.msra.mxu0 %v8129_v44 }
0x107f   :  { %6596 = vmatmul.mubr.msk.f32.gmra.mrb[34].mxu1 %vm274_vm0, %v5875_v22 }
0x1080   :  { %7045 = vmatpush3.bf16.msra.mxu1 %v7490_v15  ;;  %v257_v15 = vld [vmem:[%s8074_s20 + $0x28] sm:$0xff] }
0x1081   :  { %7047 = vmatprep.subr.bf16.mxu1 %v7507_v21  ;;  %v8138_v58 = vpack.c.bf16 %v257_v15, %v256_v11  ;;  %v8151_v11 = vpack.c.bf16 %v262_v56, %v261_v47 }
0x1083   :  { %7015 = vmatprep.subr.bf16.mxu0 %v8138_v58  ;;  %9092 = vst [vmem:[#allocation28_spill] sm:$0xff] %v8151_v11 }
0x1084   :  { %7049 = vmatpush3.bf16.msra.mxu1 %v7507_v21  ;;  %7017 = vmatpush3.bf16.msra.mxu0 %v8138_v58  ;;  %v259_v21 = vld [vmem:[%s5755_s9] sm:$0xff] }
0x1085   :  { %7071 = vmatprep.subr.bf16.mxu1 %v7585_v1  ;;  %v8142_v37 = vpack.c.bf16 %v260_v53, %v259_v21 }
0x1087   :  { %9091 = vst [vmem:[#allocation27_spill] sm:$0xff] %v8142_v37  ;;  %7019 = vmatprep.subr.bf16.mxu0 %v8142_v37 }
0x1142   :  { %v6544_v27 = vpop.f32.mrb[28].mxu1 }
0x1143   :  { %v2701_v59 = vadd.f32 %v6544_v27, %v5857_v52  ;;  %v2695_v28 = vpop.f32.mrb[29].mxu1 }
0x1144   :  { %v2696_v31 = vadd.f32 %v5857_v52, %v2695_v28 }
0x1145   :  { %v2719_v51 = vmul.f32 0.1, %v2701_v59  ;;  %vm2715_vm15 = vcmp.ge.f32.partialorder %v2701_v59, 0.0 }
0x1146   :  { %vm2714_vm7 = vcmp.ge.f32.partialorder %v2696_v31, 0.0  ;;  %v2718_v30 = vmul.f32 0.1, %v2696_v31  ;;  %v6547_v3 = vpop.f32.mrb[30].mxu1 }
0x1147   :  { %v2711_v19 = vadd.f32 %v6547_v3, %v5857_v52  ;;  %v2705_v22 = vpop.f32.mrb[31].mxu1  ;;  %v2723_v15 = vsel %vm2715_vm15, %v2701_v59, %v2719_v51 }
0x1148   :  { %v2706_v5 = vadd.f32 %v5857_v52, %v2705_v22  ;;  %v2722_v14 = vsel %vm2714_vm7, %v2696_v31, %v2718_v30  ;;  %v7405_v31 = vld [vmem:[%s7521_s21] ss:$0 sm:$0xff]  ;;  %s7452_s21 = smov 33  }
0x1149   :  { %v2721_v21 = vmul.f32 0.1, %v2711_v19  ;;  %6560 = vmatprep.mubr.msk.f32.mxu0 %vm274_vm0, %v2722_v14  ;;  %vm2717_vm8 = vcmp.ge.f32.partialorder %v2711_v19, 0.0 }
0x114a   :  { %vm2716_vm9 = vcmp.ge.f32.partialorder %v2706_v5, 0.0  ;;  %v2720_v53 = vmul.f32 0.1, %v2706_v5  ;;  %6561 = vmatmul.mubr.msk.f32.vlgmr.msra.gmra.mrb[32].mxu0 %vm274_vm0, %v2723_v15 }
0x114b   :  { %7021 = vmatpush3.bf16.msra.mxu0 %v8142_v37  ;;  %v2725_v52 = vsel %vm2717_vm8, %v2711_v19, %v2721_v21 }
0x114c   :  { %v2724_v27 = vsel %vm2716_vm9, %v2706_v5, %v2720_v53  ;;  %7023 = vmatprep.subr.bf16.mxu0 %v8151_v11 }
0x114d   :  { %6563 = vmatprep.mubr.msk.f32.mxu0 %vm274_vm0, %v2724_v27 }
0x114e   :  { %v6594_v28 = vpop.f32.mrb[32].mxu1  ;;  %6564 = vmatmul.mubr.msk.f32.gmra.mrb[34].mxu0 %vm274_vm0, %v2725_v52 }
0x114f   :  { %v3035_v59 = vpop.f32.mrb[33].mxu1  ;;  %7025 = vmatpush3.bf16.msra.mxu0 %v8151_v11  ;;  %6574 = vmatprep.mubr.msk.f32.mxu0 %vm493_vm3, %v8092_v45  ;;  %v8166_v47 = vadd.f32 %v7405_v31, %v6594_v28 }
0x1150   :  { %v8163_v51 = vadd.f32 %v7405_v31, %v3035_v59  ;;  %7051 = vmatprep.subr.bf16.mxu0 %v7514_v24 }
0x1151   :  { %9094 = vst [vmem:[#allocation30_spill] sm:$0xff] %v8166_v47 }
0x1152   :  { %9093 = vst [vmem:[#allocation29_spill] sm:$0xff] %v8163_v51  ;;  %v6597_v56 = vpop.f32.mrb[34].mxu1  ;;  %6610 = vmatprep.mubr.msk.f32.mxu1 %vm274_vm0, %v8163_v51  ;;  %6575 = vmatmul.mubr.msk.f32.vlgmr.msra.gmra.mrb[32].mxu0 %vm493_vm3, %v8095_v29 }
0x1153   :  { %v8172_v30 = vadd.f32 %v7405_v31, %v6597_v56  ;;  %v3045_v3 = vpop.f32.mrb[35].mxu1  ;;  %6611 = vmatmul.mubr.msk.f32.vlgmr.msra.gmra.mrb[36].mxu1 %vm274_vm0, %v8166_v47  ;;  %6577 = vmatprep.mubr.msk.f32.mxu0 %vm493_vm3, %v8102_v25  ;;  %v7406_v25 = vld [vmem:[%s7557_s29] ss:$0 sm:$0xff] }
0x1154   :  { %v8178_v45 = vadd.f32 %v7405_v31, %v3045_v3  ;;  %7053 = vmatpush3.bf16.msra.mxu0 %v7514_v24  ;;  %7073 = vmatpush3.bf16.msra.mxu1 %v7585_v1 }
0x1155   :  { %9095 = vst [vmem:[#allocation31_spill] sm:$0xff] %v8172_v30  ;;  %7055 = vmatprep.subr.bf16.mxu0 %v7545_v36  ;;  %7075 = vmatprep.subr.bf16.mxu1 %v7598_v6 }
0x1156   :  { %9096 = vst [vmem:[#allocation32_spill] sm:$0xff] %v8178_v45  ;;  %6613 = vmatprep.mubr.msk.f32.mxu1 %vm274_vm0, %v8178_v45  ;;  %6578 = vmatmul.mubr.msk.f32.gmra.mrb[34].mxu0 %vm493_vm3, %v8106_v41 }
0x1157   :  { %6614 = vmatmul.mubr.msk.f32.gmra.mrb[38].mxu1 %vm274_vm0, %v8172_v30 }
0x1158   :  { %7057 = vmatpush3.bf16.msra.mxu0 %v7545_v36  ;;  %7077 = vmatpush3.bf16.msra.mxu1 %v7598_v6 }
0x1159   :  { %7059 = vmatprep.subr.bf16.mxu0 %v7551_v39  ;;  %7079 = vmatprep.subr.bf16.mxu1 %v7605_v9 }
0x1225   :  { %v8194_v24 = vpop.f32.mrb[32].mxu0 }
0x1226   :  { %v6612_v1 = vpop.f32.mrb[36].mxu1  ;;  %v8196_v29 = vpop.f32.mrb[33].mxu0 }
0x1227   :  { %v3138_v19 = vadd.f32 %v7406_v25, %v6612_v1  ;;  %v3132_v22 = vpop.f32.mrb[37].mxu1 }
0x1228   :  { %v3133_v41 = vadd.f32 %v7406_v25, %v3132_v22 }
0x1229   :  { %v3156_v5 = vmul.f32 0.1, %v3138_v19  ;;  %v8199_v14 = vpop.f32.mrb[34].mxu0  ;;  %vm3152_vm12 = vcmp.ge.f32.partialorder %v3138_v19, 0.0 }
0x122a   :  { %vm3151_vm13 = vcmp.ge.f32.partialorder %v3133_v41, 0.0  ;;  %v3155_v36 = vmul.f32 0.1, %v3133_v41  ;;  %v6615_v6 = vpop.f32.mrb[38].mxu1  ;;  %v8201_v15 = vpop.f32.mrb[35].mxu0 }
0x122b   :  { %v3148_v21 = vadd.f32 %v7406_v25, %v6615_v6  ;;  %v3142_v53 = vpop.f32.mrb[39].mxu1  ;;  %v3160_v28 = vsel %vm3152_vm12, %v3138_v19, %v3156_v5 }
0x122c   :  { %v3143_v27 = vadd.f32 %v7406_v25, %v3142_v53  ;;  %v3159_v52 = vsel %vm3151_vm13, %v3133_v41, %v3155_v36  ;;  %v7407_v41 = vld [vmem:[%s7642_s19] ss:$0 sm:$0xff] }
0x122d   :  { %v3158_v59 = vmul.f32 0.1, %v3148_v21  ;;  %6624 = vmatprep.mubr.msk.f32.mxu0 %vm493_vm3, %v3159_v52  ;;  %vm3154_vm14 = vcmp.ge.f32.partialorder %v3148_v21, 0.0 }
0x122e   :  { %vm3153_vm5 = vcmp.ge.f32.partialorder %v3143_v27, 0.0  ;;  %v3157_v31 = vmul.f32 0.1, %v3143_v27  ;;  %6625 = vmatmul.mubr.msk.f32.vlgmr.msra.gmra.mrb[36].mxu0 %vm493_vm3, %v3160_v28 }
0x122f   :  { %7061 = vmatpush3.bf16.msra.mxu0 %v7551_v39  ;;  %v3162_v3 = vsel %vm3154_vm14, %v3148_v21, %v3158_v59 }
0x1230   :  { %v3161_v56 = vsel %vm3153_vm5, %v3143_v27, %v3157_v31  ;;  %7063 = vmatprep.subr.bf16.mxu0 %v7567_v54 }
0x1231   :  { %6627 = vmatprep.mubr.msk.f32.mxu0 %vm493_vm3, %v3161_v56 }
0x1232   :  { %6628 = vmatmul.mubr.msk.f32.gmra.mrb[38].mxu0 %vm493_vm3, %v3162_v3 }
0x1233   :  { %7065 = vmatpush3.bf16.msra.mxu0 %v7567_v54  ;;  %6642 = vmatprep.mubr.msk.f32.mxu0 %vm274_vm0, %v8163_v51 }
0x1234   :  { %7067 = vmatprep.subr.bf16.mxu0 %v7575_v61 }
0x1237   :  { %7069 = vmatpush3.bf16.msra.mxu0 %v7575_v61 }
0x1238   :  { %7087 = vmatprep.subr.bf16.mxu0 %v7652_v57 }
0x123a   :  { %6643 = vmatmul.mubr.msk.f32.vlgmr.msra.gmra.mrb[36].mxu0 %vm274_vm0, %v8166_v47 }
0x123b   :  { %6645 = vmatprep.mubr.msk.f32.mxu0 %vm274_vm0, %v8178_v45  ;;  %7089 = vmatpush3.bf16.msra.mxu0 %v7652_v57 }
0x123c   :  { %7091 = vmatprep.subr.bf16.mxu0 %v7656_v60 }
0x123e   :  { %6646 = vmatmul.mubr.msk.f32.gmra.mrb[38].mxu0 %vm274_vm0, %v8172_v30 }
0x123f   :  { %7093 = vmatpush3.bf16.msra.mxu0 %v7656_v60 }
0x1240   :  { %7102 = vmatprep.subr.msk.bf16.mxu0 %vm7776_vm1, %v7669_v7 }
0x130d   :  { %v6644_v39 = vpop.f32.mrb[36].mxu0 }
0x130e   :  { %v3326_v54 = vpop.f32.mrb[37].mxu0  ;;  %v7207_v1 = vadd.f32 %v7615_v18, %v6644_v39 }
0x130f   :  { %v7209_v61 = vadd.f32 %v7615_v18, %v3326_v54  ;;  %v7408_v54 = vld [vmem:[%s7681_s3] ss:$0 sm:$0xff]  ;;  %s5754_s3 = sld [smem:[%s9004_s0 + %s7452_s21]]  }
0x1311   :  { %v6647_v25 = vpop.f32.mrb[38].mxu0  ;;  %6656 = vmatprep.mubr.msk.f32.mxu1 %vm493_vm3, %v7209_v61 }
0x1312   :  { %v3336_v57 = vpop.f32.mrb[39].mxu0  ;;  %6657 = vmatmul.mubr.msk.f32.vlgmr.msra.gmra.mrb[40].mxu1 %vm493_vm3, %v7207_v1  ;;  %v7211_v60 = vadd.f32 %v7615_v18, %v6647_v25 }
0x1313   :  { %v7213_v19 = vadd.f32 %v7615_v18, %v3336_v57  ;;  %7081 = vmatpush3.bf16.msra.mxu1 %v7605_v9 }
0x1314   :  { %7083 = vmatprep.subr.bf16.mxu1 %v7635_v34 }
0x1315   :  { %6659 = vmatprep.mubr.msk.f32.mxu1 %vm493_vm3, %v7213_v19 }
0x1316   :  { %6660 = vmatmul.mubr.msk.f32.gmra.mrb[42].mxu1 %vm493_vm3, %v7211_v60 }
0x1317   :  { %7085 = vmatpush3.bf16.msra.mxu1 %v7635_v34 }
0x1318   :  { %7096 = vmatprep.subr.msk.bf16.mxu1 %vm7665_vm11, %v7669_v7 }
0x13e5   :  { %v6658_v22 = vpop.f32.mrb[40].mxu1 }
0x13e6   :  { %v3433_v5 = vadd.f32 %v7407_v41, %v6658_v22  ;;  %v3427_v36 = vpop.f32.mrb[41].mxu1 }
0x13e7   :  { %v3428_v6 = vadd.f32 %v7407_v41, %v3427_v36 }
0x13e8   :  { %v3451_v9 = vmul.f32 0.1, %v3433_v5  ;;  %vm3447_vm15 = vcmp.ge.f32.partialorder %v3433_v5, 0.0 }
0x13e9   :  { %vm3446_vm7 = vcmp.ge.f32.partialorder %v3428_v6, 0.0  ;;  %v3450_v18 = vmul.f32 0.1, %v3428_v6  ;;  %v6661_v21 = vpop.f32.mrb[42].mxu1 }
0x13ea   :  { %v3443_v53 = vadd.f32 %v7407_v41, %v6661_v21  ;;  %v3437_v27 = vpop.f32.mrb[43].mxu1  ;;  %v3455_v34 = vsel %vm3447_vm15, %v3433_v5, %v3451_v9 }
0x13eb   :  { %v3438_v52 = vadd.f32 %v7407_v41, %v3437_v27  ;;  %v3454_v28 = vsel %vm3446_vm7, %v3428_v6, %v3450_v18 }
0x13ec   :  { %v3453_v59 = vmul.f32 0.1, %v3443_v53  ;;  %6670 = vmatprep.mubr.msk.f32.mxu1 %vm493_vm3, %v3454_v28  ;;  %vm3449_vm8 = vcmp.ge.f32.partialorder %v3443_v53, 0.0 }
0x13ed   :  { %vm3448_vm9 = vcmp.ge.f32.partialorder %v3438_v52, 0.0  ;;  %v3452_v31 = vmul.f32 0.1, %v3438_v52  ;;  %6671 = vmatmul.mubr.msk.f32.vlgmr.msra.gmra.mrb[44].mxu1 %vm493_vm3, %v3455_v34 }
0x13ee   :  { %7099 = vmatpush3.bf16.xpose.msk.msra.mxu1 %vm7665_vm11, %v7669_v7  ;;  %v3457_v3 = vsel %vm3449_vm8, %v3443_v53, %v3453_v59 }
0x13ef   :  { %v3456_v56 = vsel %vm3448_vm9, %v3438_v52, %v3452_v31  ;;  %7107 = vmatprep.subr.bf16.mxu1 %v7789_v8 }
0x13f0   :  { %6673 = vmatprep.mubr.msk.f32.mxu1 %vm493_vm3, %v3456_v56  ;;  %v7409_v56 = vld [vmem:[%s7715_s7] ss:$0 sm:$0xff]  ;;  %s7453_s7 = smov 35  }
0x13f1   :  { %6674 = vmatmul.mubr.msk.f32.gmra.mrb[46].mxu1 %vm493_vm3, %v3457_v3  ;;  %s5756_s14 = sld [smem:[%s9004_s0 + %s7453_s7]]  }
0x14c0   :  { %v6672_v39 = vpop.f32.mrb[44].mxu1 }
0x14c1   :  { %v3542_v25 = vadd.f32 %v7408_v54, %v6672_v39  ;;  %v3536_v57 = vpop.f32.mrb[45].mxu1 }
0x14c2   :  { %v3537_v22 = vadd.f32 %v7408_v54, %v3536_v57 }
0x14c3   :  { %v8251_v41 = vadd.f32 %v7207_v1, %v3542_v25 }
0x14c4   :  { %v8253_v5 = vadd.f32 %v7209_v61, %v3537_v22  ;;  %v6675_v36 = vpop.f32.mrb[46].mxu1 }
0x14c5   :  { %v3564_v6 = vmul.f32 0.1, %v8251_v41  ;;  %v3552_v9 = vadd.f32 %v7408_v54, %v6675_v36  ;;  %v3546_v18 = vpop.f32.mrb[47].mxu1  ;;  %vm3560_vm12 = vcmp.ge.f32.partialorder %v8251_v41, 0.0 }
0x14c6   :  { %v3547_v21 = vadd.f32 %v7408_v54, %v3546_v18  ;;  %vm3559_vm13 = vcmp.ge.f32.partialorder %v8253_v5, 0.0  ;;  %v3563_v53 = vmul.f32 0.1, %v8253_v5 }
0x14c7   :  { %v8259_v27 = vadd.f32 %v7211_v60, %v3552_v9  ;;  %v3568_v61 = vsel %vm3560_vm12, %v8251_v41, %v3564_v6 }
0x14c8   :  { %v8261_v52 = vadd.f32 %v7213_v19, %v3547_v21  ;;  %v3567_v1 = vsel %vm3559_vm13, %v8253_v5, %v3563_v53 }
0x14c9   :  { %6684 = vmatprep.mubr.msk.f32.mxu0 %vm493_vm3, %v3567_v1  ;;  %v3566_v28 = vmul.f32 0.1, %v8259_v27  ;;  %vm3562_vm5 = vcmp.ge.f32.partialorder %v8259_v27, 0.0 }
0x14ca   :  { %6685 = vmatmul.mubr.msk.f32.vlgmr.msra.gmra.mrb[40].mxu0 %vm493_vm3, %v3568_v61  ;;  %vm3561_vm14 = vcmp.ge.f32.partialorder %v8261_v52, 0.0  ;;  %v3565_v34 = vmul.f32 0.1, %v8261_v52 }
0x14cb   :  { %7105 = vmatpush3.bf16.msk.msra.mxu0 %vm7776_vm1, %v7669_v7  ;;  %v3570_v60 = vsel %vm3562_vm5, %v8259_v27, %v3566_v28 }
0x14cc   :  { %v3569_v19 = vsel %vm3561_vm14, %v8261_v52, %v3565_v34  ;;  %7119 = vmatprep.subr.bf16.mxu0 %v7814_v26 }
0x14cd   :  { %6687 = vmatprep.mubr.msk.f32.mxu0 %vm493_vm3, %v3569_v19 }
0x14ce   :  { %6688 = vmatmul.mubr.msk.f32.gmra.mrb[42].mxu0 %vm493_vm3, %v3570_v60 }
0x159d   :  { %v6686_v59 = vpop.f32.mrb[40].mxu0 }
0x159e   :  { %v3649_v31 = vpop.f32.mrb[41].mxu0  ;;  %v8282_v39 = vadd.f32 %v7409_v56, %v6686_v59 }
0x159f   :  { %v8280_v3 = vadd.f32 %v7409_v56, %v3649_v31 }
0x15a1   :  { %v6689_v54 = vpop.f32.mrb[42].mxu0  ;;  %6694 = vmatprep.mubr.msk.f32.mxu1 %vm1025_vm10, %v8280_v3 }
0x15a2   :  { %v3659_v7 = vpop.f32.mrb[43].mxu0  ;;  %6695 = vmatmul.mubr.msk.f32.vlgmr.msra.gmra.mrb[48].mxu1 %vm1025_vm10, %v8282_v39  ;;  %v8291_v25 = vadd.f32 %v7409_v56, %v6689_v54 }
0x15a3   :  { %v8288_v48 = vadd.f32 %v7409_v56, %v3659_v7  ;;  %7109 = vmatpush3.bf16.msra.mxu1 %v7789_v8 }
0x15a4   :  { %7111 = vmatprep.subr.bf16.mxu1 %v7808_v20 }
0x15a5   :  { %6697 = vmatprep.mubr.msk.f32.mxu1 %vm1025_vm10, %v8288_v48 }
0x15a6   :  { %6698 = vmatmul.mubr.msk.f32.gmra.mrb[50].mxu1 %vm1025_vm10, %v8291_v25 }
0x1675   :  { %v6696_v57 = vpop.f32.mrb[48].mxu1 }
0x1676   :  { %v3766_v22 = vmul.f32 2.0, %v6696_v57  ;;  %v3746_v36 = vpop.f32.mrb[49].mxu1 }
0x1677   :  { %v3765_v6 = vmul.f32 2.0, %v3746_v36 }
0x1678   :  { %v8299_v9 = vsub.f32 %v7739_v2, %v3766_v22 }
0x1679   :  { %v8302_v18 = vsub.f32 %v7739_v2, %v3765_v6  ;;  %v6699_v8 = vpop.f32.mrb[50].mxu1 }
0x167a   :  { %v3756_v21 = vpop.f32.mrb[51].mxu1  ;;  %v3824_v53 = vsel %vm1184_vm2, %v8299_v9, inf  ;;  %v3768_v1 = vmul.f32 2.0, %v6699_v8 }
0x167b   :  { %v3767_v61 = vmul.f32 2.0, %v3756_v21  ;;  %3825 = vmin.xlane.f32.xlu1 %v3824_v53  ;;  %v3821_v28 = vsel %vm1184_vm2, %v8302_v18, inf }
0x167c   :  { %3822 = vmin.xlane.f32.xlu0 %v3821_v28  ;;  %v8312_v19 = vsub.f32 %v7739_v2, %v3768_v1 }
0x167d   :  { %v8309_v34 = vsub.f32 %v7739_v2, %v3767_v61 }
0x167e   :  { %v3830_v59 = vsel %vm1184_vm2, %v8312_v19, inf }
0x167f   :  { %v3827_v60 = vsel %vm1184_vm2, %v8309_v34, inf }
0x1680   :  { %3828 = vmin.xlane.f32.xlu1 %v3827_v60 }
0x1684   :  { %3831 = vmin.xlane.f32.xlu1 %v3830_v59 }
0x1708   :  { %v3826_v31 = vpop.xlane.xlu1 %3825 }
0x1709   :  { %vm3834_vm1 = vcmp.eq.f32.partialorder %v8299_v9, %v3826_v31  ;;  %v3823_v56 = vpop.xlane.xlu0 %3822 }
0x170a   :  { %v3838_v54 = vsel %vm3834_vm1, %v7761_v43, 12  ;;  %vm3833_vm15 = vcmp.eq.f32.partialorder %v8302_v18, %v3823_v56 }
0x170b   :  { %v3837_v7 = vsel %vm3833_vm15, %v7761_v43, 12  ;;  %v3856_v2 = vsel %vm1184_vm2, %v3838_v54, 2147483647 }
0x170c   :  { %v3841_v57 = vsel %vm1184_vm2, %v3837_v7, 2147483647  ;;  %v3858_v22 = vshra.s32 %v3856_v2, 16  ;;  %v3857_v7 = vand.u32 65535, %v3856_v2 }
0x170d   :  { %v3829_v36 = vpop.xlane.xlu1 %3828  ;;  %v3843_v8 = vshra.s32 %v3841_v57, 16  ;;  %v3842_v45 = vand.u32 65535, %v3841_v57 }
0x170e   :  { %vm3835_vm7 = vcmp.eq.f32.partialorder %v8309_v34, %v3829_v36  ;;  %v3860_v6 = vcvt.s32.f32 %v3858_v22  ;;  %v3859_v36 = vcvt.s32.f32 %v3857_v7 }
0x170f   :  { %v3839_v21 = vsel %vm3835_vm7, %v7761_v43, 12  ;;  %v3845_v61 = vcvt.s32.f32 %v3843_v8  ;;  %v3844_v8 = vcvt.s32.f32 %v3842_v45 }
0x1710   :  { %3861 = vmin.xlane.f32.xlu1 %v3860_v6  ;;  %v3871_v53 = vsel %vm1184_vm2, %v3839_v21, 2147483647 }
0x1711   :  { %v3832_v1 = vpop.xlane.xlu1 %3831  ;;  %v3873_v28 = vshra.s32 %v3871_v53, 16  ;;  %v3872_v30 = vand.u32 65535, %v3871_v53 }
0x1712   :  { %vm3836_vm8 = vcmp.eq.f32.partialorder %v8312_v19, %v3832_v1 }
0x1713   :  { %v3840_v60 = vsel %vm3836_vm8, %v7761_v43, 12  ;;  %v3875_v31 = vcvt.s32.f32 %v3873_v28 }
0x1714   :  { %3846 = vmin.xlane.f32.xlu1 %v3845_v61  ;;  %v3886_v59 = vsel %vm1184_vm2, %v3840_v60, 2147483647  ;;  %v3874_v60 = vcvt.s32.f32 %v3872_v30 }
0x1715   :  { %v3888_v56 = vshra.s32 %v3886_v59, 16  ;;  %v3887_v28 = vand.u32 65535, %v3886_v59 }
0x1717   :  { %v3890_v54 = vcvt.s32.f32 %v3888_v56  ;;  %v3889_v2 = vcvt.s32.f32 %v3887_v28 }
0x1718   :  { %3876 = vmin.xlane.f32.xlu1 %v3875_v31 }
0x171c   :  { %3891 = vmin.xlane.f32.xlu1 %v3890_v54 }
0x179d   :  { %v3862_v22 = vpop.xlane.xlu1 %3861 }
0x179e   :  { %vm3863_vm9 = vcmp.eq.f32.partialorder %v3860_v6, %v3862_v22  ;;  %v3868_v57 = vcvt.f32.s32 %v3862_v22 }
0x179f   :  { %v3864_v21 = vsel %vm3863_vm9, %v3859_v36, inf }
0x17a0   :  { %3865 = vmin.xlane.f32.xlu1 %v3864_v21  ;;  %v3869_v45 = vshll.u32 %v3868_v57, 16 }
0x17a1   :  { %v3847_v1 = vpop.xlane.xlu1 %3846 }
0x17a2   :  { %vm3848_vm12 = vcmp.eq.f32.partialorder %v3845_v61, %v3847_v1  ;;  %v3853_v36 = vcvt.f32.s32 %v3847_v1 }
0x17a3   :  { %v3849_v51 = vsel %vm3848_vm12, %v3844_v8, inf }
0x17a4   :  { %3850 = vmin.xlane.f32.xlu1 %v3849_v51  ;;  %v3854_v8 = vshll.u32 %v3853_v36, 16 }
0x17a5   :  { %v3877_v47 = vpop.xlane.xlu1 %3876 }
0x17a6   :  { %vm3878_vm13 = vcmp.eq.f32.partialorder %v3875_v31, %v3877_v47  ;;  %v3883_v51 = vcvt.f32.s32 %v3877_v47 }
0x17a7   :  { %v3879_v11 = vsel %vm3878_vm13, %v3874_v60, inf }
0x17a8   :  { %3880 = vmin.xlane.f32.xlu1 %v3879_v11  ;;  %v3884_v11 = vshll.u32 %v3883_v51, 16 }
0x17a9   :  { %v3892_v56 = vpop.xlane.xlu1 %3891 }
0x17aa   :  { %vm3893_vm14 = vcmp.eq.f32.partialorder %v3890_v54, %v3892_v56  ;;  %v3898_v31 = vcvt.f32.s32 %v3892_v56 }
0x17ab   :  { %v3894_v7 = vsel %vm3893_vm14, %v3889_v2, inf }
0x17ac   :  { %3895 = vmin.xlane.f32.xlu1 %v3894_v7  ;;  %v3899_v28 = vshll.u32 %v3898_v31, 16 }
0x182d   :  { %v3866_v6 = vpop.xlane.xlu1 %3865 }
0x182e   :  { %v3867_v21 = vcvt.f32.s32 %v3866_v6 }
0x1830   :  { %v3870_v53 = vadd.s32 %v3869_v45, %v3867_v21 }
0x1831   :  { %v3851_v61 = vpop.xlane.xlu1 %3850 }
0x1832   :  { %v3852_v37 = vcvt.f32.s32 %v3851_v61  ;;  %vm3902_vm5 = vcmp.eq.s32.totalorder %v7761_v43, %v3870_v53 }
0x1833   :  { %v5911_v22 = vsel %vm3902_vm5, 1.0, %v9082_v33 }
0x1834   :  { %v3855_v30 = vadd.s32 %v3854_v8, %v3852_v37 }
0x1835   :  { %v3881_v59 = vpop.xlane.xlu1 %3880 }
0x1836   :  { %v3882_v60 = vcvt.f32.s32 %v3881_v59  ;;  %vm3901_vm1 = vcmp.eq.s32.totalorder %v7761_v43, %v3855_v30 }
0x1837   :  { %v5910_v54 = vsel %vm3901_vm1, 1.0, %v9082_v33 }
0x1838   :  { %v3885_v1 = vadd.s32 %v3884_v11, %v3882_v60  ;;  %6704 = vmatprep.mubr.msk.f32.mxu0 %vm1184_vm2, %v5910_v54  ;;  %v7411_v54 = vld [vmem:[%s7876_s5] ss:$0 sm:$0xff] }
0x1839   :  { %6705 = vmatmul.mubr.msk.f32.vlgmr.msra.gmra.mrb[44].mxu0 %vm1184_vm2, %v5911_v22  ;;  %v3896_v47 = vpop.xlane.xlu1 %3895 }
0x183a   :  { %v3897_v37 = vcvt.f32.s32 %v3896_v47  ;;  %vm3903_vm15 = vcmp.eq.s32.totalorder %v7761_v43, %v3885_v1  ;;  %7121 = vmatpush3.bf16.msra.mxu0 %v7814_v26 }
0x183b   :  { %v5912_v56 = vsel %vm3903_vm15, 1.0, %v9082_v33  ;;  %7123 = vmatprep.subr.bf16.mxu0 %v7847_v63 }
0x183c   :  { %v3900_v2 = vadd.s32 %v3899_v28, %v3897_v37  ;;  %6707 = vmatprep.mubr.msk.f32.mxu0 %vm1184_vm2, %v5912_v56 }
0x183e   :  { %vm3904_vm7 = vcmp.eq.s32.totalorder %v7761_v43, %v3900_v2  ;;  %7125 = vmatpush3.bf16.msra.mxu0 %v7847_v63 }
0x183f   :  { %v5913_v7 = vsel %vm3904_vm7, 1.0, %v9082_v33  ;;  %7128 = vmatprep.subr.msk.bf16.mxu0 %vm7665_vm11, %v7854_v17 }
0x1840   :  { %6708 = vmatmul.mubr.msk.f32.gmra.mrb[46].mxu0 %vm1184_vm2, %v5913_v7 }
0x190c   :  { %v8348_v26 = vpop.f32.mrb[44].mxu0 }
0x190d   :  { %v8350_v57 = vpop.f32.mrb[45].mxu0 }
0x190e   :  { %6714 = vmatprep.mubr.msk.f32.mxu1 %vm1025_vm10, %v8350_v57 }
0x190f   :  { %6715 = vmatmul.mubr.msk.f32.vlgmr.msra.gmra.mrb[52].mxu1 %vm1025_vm10, %v8348_v26 }
0x1910   :  { %7113 = vmatpush3.bf16.msra.mxu1 %v7808_v20 }
0x1911   :  { %7115 = vmatprep.subr.bf16.mxu1 %v7822_v4 }
0x1913   :  { %v8358_v63 = vpop.f32.mrb[46].mxu0 }
0x1914   :  { %v8360_v6 = vpop.f32.mrb[47].mxu0  ;;  %7117 = vmatpush3.bf16.msra.mxu1 %v7822_v4  ;;  %v7410_v4 = vld [vmem:[%s7863_s30] ss:$0 sm:$0xff] }
0x1915   :  { %6717 = vmatprep.mubr.msk.f32.mxu1 %vm1025_vm10, %v8360_v6  ;;  %7134 = vmatprep.subr.msk.bf16.mxu1 %vm7932_vm6, %v7854_v17 }
0x1916   :  { %6718 = vmatmul.mubr.msk.f32.gmra.mrb[54].mxu1 %vm1025_vm10, %v8358_v63 }
0x1917   :  { %6728 = vmatprep.mubr.msk.f32.mxu1 %vm493_vm3, %v8253_v5 }
0x191a   :  { %6729 = vmatmul.mubr.msk.f32.vlgmr.msra.gmra.mrb[52].mxu1 %vm493_vm3, %v8251_v41 }
0x191b   :  { %6731 = vmatprep.mubr.msk.f32.mxu1 %vm493_vm3, %v8261_v52  ;;  %7137 = vmatpush3.bf16.msk.msra.mxu1 %vm7932_vm6, %v7854_v17 }
0x191c   :  { %7147 = vmatprep.subr.bf16.mxu1 %v7970_v35 }
0x191e   :  { %6732 = vmatmul.mubr.msk.f32.gmra.mrb[54].mxu1 %vm493_vm3, %v8259_v27 }
0x19ed   :  { %v6730_v20 = vpop.f32.mrb[52].mxu1 }
0x19ee   :  { %v4234_v36 = vadd.f32 %v7410_v4, %v6730_v20  ;;  %v4214_v21 = vpop.f32.mrb[53].mxu1 }
0x19ef   :  { %v4233_v5 = vadd.f32 %v7410_v4, %v4214_v21 }
0x19f0   :  { %v4242_v45 = vmul.f32 0.1, %v4234_v36  ;;  %vm4238_vm8 = vcmp.ge.f32.partialorder %v4234_v36, 0.0 }
0x19f1   :  { %vm4237_vm9 = vcmp.ge.f32.partialorder %v4233_v5, 0.0  ;;  %v4241_v41 = vmul.f32 0.1, %v4233_v5  ;;  %v6733_v53 = vpop.f32.mrb[54].mxu1 }
0x19f2   :  { %v4236_v52 = vadd.f32 %v7410_v4, %v6733_v53  ;;  %v4224_v61 = vpop.f32.mrb[55].mxu1  ;;  %v4246_v51 = vsel %vm4238_vm8, %v4234_v36, %v4242_v45 }
0x19f3   :  { %v4235_v8 = vadd.f32 %v7410_v4, %v4224_v61  ;;  %v4245_v55 = vsel %vm4237_vm9, %v4233_v5, %v4241_v41 }
0x19f4   :  { %v4244_v30 = vmul.f32 0.1, %v4236_v52  ;;  %6742 = vmatprep.mubr.msk.f32.mxu0 %vm493_vm3, %v4245_v55  ;;  %vm4240_vm6 = vcmp.ge.f32.partialorder %v4236_v52, 0.0 }
0x19f5   :  { %vm4239_vm12 = vcmp.ge.f32.partialorder %v4235_v8, 0.0  ;;  %v4243_v27 = vmul.f32 0.1, %v4235_v8  ;;  %6743 = vmatmul.mubr.msk.f32.vlgmr.msra.gmra.mrb[48].mxu0 %vm493_vm3, %v4246_v51 }
0x19f6   :  { %7131 = vmatpush3.bf16.xpose.msk.msra.mxu0 %vm7665_vm11, %v7854_v17  ;;  %v4248_v11 = vsel %vm4240_vm6, %v4236_v52, %v4244_v30 }
0x19f7   :  { %v4247_v59 = vsel %vm4239_vm12, %v4235_v8, %v4243_v27  ;;  %7139 = vmatprep.subr.bf16.mxu0 %v7945_v50 }
0x19f8   :  { %6745 = vmatprep.mubr.msk.f32.mxu0 %vm493_vm3, %v4247_v59 }
0x19f9   :  { %6746 = vmatmul.mubr.msk.f32.gmra.mrb[50].mxu0 %vm493_vm3, %v4248_v11 }
0x1ac8   :  { %v6744_v31 = vpop.f32.mrb[48].mxu0 }
0x1ac9   :  { %v4327_v60 = vpop.f32.mrb[49].mxu0  ;;  %v8394_v1 = vadd.f32 %v7411_v54, %v6744_v31 }
0x1aca   :  { %v8392_v22 = vadd.f32 %v7411_v54, %v4327_v60 }
0x1acc   :  { %v6747_v47 = vpop.f32.mrb[50].mxu0  ;;  %6752 = vmatprep.mubr.msk.f32.mxu0 %vm1025_vm10, %v8392_v22 }
0x1acd   :  { %v4337_v0 = vpop.f32.mrb[51].mxu0  ;;  %6753 = vmatmul.mubr.msk.f32.vlgmr.msra.gmra.mrb[52].mxu0 %vm1025_vm10, %v8394_v1  ;;  %v8403_v28 = vadd.f32 %v7411_v54, %v6747_v47 }
0x1ace   :  { %v8400_v17 = vadd.f32 %v7411_v54, %v4337_v0  ;;  %7141 = vmatpush3.bf16.msra.mxu0 %v7945_v50 }
0x1acf   :  { %7143 = vmatprep.subr.bf16.mxu0 %v7964_v62 }
0x1ad0   :  { %6755 = vmatprep.mubr.msk.f32.mxu0 %vm1025_vm10, %v8400_v17 }
0x1ad1   :  { %6756 = vmatmul.mubr.msk.f32.gmra.mrb[54].mxu0 %vm1025_vm10, %v8403_v28 }
0x1ba0   :  { %v6754_v37 = vpop.f32.mrb[52].mxu0 }
0x1ba1   :  { %v4444_v56 = vmul.f32 2.0, %v6754_v37  ;;  %v4424_v2 = vpop.f32.mrb[53].mxu0 }
0x1ba2   :  { %v4443_v7 = vmul.f32 2.0, %v4424_v2 }
0x1ba3   :  { %v8411_v20 = vsub.f32 %v7897_v49, %v4444_v56 }
0x1ba4   :  { %v8414_v4 = vsub.f32 %v7897_v49, %v4443_v7  ;;  %v6757_v50 = vpop.f32.mrb[54].mxu0 }
0x1ba5   :  { %v4446_v36 = vmul.f32 2.0, %v6757_v50  ;;  %v4434_v21 = vpop.f32.mrb[55].mxu0  ;;  %v4502_v5 = vsel %vm1931_vm4, %v8411_v20, inf }
0x1ba6   :  { %v4445_v45 = vmul.f32 2.0, %v4434_v21  ;;  %4503 = vmin.xlane.f32.xlu1 %v4502_v5  ;;  %v4499_v41 = vsel %vm1931_vm4, %v8414_v4, inf }
0x1ba7   :  { %v8421_v53 = vsub.f32 %v7897_v49, %v4446_v36  ;;  %4500 = vmin.xlane.f32.xlu0 %v4499_v41 }
0x1ba8   :  { %v8424_v52 = vsub.f32 %v7897_v49, %v4445_v45 }
0x1ba9   :  { %v4508_v61 = vsel %vm1931_vm4, %v8421_v53, inf }
0x1baa   :  { %4509 = vmin.xlane.f32.xlu1 %v4508_v61  ;;  %v4505_v8 = vsel %vm1931_vm4, %v8424_v52, inf }
0x1bab   :  { %4506 = vmin.xlane.f32.xlu0 %v4505_v8 }
0x1c33   :  { %v4504_v55 = vpop.xlane.xlu1 %4503 }
0x1c34   :  { %vm4512_vm11 = vcmp.eq.f32.partialorder %v8411_v20, %v4504_v55  ;;  %v4501_v51 = vpop.xlane.xlu0 %4500 }
0x1c35   :  { %v4516_v30 = vsel %vm4512_vm11, %v7761_v43, 10  ;;  %vm4511_vm13 = vcmp.eq.f32.partialorder %v8414_v4, %v4501_v51 }
0x1c36   :  { %v4534_v27 = vsel %vm1931_vm4, %v4516_v30, 2147483647  ;;  %v4515_v49 = vsel %vm4511_vm13, %v7761_v43, 10 }
0x1c37   :  { %v4519_v59 = vsel %vm1931_vm4, %v4515_v49, 2147483647  ;;  %v4510_v11 = vpop.xlane.xlu1 %4509  ;;  %v4536_v31 = vshra.s32 %v4534_v27, 16  ;;  %v4535_v45 = vand.u32 65535, %v4534_v27 }
0x1c38   :  { %vm4514_vm14 = vcmp.eq.f32.partialorder %v8421_v53, %v4510_v11  ;;  %v4507_v60 = vpop.xlane.xlu0 %4506  ;;  %v4521_v54 = vshra.s32 %v4519_v59, 16  ;;  %v4520_v41 = vand.u32 65535, %v4519_v59 }
0x1c39   :  { %v4518_v47 = vsel %vm4514_vm14, %v7761_v43, 10  ;;  %vm4513_vm5 = vcmp.eq.f32.partialorder %v8424_v52, %v4507_v60  ;;  %v4538_v0 = vcvt.s32.f32 %v4536_v31  ;;  %v4537_v8 = vcvt.s32.f32 %v4535_v45 }
0x1c3a   :  { %v4564_v37 = vsel %vm1931_vm4, %v4518_v47, 2147483647  ;;  %v4517_v56 = vsel %vm4513_vm5, %v7761_v43, 10  ;;  %v4523_v2 = vcvt.s32.f32 %v4521_v54  ;;  %v4522_v30 = vcvt.s32.f32 %v4520_v41 }
0x1c3b   :  { %v4549_v7 = vsel %vm1931_vm4, %v4517_v56, 2147483647  ;;  %4539 = vmin.xlane.f32.xlu1 %v4538_v0  ;;  %v4566_v50 = vshra.s32 %v4564_v37, 16  ;;  %v4565_v55 = vand.u32 65535, %v4564_v37  ;;  %v1180_v56 = vsub.f32 0.0, %v7745_v16 }
0x1c3c   :  { %4524 = vmin.xlane.f32.xlu0 %v4523_v2  ;;  %v4551_v36 = vshra.s32 %v4549_v7, 16  ;;  %v4550_v49 = vand.u32 65535, %v4549_v7  ;;  %v3774_v7 = vsub.f32 0.0, %v8299_v9  ;;  %v9054_v41 = vsub.f32 0.0, %v7752_v38 }
0x1c3d   :  { %v4568_v21 = vcvt.s32.f32 %v4566_v50  ;;  %v4567_v27 = vcvt.s32.f32 %v4565_v55  ;;  %v1185_v50 = vsel %vm1184_vm2, %v1180_v56, -inf  ;;  %v9053_v55 = vsub.f32 0.0, %v8309_v34 }
0x1c3e   :  { %v4553_v5 = vcvt.s32.f32 %v4551_v36  ;;  %v4552_v54 = vcvt.s32.f32 %v4550_v49  ;;  %v3773_v36 = vsub.f32 0.0, %v8302_v18  ;;  %v9051_v49 = vsub.f32 0.0, %v7900_v32 }
0x1c3f   :  { %4569 = vmin.xlane.f32.xlu1 %v4568_v21 }
0x1c40   :  { %4554 = vmin.xlane.f32.xlu0 %v4553_v5  ;;  %v3777_v45 = vsel %vm1184_vm2, %v3773_v36, -inf }
0x1cc8   :  { %v8442_v61 = vpop.xlane.xlu1 %4539 }
0x1cc9   :  { %v8444_v51 = vpop.xlane.xlu0 %4524  ;;  %vm4541_vm1 = vcmp.eq.f32.partialorder %v4538_v0, %v8442_v61  ;;  %v1181_v0 = vsub.f32 0.0, %v7742_v13 }
0x1cca   :  { %v4542_v11 = vsel %vm4541_vm1, %v4537_v8, inf  ;;  %vm4526_vm15 = vcmp.eq.f32.partialorder %v4523_v2, %v8444_v51 }
0x1ccb   :  { %4543 = vmin.xlane.f32.xlu1 %v4542_v11  ;;  %v4527_v31 = vsel %vm4526_vm15, %v4522_v30, inf  ;;  %v1188_v2 = vsel %vm1184_vm2, %v1181_v0, -inf  ;;  %v1191_v30 = vsel %vm1184_vm2, %v9054_v41, -inf  ;;  %v3783_v11 = vsel %vm1184_vm2, %v9053_v55, -inf }
0x1ccc   :  { %v8448_v60 = vpop.xlane.xlu1 %4569  ;;  %4528 = vmin.xlane.f32.xlu0 %v4527_v31  ;;  %v9050_v31 = vsub.f32 0.0, %v8411_v20 }
0x1ccd   :  { %v8450_v59 = vpop.xlane.xlu0 %4554  ;;  %vm4571_vm7 = vcmp.eq.f32.partialorder %v4568_v21, %v8448_v60  ;;  %v3780_v21 = vsel %vm1184_vm2, %v3774_v7, -inf }
0x1cce   :  { %v4572_v47 = vsel %vm4571_vm7, %v4567_v27, inf  ;;  %vm4556_vm8 = vcmp.eq.f32.partialorder %v4553_v5, %v8450_v59  ;;  %v9055_v5 = vsub.f32 0.0, %v7903_v42  ;;  %v1935_v27 = vsel %vm1931_vm4, %v9051_v49, -inf }
0x1ccf   :  { %4573 = vmin.xlane.f32.xlu1 %v4572_v47  ;;  %v4557_v37 = vsel %vm4556_vm8, %v4552_v54, inf  ;;  %v9049_v54 = vsub.f32 0.0, %v8414_v4  ;;  %v4458_v47 = vsel %vm1931_vm4, %v9050_v31, -inf  ;;  %v4561_v49 = vcvt.f32.s32 %v8450_v59 }
0x1cd0   :  { %4558 = vmin.xlane.f32.xlu0 %v4557_v37  ;;  %v1932_v8 = vsel %vm1931_vm4, %v9055_v5, -inf  ;;  %v9047_v37 = vsub.f32 0.0, %v7908_v23 }
0x1cd3   :  { %1189 = vmax.xlane.f32.xlu1 %v1188_v2  ;;  %v4455_v2 = vsel %vm1931_vm4, %v9049_v54, -inf }
0x1cd4   :  { %1186 = vmax.xlane.f32.xlu0 %v1185_v50  ;;  %v9046_v50 = vsub.f32 0.0, %v7755_v40 }
0x1cd7   :  { %3781 = vmax.xlane.f32.xlu1 %v3780_v21  ;;  %v1938_v21 = vsel %vm1931_vm4, %v9047_v37, -inf }
0x1cd8   :  { %3778 = vmax.xlane.f32.xlu0 %v3777_v45  ;;  %v9045_v45 = vsub.f32 0.0, %v8424_v52 }
0x1cdb   :  { %1933 = vmax.xlane.f32.xlu1 %v1932_v8  ;;  %v1194_v8 = vsel %vm1184_vm2, %v9046_v50, -inf }
0x1cdc   :  { %1192 = vmax.xlane.f32.xlu0 %v1191_v30  ;;  %v9048_v30 = vsub.f32 0.0, %v8312_v19 }
0x1cdf   :  { %3784 = vmax.xlane.f32.xlu1 %v3783_v11  ;;  %v4461_v11 = vsel %vm1931_vm4, %v9045_v45, -inf  ;;  %v4546_v45 = vcvt.f32.s32 %v8442_v61 }
0x1ce0   :  { %1936 = vmax.xlane.f32.xlu0 %v1935_v27  ;;  %v9052_v27 = vsub.f32 0.0, %v8421_v53 }
0x1ce1   :  { %v4547_v37 = vshll.u32 %v4546_v45, 16 }
0x1ce3   :  { %4459 = vmax.xlane.f32.xlu1 %v4458_v47  ;;  %v3786_v47 = vsel %vm1184_vm2, %v9048_v30, -inf  ;;  %v4576_v30 = vcvt.f32.s32 %v8448_v60 }
0x1ce4   :  { %4456 = vmax.xlane.f32.xlu0 %v4455_v2  ;;  %v9056_v2 = vsub.f32 0.0, %v7913_v10 }
0x1ce5   :  { %v4577_v5 = vshll.u32 %v4576_v30, 16 }
0x1ce7   :  { %1939 = vmax.xlane.f32.xlu1 %v1938_v21  ;;  %v4464_v21 = vsel %vm1931_vm4, %v9052_v27, -inf }
0x1ce8   :  { %1195 = vmax.xlane.f32.xlu0 %v1194_v8  ;;  %v1941_v8 = vsel %vm1931_vm4, %v9056_v2, -inf  ;;  %v4562_v2 = vshll.u32 %v4561_v49, 16 }
0x1ceb   :  { %4462 = vmax.xlane.f32.xlu1 %v4461_v11  ;;  %v4531_v11 = vcvt.f32.s32 %v8444_v51 }
0x1cec   :  { %3787 = vmax.xlane.f32.xlu0 %v3786_v47 }
0x1ced   :  { %v4532_v31 = vshll.u32 %v4531_v11, 16 }
0x1cef   :  { %4465 = vmax.xlane.f32.xlu1 %v4464_v21 }
0x1cf0   :  { %1942 = vmax.xlane.f32.xlu0 %v1941_v8 }
0x1d58   :  { %v4544_v50 = vpop.xlane.xlu1 %4543 }
0x1d59   :  { %v4545_v54 = vcvt.f32.s32 %v4544_v50  ;;  %v4529_v47 = vpop.xlane.xlu0 %4528 }
0x1d5a   :  { %v4530_v27 = vcvt.f32.s32 %v4529_v47 }
0x1d5b   :  { %v4548_v21 = vadd.s32 %v4547_v37, %v4545_v54  ;;  %v9097_v54 = vld [vmem:[#allocation23_spill] sm:$0xff] }
0x1d5c   :  { %v4533_v55 = vadd.s32 %v4532_v31, %v4530_v27  ;;  %v4574_v41 = vpop.xlane.xlu1 %4573  ;;  %v9098_v27 = vld [vmem:[#allocation24_spill] sm:$0xff] }
0x1d5d   :  { %vm4580_vm9 = vcmp.eq.s32.totalorder %v7761_v43, %v4548_v21  ;;  %v4575_v8 = vcvt.f32.s32 %v4574_v41  ;;  %v4559_v61 = vpop.xlane.xlu0 %4558 }
0x1d5e   :  { %v4560_v51 = vcvt.f32.s32 %v4559_v61  ;;  %vm4579_vm6 = vcmp.eq.s32.totalorder %v7761_v43, %v4533_v55  ;;  %v5938_v50 = vsel %vm4580_vm9, 1.0, %v9082_v33 }
0x1d5f   :  { %v4578_v45 = vadd.s32 %v4577_v5, %v4575_v8  ;;  %v5937_v60 = vsel %vm4579_vm6, 1.0, %v9082_v33 }
0x1d60   :  { %v4563_v11 = vadd.s32 %v4562_v2, %v4560_v51  ;;  %v1190_v59 = vpop.xlane.xlu1 %1189  ;;  %6762 = vmatprep.mubr.msk.f32.mxu1 %vm1931_vm4, %v5937_v60 }
0x1d61   :  { %v1198_v31 = vsub.f32 %v1181_v0, %v1190_v59  ;;  %6763 = vmatmul.mubr.msk.f32.vlgmr.msra.gmra.mrb[56].mxu1 %vm1931_vm4, %v5938_v50  ;;  %v1187_v41 = vpop.xlane.xlu0 %1186  ;;  %vm4582_vm12 = vcmp.eq.s32.totalorder %v7761_v43, %v4578_v45  ;;  %v9102_v50 = vsub.f32 0.0, %v7900_v32 }
0x1d62   :  { %v1197_v55 = vsub.f32 %v1180_v56, %v1187_v41  ;;  %vm4581_vm11 = vcmp.eq.s32.totalorder %v7761_v43, %v4563_v11  ;;  %7149 = vmatpush3.bf16.msra.mxu1 %v7970_v35  ;;  %v5940_v0 = vsel %vm4582_vm12, 1.0, %v9082_v33 }
0x1d63   :  { %v1203_v5 = vmul.f32 1.442695, %v1198_v31  ;;  %v5939_v49 = vsel %vm4581_vm11, 1.0, %v9082_v33  ;;  %7151 = vmatprep.subr.bf16.mxu1 %v9097_v54  ;;  %v9099_v33 = vsub.f32 0.0, %v7903_v42 }
0x1d64   :  { %v1201_v37 = vmul.f32 1.442695, %v1197_v55  ;;  %v3782_v13 = vpop.xlane.xlu1 %3781  ;;  %6765 = vmatprep.mubr.msk.f32.mxu1 %vm1931_vm4, %v5939_v49 }
0x1d65   :  { %7293 = vpow2.f32 %v1203_v5  ;;  %v3790_v16 = vsub.f32 %v3774_v7, %v3782_v13  ;;  %6766 = vmatmul.mubr.msk.f32.gmra.mrb[58].mxu1 %vm1931_vm4, %v5940_v0  ;;  %v3779_v56 = vpop.xlane.xlu0 %3778  ;;  %v9100_v7 = vsub.f32 0.0, %v7752_v38  ;;  %v9103_v5 = vsub.f32 0.0, %v8411_v20 }
0x1d66   :  { %7295 = vpow2.f32 %v1201_v37  ;;  %v3789_v35 = vsub.f32 %v3773_v36, %v3779_v56  ;;  %7153 = vmatpush3.bf16.msra.mxu1 %v9097_v54  ;;  %v9101_v36 = vsub.f32 0.0, %v8309_v34  ;;  %v9104_v54 = vsub.f32 0.0, %v8414_v4 }
0x1d67   :  { %v3795_v30 = vmul.f32 1.442695, %v3790_v16  ;;  %7155 = vmatprep.subr.bf16.mxu1 %v9098_v27 }
0x1d68   :  { %v3793_v2 = vmul.f32 1.442695, %v3789_v35  ;;  %v1934_v47 = vpop.xlane.xlu1 %1933 }
0x1d69   :  { %7297 = vpow2.f32 %v3795_v30  ;;  %v1944_v21 = vsub.f32 %v9099_v33, %v1934_v47  ;;  %v1193_v9 = vpop.xlane.xlu0 %1192  ;;  %v9105_v30 = vsub.f32 0.0, %v7908_v23  ;;  %v9106_v33 = vsub.f32 0.0, %v7755_v40 }
0x1d6a   :  { %7299 = vpow2.f32 %v3793_v2  ;;  %v1199_v8 = vsub.f32 %v9100_v7, %v1193_v9 }
0x1d6b   :  { %v1948_v61 = vmul.f32 1.442695, %v1944_v21 }
0x1d6c   :  { %v1205_v51 = vmul.f32 1.442695, %v1199_v8  ;;  %v3785_v18 = vpop.xlane.xlu1 %3784 }
0x1d6d   :  { %7301 = vpow2.f32 %v1948_v61  ;;  %v3791_v45 = vsub.f32 %v9101_v36, %v3785_v18  ;;  %v1937_v60 = vpop.xlane.xlu0 %1936  ;;  %v9107_v18 = vsub.f32 0.0, %v8424_v52 }
0x1d6e   :  { %7303 = vpow2.f32 %v1205_v51  ;;  %v1945_v11 = vsub.f32 %v9102_v50, %v1937_v60  ;;  %v9108_v60 = vsub.f32 0.0, %v8312_v19 }
0x1d6f   :  { %v8554_v59 = vpop.eup %7293  ;;  %v3797_v42 = vmul.f32 1.442695, %v3791_v45 }
0x1d70   :  { %v8556_v31 = vpop.eup %7295  ;;  %v1950_v41 = vmul.f32 1.442695, %v1945_v11  ;;  %v4460_v38 = vpop.xlane.xlu1 %4459  ;;  %v1212_v55 = vsel %vm1184_vm2, %v8554_v59, 0.0 }
0x1d71   :  { %7305 = vpow2.f32 %v3797_v42  ;;  %v4468_v34 = vsub.f32 %v9103_v5, %v4460_v38  ;;  %1213 = vadd.xlane.f32.xlu1 %v1212_v55  ;;  %v4457_v49 = vpop.xlane.xlu0 %4456  ;;  %v1209_v32 = vsel %vm1184_vm2, %v8556_v31, 0.0  ;;  %v9109_v5 = vsub.f32 0.0, %v8421_v53 }
0x1d72   :  { %7307 = vpow2.f32 %v1950_v41  ;;  %v4467_v37 = vsub.f32 %v9104_v54, %v4457_v49  ;;  %1210 = vadd.xlane.f32.xlu0 %v1209_v32  ;;  %v9110_v32 = vsub.f32 0.0, %v7913_v10 }
0x1d73   :  { %v8566_v13 = vpop.eup %7297  ;;  %v4473_v0 = vmul.f32 1.442695, %v4468_v34 }
0x1d74   :  { %v8568_v16 = vpop.eup %7299  ;;  %v4471_v56 = vmul.f32 1.442695, %v4467_v37  ;;  %v1940_v35 = vpop.xlane.xlu1 %1939  ;;  %v3804_v20 = vsel %vm1184_vm2, %v8566_v13, 0.0 }
0x1d75   :  { %7309 = vpow2.f32 %v4473_v0  ;;  %v1946_v2 = vsub.f32 %v9105_v30, %v1940_v35  ;;  %3805 = vadd.xlane.f32.xlu1 %v3804_v20  ;;  %v1196_v47 = vpop.xlane.xlu0 %1195  ;;  %v3801_v4 = vsel %vm1184_vm2, %v8568_v16, 0.0 }
0x1d76   :  { %7311 = vpow2.f32 %v4471_v56  ;;  %v1200_v21 = vsub.f32 %v9106_v33, %v1196_v47  ;;  %3802 = vadd.xlane.f32.xlu0 %v3801_v4 }
0x1d77   :  { %v8578_v9 = vpop.eup %7301  ;;  %v1952_v7 = vmul.f32 1.442695, %v1946_v2 }
0x1d78   :  { %v8580_v8 = vpop.eup %7303  ;;  %v1207_v61 = vmul.f32 1.442695, %v1200_v21  ;;  %v4463_v51 = vpop.xlane.xlu1 %4462  ;;  %v1956_v23 = vsel %vm1931_vm4, %v8578_v9, 0.0  ;;  %v9111_v21 = vld [vmem:[#allocation7_spill] sm:$0xff] }
0x1d79   :  { %7313 = vpow2.f32 %v1952_v7  ;;  %v4469_v36 = vsub.f32 %v9107_v18, %v4463_v51  ;;  %1957 = vadd.xlane.f32.xlu1 %v1956_v23  ;;  %v3788_v45 = vpop.xlane.xlu0 %3787  ;;  %v1215_v40 = vsel %vm1184_vm2, %v8580_v8, 0.0  ;;  %v9112_v7 = vld [vmem:[#allocation11_spill] sm:$0xff]  ;;  %v9113_v18 = vld [vmem:[#allocation6_spill] sm:$0xff] }
0x1d7a   :  { %7315 = vpow2.f32 %v1207_v61  ;;  %v3792_v50 = vsub.f32 %v9108_v60, %v3788_v45  ;;  %1216 = vadd.xlane.f32.xlu0 %v1215_v40  ;;  %v1424_v61 = vsub.f32 %v9112_v7, %v9111_v21 }
0x1d7b   :  { %v8590_v11 = vpop.eup %7305  ;;  %v4475_v42 = vmul.f32 1.442695, %v4469_v36  ;;  %v9114_v36 = vld [vmem:[#allocation12_spill] sm:$0xff] }
0x1d7c   :  { %v8592_v41 = vpop.eup %7307  ;;  %v3799_v38 = vmul.f32 1.442695, %v3792_v50  ;;  %v4466_v55 = vpop.xlane.xlu1 %4465  ;;  %v3807_v52 = vsel %vm1184_vm2, %v8590_v11, 0.0  ;;  %v1423_v45 = vsub.f32 %v9114_v36, %v9113_v18  ;;  %v9117_v50 = vld [vmem:[#allocation16_spill] sm:$0xff] }
0x1d7d   :  { %7317 = vpow2.f32 %v4475_v42  ;;  %v4470_v34 = vsub.f32 %v9109_v5, %v4466_v55  ;;  %3808 = vadd.xlane.f32.xlu1 %v3807_v52  ;;  %v1943_v49 = vpop.xlane.xlu0 %1942  ;;  %v1959_v19 = vsel %vm1931_vm4, %v8592_v41, 0.0  ;;  %v9118_v42 = vld [vmem:[#allocation19_spill] sm:$0xff]  ;;  %v1428_v52 = vmul.f32 %v1424_v61, %v1424_v61 }
0x1d7e   :  { %7319 = vpow2.f32 %v3799_v38  ;;  %v1947_v54 = vsub.f32 %v9110_v32, %v1943_v49  ;;  %1960 = vadd.xlane.f32.xlu0 %v1959_v19  ;;  %v2169_v38 = vsub.f32 %v9118_v42, %v9117_v50  ;;  %v9119_v5 = vld [vmem:[#allocation15_spill] sm:$0xff]  ;;  %v8646_v19 = vld [vmem:[%s5754_s3] ss:$0 sm:$0xff]  ;;  %v4010_v61 = vsub.f32 %v8350_v57, %v8280_v3  ;;  %v9123_v42 = vld [vmem:[#allocation8_spill] sm:$0xff] }
0x1d7f   :  { %v8602_v37 = vpop.eup %7309  ;;  %v4477_v0 = vmul.f32 1.442695, %v4470_v34  ;;  %v9120_v34 = vld [vmem:[#allocation20_spill] sm:$0xff]  ;;  %v7200_v21 = vadd.f32 %v8646_v19, %v8196_v29 }
0x1d80   :  { %v8604_v56 = vpop.eup %7311  ;;  %v1954_v35 = vmul.f32 1.442695, %v1947_v54  ;;  %v4482_v53 = vsel %vm1931_vm4, %v8602_v37, 0.0  ;;  %v2168_v49 = vsub.f32 %v9120_v34, %v9119_v5  ;;  %v1427_v54 = vmul.f32 %v1423_v45, %v1423_v45  ;;  %v9125_v5 = vld [vmem:[#allocation3_spill] sm:$0xff] }
0x1d81   :  { %7321 = vpow2.f32 %v4477_v0  ;;  %4483 = vadd.xlane.f32.xlu1 %v4482_v53  ;;  %v4479_v20 = vsel %vm1931_vm4, %v8604_v56, 0.0  ;;  %v2173_v0 = vmul.f32 %v2169_v38, %v2169_v38  ;;  %v4011_v53 = vsub.f32 %v8348_v26, %v8282_v39  ;;  %v9124_v38 = vld [vmem:[#allocation14_spill] sm:$0xff] }
0x1d82   :  { %7323 = vpow2.f32 %v1954_v35  ;;  %4480 = vadd.xlane.f32.xlu0 %v4479_v20  ;;  %v7198_v35 = vadd.f32 %v8194_v24, %v8646_v19  ;;  %v1434_v20 = vsel %vm1025_vm10, %v1428_v52, 0.0  ;;  %v1431_v7 = vsel %vm1025_vm10, %v1427_v54, 0.0  ;;  %v9122_v24 = vld [vmem:[#allocation22_spill] sm:$0xff] }
0x1d83   :  { %v8610_v30 = vpop.eup %7313  ;;  %v2179_v18 = vsel %vm1025_vm10, %v2173_v0, 0.0  ;;  %v4015_v36 = vmul.f32 %v4011_v53, %v4011_v53  ;;  %v4014_v50 = vmul.f32 %v4010_v61, %v4010_v61  ;;  %v9126_v54 = vld [vmem:[#allocation2_spill] sm:$0xff] }
0x1d84   :  { %v8612_v10 = vpop.eup %7315  ;;  %v1962_v2 = vsel %vm1931_vm4, %v8610_v30, 0.0 }
0x1d85   :  { %1963 = vadd.xlane.f32.xlu1 %v1962_v2  ;;  %v1218_v47 = vsel %vm1184_vm2, %v8612_v10, 0.0  ;;  %v2172_v2 = vmul.f32 %v2168_v49, %v2168_v49  ;;  %v4021_v52 = vsel %vm1025_vm10, %v4015_v36, 0.0  ;;  %v4018_v49 = vsel %vm1025_vm10, %v4014_v50, 0.0 }
0x1d86   :  { %1219 = vadd.xlane.f32.xlu0 %v1218_v47  ;;  %v8655_v47 = vld [vmem:[%s5756_s14] ss:$0 sm:$0xff] }
0x1d87   :  { %v8621_v4 = vpop.eup %7317  ;;  %v7199_v39 = vadd.f32 %v7198_v35, %v8655_v47  ;;  %v7201_v45 = vadd.f32 %v7200_v21, %v8655_v47  ;;  %v2176_v29 = vsel %vm1025_vm10, %v2172_v2, 0.0  ;;  %v4012_v21 = vsub.f32 %v8360_v6, %v8288_v48 }
0x1d88   :  { %v8623_v33 = vpop.eup %7319  ;;  %v4485_v51 = vsel %vm1931_vm4, %v8621_v4, 0.0 }
0x1d89   :  { %4486 = vadd.xlane.f32.xlu1 %v4485_v51  ;;  %v3810_v23 = vsel %vm1184_vm2, %v8623_v33, 0.0  ;;  %v9121_v51 = vld [vmem:[#allocation17_spill] sm:$0xff]  ;;  %v2925_v34 = vsub.f32 %v7199_v39, %v9125_v5  ;;  %v2924_v0 = vsub.f32 %v7201_v45, %v9126_v54 }
0x1d8a   :  { %3811 = vadd.xlane.f32.xlu0 %v3810_v23  ;;  %v2170_v23 = vsub.f32 %v9122_v24, %v9121_v51  ;;  %v4016_v51 = vmul.f32 %v4012_v21, %v4012_v21 }
0x1d8b   :  { %v8636_v40 = vpop.eup %7321  ;;  %v2929_v53 = vmul.f32 %v2925_v34, %v2925_v34  ;;  %v2928_v2 = vmul.f32 %v2924_v0, %v2924_v0 }
0x1d8c   :  { %9115 = vst [vmem:[#allocation23_spill] sm:$0xff] %v8636_v40  ;;  %v8638_v60 = vpop.eup %7323  ;;  %v4488_v55 = vsel %vm1931_vm4, %v8636_v40, 0.0  ;;  %v2174_v3 = vmul.f32 %v2170_v23, %v2170_v23  ;;  %v4024_v24 = vsel %vm1025_vm10, %v4016_v51, 0.0 }
0x1d8d   :  { %9116 = vst [vmem:[#allocation24_spill] sm:$0xff] %v8638_v60  ;;  %4489 = vadd.xlane.f32.xlu1 %v4488_v55  ;;  %v1965_v32 = vsel %vm1931_vm4, %v8638_v60, 0.0  ;;  %v1425_v55 = vsub.f32 %v9124_v38, %v9123_v42  ;;  %v2932_v61 = vsel %vm274_vm0, %v2928_v2, 0.0 }
0x1d8e   :  { %1966 = vadd.xlane.f32.xlu0 %v1965_v32  ;;  %v2182_v35 = vsel %vm1025_vm10, %v2174_v3, 0.0 }
0x1d8f   :  { %v1429_v32 = vmul.f32 %v1425_v55, %v1425_v55 }
0x1d91   :  { %1435 = vadd.xlane.f32.xlu1 %v1434_v20  ;;  %v1437_v20 = vsel %vm1025_vm10, %v1429_v32, 0.0 }
0x1d92   :  { %1432 = vadd.xlane.f32.xlu0 %v1431_v7  ;;  %v2935_v7 = vsel %vm274_vm0, %v2929_v53, 0.0 }
0x1d95   :  { %2180 = vadd.xlane.f32.xlu1 %v2179_v18 }
0x1d96   :  { %2177 = vadd.xlane.f32.xlu0 %v2176_v29 }
0x1d99   :  { %4022 = vadd.xlane.f32.xlu1 %v4021_v52 }
0x1d9a   :  { %4019 = vadd.xlane.f32.xlu0 %v4018_v49 }
0x1d9d   :  { %2183 = vadd.xlane.f32.xlu1 %v2182_v35 }
0x1d9e   :  { %1438 = vadd.xlane.f32.xlu0 %v1437_v20 }
0x1da1   :  { %2936 = vadd.xlane.f32.xlu1 %v2935_v7 }
0x1da2   :  { %2933 = vadd.xlane.f32.xlu0 %v2932_v61 }
0x1da6   :  { %4025 = vadd.xlane.f32.xlu0 %v4024_v24 }
0x1dfe   :  { %v1214_v23 = vpop.xlane.xlu1 %1213 }
0x1dff   :  { %7325 = vrcp.f32 %v1214_v23  ;;  %v1211_v39 = vpop.xlane.xlu0 %1210 }
0x1e00   :  { %7327 = vrcp.f32 %v1211_v39 }
0x1e02   :  { %v3806_v18 = vpop.xlane.xlu1 %3805 }
0x1e03   :  { %7329 = vrcp.f32 %v3806_v18  ;;  %v3803_v36 = vpop.xlane.xlu0 %3802 }
0x1e04   :  { %7331 = vrcp.f32 %v3803_v36 }
0x1e06   :  { %v1958_v48 = vpop.xlane.xlu1 %1957 }
0x1e07   :  { %v1217_v45 = vpop.xlane.xlu0 %1216 }
0x1e08   :  { %7333 = vrcp.f32 %v1217_v45 }
0x1e09   :  { %v7326_v29 = vpop.eup %7325 }
0x1e0a   :  { %v7328_v50 = vpop.eup %7327  ;;  %v8682_v42 = vmul.f32 %v7326_v29, %v8554_v59  ;;  %v3809_v38 = vpop.xlane.xlu1 %3808 }
0x1e0b   :  { %7335 = vrcp.f32 %v3809_v38  ;;  %v1961_v55 = vpop.xlane.xlu0 %1960  ;;  %v8685_v3 = vmul.f32 %v7328_v50, %v8556_v31 }
0x1e0c   :  { %7337 = vrcp.f32 %v1961_v55  ;;  %v5465_v5 = vmax.f32 %v8682_v42, 1e-12  ;;  %vm5477_vm13 = vcmp.gt.f32.partialorder %v8682_v42, 0.0 }
0x1e0d   :  { %v7330_v52 = vpop.eup %7329  ;;  %7339 = vrcp.f32 %v1958_v48  ;;  %v5464_v54 = vmax.f32 %v8685_v3, 1e-12  ;;  %vm5476_vm5 = vcmp.gt.f32.partialorder %v8685_v3, 0.0 }
0x1e0e   :  { %v7332_v34 = vpop.eup %7331  ;;  %v8689_v49 = vmul.f32 %v7330_v52, %v8566_v13  ;;  %v4484_v32 = vpop.xlane.xlu1 %4483 }
0x1e0f   :  { %v8693_v59 = vmul.f32 %v7332_v34, %v8568_v16  ;;  %7341 = vrcp.f32 %v4484_v32  ;;  %v4481_v0 = vpop.xlane.xlu0 %4480 }
0x1e10   :  { %7343 = vrcp.f32 %v4481_v0  ;;  %v5445_v31 = vadd.f32 %v8689_v49, %v8682_v42  ;;  %v5514_v35 = vmax.f32 %v8689_v49, 1e-12  ;;  %vm5526_vm14 = vcmp.gt.f32.partialorder %v8689_v49, 0.0 }
0x1e11   :  { %7345 = vlog2.f32 %v5465_v5  ;;  %v5444_v13 = vadd.f32 %v8693_v59, %v8685_v3  ;;  %v5513_v53 = vmax.f32 %v8693_v59, 1e-12  ;;  %vm5525_vm1 = vcmp.gt.f32.partialorder %v8693_v59, 0.0 }
0x1e12   :  { %v8701_v20 = vpop.xlane.xlu1 %1963  ;;  %v5449_v2 = vmul.f32 0.5, %v5445_v31  ;;  %7347 = vlog2.f32 %v5464_v54  ;;  %v7334_v16 = vpop.eup %7333 }
0x1e13   :  { %v1220_v21 = vpop.xlane.xlu0 %1219  ;;  %v5448_v7 = vmul.f32 0.5, %v5444_v13  ;;  %7349 = vlog2.f32 %v5514_v35  ;;  %v8704_v23 = vmul.f32 %v7334_v16, %v8580_v8 }
0x1e14   :  { %7351 = vrcp.f32 %v1220_v21  ;;  %v5453_v61 = vmax.f32 %v5449_v2, 1e-12 }
0x1e15   :  { %v7336_v51 = vpop.eup %7335  ;;  %v5452_v24 = vmax.f32 %v5448_v7, 1e-12  ;;  %7353 = vlog2.f32 %v5513_v53  ;;  %v9127_v7 = vld [vmem:[#allocation18_spill] sm:$0xff]  ;;  %vm5478_vm7 = vcmp.gt.f32.partialorder %v8704_v23, 0.0 }
0x1e16   :  { %v8707_v39 = vmul.f32 %v7336_v51, %v8590_v11  ;;  %v8709_v18 = vpop.xlane.xlu1 %4486  ;;  %7355 = vlog2.f32 %v5453_v61  ;;  %v7338_v36 = vpop.eup %7337  ;;  %v9128_v61 = vld [vmem:[#allocation21_spill] sm:$0xff] }
0x1e17   :  { %v3812_v48 = vpop.xlane.xlu0 %3811  ;;  %v7340_v45 = vpop.eup %7339  ;;  %v8715_v8 = vmul.f32 %v7338_v36, %v8592_v41  ;;  %v5466_v41 = vmax.f32 %v8704_v23, 1e-12  ;;  %v9130_v36 = vld [vmem:[#allocation13_spill] sm:$0xff] }
0x1e18   :  { %7357 = vrcp.f32 %v3812_v48  ;;  %v5446_v29 = vadd.f32 %v8707_v39, %v8704_v23  ;;  %v5515_v38 = vmax.f32 %v8707_v39, 1e-12  ;;  %v8731_v53 = vmul.f32 %v7340_v45, %v8578_v9 }
0x1e19   :  { %v7342_v50 = vpop.eup %7341  ;;  %7359 = vlog2.f32 %v5452_v24  ;;  %v9129_v24 = vld [vmem:[#allocation9_spill] sm:$0xff]  ;;  %vm5527_vm15 = vcmp.gt.f32.partialorder %v8707_v39, 0.0  ;;  %vm5597_vm9 = vcmp.gt.f32.partialorder %v8715_v8, 0.0 }
0x1e1a   :  { %v7344_v55 = vpop.eup %7343  ;;  %v8718_v11 = vmul.f32 %v7342_v50, %v8602_v37  ;;  %v8720_v52 = vpop.xlane.xlu1 %4489  ;;  %v5450_v5 = vmul.f32 0.5, %v5446_v29  ;;  %7361 = vlog2.f32 %v5515_v38  ;;  %v8738_v48 = vsub.f32 %v9130_v36, %v9129_v24 }
0x1e1b   :  { %v7346_v34 = vpop.eup %7345  ;;  %v8722_v32 = vpop.xlane.xlu0 %1966  ;;  %v8725_v0 = vmul.f32 %v7344_v55, %v8604_v56  ;;  %v2171_v56 = vsub.f32 %v9128_v61, %v9127_v7  ;;  %vm5596_vm11 = vcmp.gt.f32.partialorder %v8731_v53, 0.0 }
0x1e1c   :  { %v7348_v54 = vpop.eup %7347  ;;  %v5454_v31 = vmax.f32 %v5450_v5, 1e-12  ;;  %v5565_v35 = vadd.f32 %v8718_v11, %v8715_v8  ;;  %v5471_v45 = vmul.f32 0.6931472, %v7346_v34  ;;  %v5634_v7 = vmax.f32 %v8718_v11, 1e-12 }
0x1e1d   :  { %v7350_v13 = vpop.eup %7349  ;;  %v5564_v38 = vadd.f32 %v8725_v0, %v8731_v53  ;;  %vm5646_vm12 = vcmp.gt.f32.partialorder %v8718_v11, 0.0 }
0x1e1e   :  { %v7352_v37 = vpop.eup %7351  ;;  %v1436_v2 = vpop.xlane.xlu1 %1435  ;;  %7363 = vlog2.f32 %v5454_v31  ;;  %v5569_v16 = vmul.f32 0.5, %v5565_v35  ;;  %v5520_v5 = vmul.f32 0.6931472, %v7350_v13  ;;  %v5585_v31 = vmax.f32 %v8715_v8, 1e-12 }
0x1e1f   :  { %v7354_v21 = vpop.eup %7353  ;;  %v1433_v51 = vpop.xlane.xlu0 %1432  ;;  %v8741_v50 = vmul.f32 %v7352_v37, %v8612_v10  ;;  %7365 = vlog2.f32 %v5466_v41  ;;  %v8752_v10 = vadd.f32 %v8655_v47, %v8646_v19  ;;  %v5568_v19 = vmul.f32 0.5, %v5564_v38 }
0x1e20   :  { %v7356_v29 = vpop.eup %7355  ;;  %v8743_v9 = vadd.f32 %v1436_v2, %v1433_v51  ;;  %v5469_v2 = vmul.f32 0.6931472, %v7348_v54  ;;  %v5573_v34 = vmax.f32 %v5569_v16, 1e-12  ;;  %v5518_v41 = vmul.f32 0.6931472, %v7354_v21 }
0x1e21   :  { %v5459_v55 = vmul.f32 0.6931472, %v7356_v29  ;;  %v5467_v40 = vmax.f32 %v8741_v50, 1e-12  ;;  %7367 = vlog2.f32 %v5585_v31  ;;  %v5584_v38 = vmax.f32 %v8731_v53, 1e-12 }
0x1e22   :  { %v7358_v35 = vpop.eup %7357  ;;  %v2181_v37 = vpop.xlane.xlu1 %2180  ;;  %7369 = vlog2.f32 %v5573_v34  ;;  %v5572_v31 = vmax.f32 %v5568_v19, 1e-12  ;;  %vm5479_vm6 = vcmp.gt.f32.partialorder %v8741_v50, 0.0 }
0x1e23   :  { %v7360_v61 = vpop.eup %7359  ;;  %v8756_v51 = vmul.f32 %v7358_v35, %v8623_v33  ;;  %v2178_v24 = vpop.xlane.xlu0 %2177  ;;  %v5481_v36 = vsub.f32 %v5471_v45, %v5459_v55  ;;  %v5530_v13 = vsub.f32 %v5520_v5, %v5459_v55  ;;  %7371 = vlog2.f32 %v5634_v7 }
0x1e24   :  { %v8758_v29 = vadd.f32 %v2181_v37, %v2178_v24  ;;  %v5457_v60 = vmul.f32 0.6931472, %v7360_v61  ;;  %v7362_v21 = vpop.eup %7361  ;;  %7373 = vlog2.f32 %v5467_v40  ;;  %v7205_v7 = vadd.f32 %v8752_v10, %v8201_v15 }
0x1e25   :  { %v5485_v47 = vmul.f32 %v5481_v36, %v8682_v42  ;;  %v5534_v54 = vmul.f32 %v5530_v13, %v8689_v49  ;;  %v5447_v16 = vadd.f32 %v8756_v51, %v8741_v50  ;;  %v5516_v45 = vmax.f32 %v8756_v51, 1e-12 }
0x1e26   :  { %v5480_v33 = vsub.f32 %v5469_v2, %v5457_v60  ;;  %v5529_v35 = vsub.f32 %v5518_v41, %v5457_v60  ;;  %v2175_v36 = vmul.f32 %v2171_v56, %v2171_v56  ;;  %v5522_v19 = vmul.f32 0.6931472, %v7362_v21 }
0x1e27   :  { %v5489_v55 = vsel %vm5477_vm13, %v5485_v47, 0.0  ;;  %v5451_v5 = vmul.f32 0.5, %v5447_v16  ;;  %v5538_v60 = vsel %vm5526_vm14, %v5534_v54, 0.0  ;;  %7375 = vlog2.f32 %v5516_v45  ;;  %v9131_v54 = vld [vmem:[#allocation5_spill] sm:$0xff] }
0x1e28   :  { %v7364_v37 = vpop.eup %7363  ;;  %v5495_v61 = vsel %vm1184_vm2, %v5489_v55, 0.0  ;;  %v5484_v24 = vmul.f32 %v5480_v33, %v8685_v3  ;;  %v5533_v2 = vmul.f32 %v5529_v35, %v8693_v59  ;;  %7377 = vlog2.f32 %v5584_v38 }
0x1e29   :  { %5496 = vadd.xlane.f32.xlu1 %v5495_v61  ;;  %v5461_v34 = vmul.f32 0.6931472, %v7364_v37  ;;  %v5455_v42 = vmax.f32 %v5451_v5, 1e-12  ;;  %v7366_v41 = vpop.eup %7365  ;;  %v4013_v49 = vsub.f32 %v8358_v63, %v8291_v25  ;;  %v5544_v56 = vsel %vm1184_vm2, %v5538_v60, 0.0 }
0x1e2a   :  { %v5488_v13 = vsel %vm5476_vm5, %v5484_v24, 0.0  ;;  %v5537_v47 = vsel %vm5525_vm1, %v5533_v2, 0.0  ;;  %v5633_v3 = vmax.f32 %v8725_v0, 1e-12  ;;  %v2926_v16 = vsub.f32 %v7205_v7, %v9131_v54 }
0x1e2b   :  { %v5492_v40 = vsel %vm1184_vm2, %v5488_v13, 0.0  ;;  %7379 = vlog2.f32 %v5455_v42  ;;  %v5531_v15 = vsub.f32 %v5522_v19, %v5461_v34  ;;  %v5473_v33 = vmul.f32 0.6931472, %v7366_v41  ;;  %v7368_v35 = vpop.eup %7367  ;;  %v9132_v19 = vld [vmem:[#allocation4_spill] sm:$0xff] }
0x1e2c   :  { %5493 = vadd.xlane.f32.xlu0 %v5492_v40  ;;  %7381 = vlog2.f32 %v5572_v31  ;;  %v5541_v59 = vsel %vm1184_vm2, %v5537_v47, 0.0  ;;  %v1430_v45 = vmul.f32 %v8738_v48, %v8738_v48  ;;  %v7370_v25 = vpop.eup %7369  ;;  %v2185_v21 = vsel %vm1025_vm10, %v2175_v36, 0.0 }
0x1e2d   :  { %5545 = vadd.xlane.f32.xlu1 %v5544_v56  ;;  %v4017_v55 = vmul.f32 %v4013_v49, %v4013_v49  ;;  %v5482_v5 = vsub.f32 %v5473_v33, %v5461_v34  ;;  %v7372_v38 = vpop.eup %7371  ;;  %v5535_v37 = vmul.f32 %v5531_v15, %v8707_v39  ;;  %7383 = vlog2.f32 %v5633_v3 }
0x1e2e   :  { %v7374_v61 = vpop.eup %7373  ;;  %v7203_v24 = vadd.f32 %v8752_v10, %v8199_v14  ;;  %v2930_v31 = vmul.f32 %v2926_v16, %v2926_v16  ;;  %v1440_v60 = vsel %vm1025_vm10, %v1430_v45, 0.0  ;;  %v5579_v2 = vmul.f32 0.6931472, %v7370_v25 }
0x1e2f   :  { %v4027_v36 = vsel %vm1025_vm10, %v4017_v55, 0.0  ;;  %v5486_v34 = vmul.f32 %v5482_v5, %v8704_v23  ;;  %v5539_v41 = vsel %vm5527_vm15, %v5535_v37, 0.0  ;;  %v5591_v40 = vmul.f32 0.6931472, %v7368_v35  ;;  %v9133_v55 = vld [vmem:[#allocation26_spill] sm:$0xff] }
0x1e30   :  { %5542 = vadd.xlane.f32.xlu0 %v5541_v59  ;;  %v2927_v49 = vsub.f32 %v7203_v24, %v9132_v19  ;;  %v2938_v56 = vsel %vm274_vm0, %v2930_v31, 0.0  ;;  %v5475_v54 = vmul.f32 0.6931472, %v7374_v61  ;;  %v5547_v33 = vsel %vm1184_vm2, %v5539_v41, 0.0 }
0x1e31   :  { %2186 = vadd.xlane.f32.xlu1 %v2185_v21  ;;  %v7376_v48 = vpop.eup %7375  ;;  %v5601_v3 = vsub.f32 %v5591_v40, %v5579_v2  ;;  %v5490_v35 = vsel %vm5478_vm7, %v5486_v34, 0.0  ;;  %v5640_v21 = vmul.f32 0.6931472, %v7372_v38  ;;  %vm5528_vm8 = vcmp.gt.f32.partialorder %v8756_v51, 0.0 }
0x1e32   :  { %v7378_v7 = vpop.eup %7377  ;;  %v5524_v15 = vmul.f32 0.6931472, %v7376_v48  ;;  %v2931_v5 = vmul.f32 %v2927_v49, %v2927_v49  ;;  %vm5687_vm13 = vcmp.eq.s32.totalorder %v7761_v43, 0  ;;  %vm5691_vm5 = vcmp.eq.s32.totalorder %v7761_v43, 1 }
0x1e33   :  { %v5589_v37 = vmul.f32 0.6931472, %v7378_v7  ;;  %v5605_v31 = vmul.f32 %v5601_v3, %v8715_v8  ;;  %7385 = vrcp.f32 %v8709_v18 }
0x1e34   :  { %1441 = vadd.xlane.f32.xlu0 %v1440_v60  ;;  %v6764_v42 = vpop.f32.mrb[56].mxu1  ;;  %v5650_v60 = vsub.f32 %v5640_v21, %v5579_v2  ;;  %v2941_v41 = vsel %vm274_vm0, %v2931_v5, 0.0  ;;  %7387 = vrcp.f32 %v8701_v20 }
0x1e35   :  { %v8796_v13 = vpop.f32.mrb[57].mxu1  ;;  %4028 = vadd.xlane.f32.xlu1 %v4027_v36  ;;  %v7380_v14 = vpop.eup %7379  ;;  %v5609_v2 = vsel %vm5597_vm9, %v5605_v31, 0.0  ;;  %7389 = vrcp.f32 %v8720_v52 }
0x1e36   :  { %6772 = vmatprep.mubr.msk.f32.mxu0 %vm1025_vm10, %v8796_v13  ;;  %v7382_v47 = vpop.eup %7381  ;;  %v5463_v39 = vmul.f32 0.6931472, %v7380_v14  ;;  %v4689_v14 = vsub.f32 %v6764_v42, %v8394_v1  ;;  %v5615_v19 = vsel %vm1931_vm4, %v5609_v2, 0.0  ;;  %7391 = vrcp.f32 %v8722_v32 }
0x1e37   :  { %6773 = vmatmul.mubr.msk.f32.vlgmr.msra.gmra.mrb[56].mxu0 %vm1025_vm10, %v6764_v42  ;;  %v5577_v59 = vmul.f32 0.6931472, %v7382_v47  ;;  %v7384_v61 = vpop.eup %7383 }
0x1e38   :  { %2939 = vadd.xlane.f32.xlu0 %v2938_v56  ;;  %7145 = vmatpush3.bf16.msra.mxu0 %v7964_v62  ;;  %v8805_v16 = vpop.f32.mrb[58].mxu1  ;;  %v5532_v25 = vsub.f32 %v5524_v15, %v5463_v39  ;;  %v5483_v23 = vsub.f32 %v5475_v54, %v5463_v39  ;;  %v5498_v62 = vsel %vm1184_vm2, %v5490_v35, 0.0  ;;  %v5638_v7 = vmul.f32 0.6931472, %v7384_v61  ;;  %v4020_v54 = vpop.xlane.xlu0 %4019 }
0x1e39   :  { %v4679_v45 = vpop.f32.mrb[59].mxu1  ;;  %5548 = vadd.xlane.f32.xlu1 %v5547_v33  ;;  %7163 = vmatprep.subr.bf16.mxu0 %v9133_v55  ;;  %v5600_v48 = vsub.f32 %v5589_v37, %v5577_v59  ;;  %v4693_v1 = vmul.f32 %v4689_v14, %v4689_v14  ;;  %v4688_v56 = vsub.f32 %v8796_v13, %v8392_v22  ;;  %v4023_v33 = vpop.xlane.xlu1 %4022 }
0x1e3a   :  { %6775 = vmatprep.mubr.msk.f32.mxu0 %vm1025_vm10, %v4679_v45  ;;  %v5536_v24 = vmul.f32 %v5532_v25, %v8756_v51  ;;  %v5487_v38 = vmul.f32 %v5483_v23, %v8741_v50  ;;  %v5649_v8 = vsub.f32 %v5638_v7, %v5577_v59  ;;  %v4030_v37 = vadd.f32 %v4023_v33, %v4020_v54 }
0x1e3b   :  { %6776 = vmatmul.mubr.msk.f32.gmra.mrb[58].mxu0 %vm1025_vm10, %v8805_v16  ;;  %v5604_v40 = vmul.f32 %v5600_v48, %v8731_v53  ;;  %v4699_v39 = vsel %vm1025_vm10, %v4693_v1, 0.0  ;;  %v4692_v15 = vmul.f32 %v4688_v56, %v4688_v56 }
0x1e3c   :  { %5499 = vadd.xlane.f32.xlu0 %v5498_v62  ;;  %6782 = vmatprep.mubr.msk.f32.mxu0 %vm1025_vm10, %v8350_v57  ;;  %v5540_v36 = vsel %vm5528_vm8, %v5536_v24, 0.0  ;;  %v5654_v57 = vmul.f32 %v5650_v60, %v8718_v11  ;;  %v5491_v51 = vsel %vm5479_vm6, %v5487_v38, 0.0  ;;  %v5653_v49 = vmul.f32 %v5649_v8, %v8725_v0  ;;  %v1439_v35 = vpop.xlane.xlu0 %1438 }
0x1e3d   :  { %v5550_v34 = vsel %vm1184_vm2, %v5540_v36, 0.0  ;;  %v5608_v50 = vsel %vm5596_vm11, %v5604_v40, 0.0  ;;  %v4690_v11 = vsub.f32 %v4679_v45, %v8400_v17  ;;  %v4696_v3 = vsel %vm1025_vm10, %v4692_v15, 0.0  ;;  %v2184_v59 = vpop.xlane.xlu1 %2183 }
0x1e3e   :  { %5551 = vadd.xlane.f32.xlu1 %v5550_v34  ;;  %v1444_v61 = vadd.f32 %v8743_v9, %v1439_v35 }
0x1e3f   :  { %6783 = vmatmul.mubr.msk.f32.vlgmr.msra.gmra.mrb[56].mxu0 %vm1025_vm10, %v8348_v26  ;;  %v5501_v26 = vsel %vm1184_vm2, %v5491_v51, 0.0  ;;  %vm5645_vm2 = vcmp.gt.f32.partialorder %v8725_v0, 0.0  ;;  %v4694_v47 = vmul.f32 %v4690_v11, %v4690_v11 }
0x1e40   :  { %2942 = vadd.xlane.f32.xlu0 %v2941_v41  ;;  %6785 = vmatprep.mubr.msk.f32.mxu0 %vm1025_vm10, %v8360_v6  ;;  %v5658_v6 = vsel %vm5646_vm12, %v5654_v57, 0.0  ;;  %v5657_v53 = vsel %vm5645_vm2, %v5653_v49, 0.0  ;;  %v8853_v45 = vpop.xlane.xlu0 %2933 }
0x1e41   :  { %7165 = vmatpush3.bf16.msra.mxu0 %v9133_v55  ;;  %v5664_v42 = vsel %vm1931_vm4, %v5658_v6, 0.0  ;;  %v5661_v17 = vsel %vm1931_vm4, %v5657_v53, 0.0  ;;  %v4702_v22 = vsel %vm1025_vm10, %v4694_v47, 0.0  ;;  %v2189_v47 = vadd.f32 %v8758_v29, %v2184_v59 }
0x1e42   :  { %7167 = vmatprep.subr.bf16.mxu0 %v8066_v12  ;;  %5616 = vadd.xlane.f32.xlu1 %v5615_v19 }
0x1e43   :  { %6786 = vmatmul.mubr.msk.f32.gmra.mrb[58].mxu0 %vm1025_vm10, %v8358_v63  ;;  %v5612_v63 = vsel %vm1931_vm4, %v5608_v50, 0.0 }
0x1e44   :  { %5502 = vadd.xlane.f32.xlu0 %v5501_v26  ;;  %v9134_v26 = vld [vmem:[#allocation10_spill] sm:$0xff] }
0x1e45   :  { %7169 = vmatpush3.bf16.msra.mxu0 %v8066_v12  ;;  %v4691_v12 = vsub.f32 %v8805_v16, %v8403_v28  ;;  %v8855_v28 = vpop.xlane.xlu1 %2936  ;;  %v4026_v16 = vpop.xlane.xlu0 %4025 }
0x1e46   :  { %5665 = vadd.xlane.f32.xlu1 %v5664_v42  ;;  %v4031_v62 = vadd.f32 %v4030_v37, %v4026_v16 }
0x1e47   :  { %v4695_v13 = vmul.f32 %v4691_v12, %v4691_v12 }
0x1e48   :  { %5613 = vadd.xlane.f32.xlu0 %v5612_v63 }
0x1e49   :  { %v4705_v0 = vsel %vm1025_vm10, %v4695_v13, 0.0  ;;  %vm5686_vm10 = vcmp.eq.s32.totalorder %v9134_v26, 0 }
0x1e4a   :  { %4700 = vadd.xlane.f32.xlu1 %v4699_v39  ;;  %vm8880_vm14 = vmand %vm5686_vm10, %vm5687_vm13 }
0x1e4b   :  { %vm5692_vm1 = vmand %vm5686_vm10, %vm5691_vm5 }
0x1e4c   :  { %5662 = vadd.xlane.f32.xlu0 %v5661_v17 }
0x1e4e   :  { %4703 = vadd.xlane.f32.xlu1 %v4702_v22 }
0x1e50   :  { %4697 = vadd.xlane.f32.xlu0 %v4696_v3 }
0x1e54   :  { %4706 = vadd.xlane.f32.xlu0 %v4705_v0 }
0x1eb6   :  { %v8857_v25 = vpop.xlane.xlu1 %5496 }
0x1eb9   :  { %v8859_v23 = vpop.xlane.xlu0 %5493 }
0x1eba   :  { %v8861_v21 = vpop.xlane.xlu1 %5545 }
0x1ebd   :  { %v8863_v55 = vpop.xlane.xlu0 %5542 }
0x1ebe   :  { %v2187_v5 = vpop.xlane.xlu1 %2186 }
0x1ebf   :  { %v2190_v12 = vadd.f32 %v2189_v47, %v2187_v5  ;;  %v7413_v47 = vld [vmem:[%s8057_s15] ss:$0 sm:$0xff] }
0x1ec1   :  { %v1442_v24 = vpop.xlane.xlu0 %1441  ;;  %v2191_v13 = vrot.slane %v2190_v12, 4 }
0x1ec2   :  { %v1445_v31 = vadd.f32 %v1444_v61, %v1442_v24  ;;  %v4029_v60 = vpop.xlane.xlu1 %4028 }
0x1ec3   :  { %v4032_v38 = vadd.f32 %v4031_v62, %v4029_v60  ;;  %v2192_v0 = vadd.f32 %v2191_v13, %v2190_v12 }
0x1ec4   :  { %v1446_v48 = vrot.slane %v1445_v31, 4 }
0x1ec5   :  { %v4033_v36 = vrot.slane %v4032_v38, 4  ;;  %v8866_v34 = vpop.xlane.xlu0 %2939  ;;  %v2193_v37 = vrot.slane %v2192_v0, 2 }
0x1ec6   :  { %v1447_v7 = vadd.f32 %v1446_v48, %v1445_v31  ;;  %v8868_v41 = vpop.xlane.xlu1 %5548 }
0x1ec7   :  { %v4034_v2 = vadd.f32 %v4033_v36, %v4032_v38  ;;  %v2194_v29 = vadd.f32 %v2193_v37, %v2192_v0 }
0x1ec8   :  { %v1448_v57 = vrot.slane %v1447_v7, 2 }
0x1ec9   :  { %v4035_v51 = vrot.slane %v4034_v2, 2  ;;  %v8870_v40 = vpop.xlane.xlu0 %5499  ;;  %v2195_v31 = vrot.slane %v2194_v29, 1 }
0x1eca   :  { %v1449_v8 = vadd.f32 %v1448_v57, %v1447_v7 }
0x1ecb   :  { %v4036_v14 = vadd.f32 %v4035_v51, %v4034_v2  ;;  %v8872_v19 = vpop.xlane.xlu1 %5551  ;;  %v2196_v38 = vadd.f32 %v2195_v31, %v2194_v29 }
0x1ecc   :  { %v1450_v9 = vrot.slane %v1449_v8, 1 }
0x1ecd   :  { %v4037_v6 = vrot.slane %v4036_v14, 1  ;;  %v8876_v50 = vpop.xlane.xlu0 %2942 }
0x1ece   :  { %v1451_v49 = vadd.f32 %v1450_v9, %v1449_v8  ;;  %v7412_v8 = vld [vmem:[%s8012_s28] ss:$0 sm:$0xff]  ;;  %s7454_s28 = smov 37  }
0x1ecf   :  { %v4038_v1 = vadd.f32 %v4037_v6, %v4036_v14  ;;  %v8884_v42 = vpop.xlane.xlu1 %5616  ;;  %s5758_s17 = sld [smem:[%s9004_s0 + %s7454_s28]]  }
0x1ed1   :  { %v5441_v56 = vadd.f32 %v4038_v1, %v1451_v49  ;;  %v8886_v63 = vpop.xlane.xlu0 %5502 }
0x1ed3   :  { %v5689_v53 = vsel %vm8880_vm14, %v5441_v56, 0.0  ;;  %v8891_v39 = vpop.xlane.xlu1 %5665  ;;  %v9137_v56 = vld [vmem:[#allocation25_spill] sm:$0xff] }
0x1ed5   :  { %v8893_v15 = vpop.xlane.xlu0 %5613 }
0x1ed7   :  { %v4701_v17 = vpop.xlane.xlu1 %4700 }
0x1ed9   :  { %v8895_v22 = vpop.xlane.xlu0 %5662 }
0x1edb   :  { %v4704_v33 = vpop.xlane.xlu1 %4703 }
0x1edd   :  { %v4698_v3 = vpop.xlane.xlu0 %4697 }
0x1ede   :  { %v4708_v54 = vadd.f32 %v4701_v17, %v4698_v3 }
0x1ee0   :  { %v4709_v35 = vadd.f32 %v4708_v54, %v4704_v33 }
0x1ee1   :  { %v4707_v16 = vpop.xlane.xlu0 %4706 }
0x1ee2   :  { %v4710_v61 = vadd.f32 %v4709_v35, %v4707_v16 }
0x1ee4   :  { %v4711_v62 = vrot.slane %v4710_v61, 4 }
0x1ee6   :  { %v4712_v59 = vadd.f32 %v4711_v62, %v4710_v61 }
0x1ee8   :  { %v4713_v24 = vrot.slane %v4712_v59, 2 }
0x1eea   :  { %v4714_v60 = vadd.f32 %v4713_v24, %v4712_v59  ;;  %v9138_v24 = vld [vmem:[#allocation27_spill] sm:$0xff] }
0x1eec   :  { %v4715_v5 = vrot.slane %v4714_v60, 1 }
0x1eee   :  { %v4716_v48 = vadd.f32 %v4715_v5, %v4714_v60  ;;  %v7414_v60 = vld [vmem:[%s8085_s25] ss:$0 sm:$0xff] }
0x1ef0   :  { %v5442_v36 = vadd.f32 %v4716_v48, %v2196_v38 }
0x1ef2   :  { %v5693_v7 = vsel %vm5692_vm1, %v5442_v36, 0.0 }
0x1ef3   :  { %v8900_v2 = vadd.f32 %v5693_v7, %v5689_v53 }
0x1f12   :  { %v6784_v57 = vpop.f32.mrb[56].mxu0 }
0x1f13   :  { %v4880_v51 = vpop.f32.mrb[57].mxu0  ;;  %v4900_v9 = vadd.f32 %v7412_v8, %v6784_v57 }
0x1f14   :  { %v4899_v14 = vadd.f32 %v7412_v8, %v4880_v51 }
0x1f16   :  { %v6787_v6 = vpop.f32.mrb[58].mxu0  ;;  %6796 = vmatprep.mubr.msk.f32.mxu1 %vm493_vm3, %v4899_v14 }
0x1f17   :  { %v4890_v49 = vpop.f32.mrb[59].mxu0  ;;  %6797 = vmatmul.mubr.msk.f32.vlgmr.msra.gmra.mrb[60].mxu1 %vm493_vm3, %v4900_v9  ;;  %v4902_v11 = vadd.f32 %v7412_v8, %v6787_v6 }
0x1f18   :  { %v4901_v1 = vadd.f32 %v7412_v8, %v4890_v49  ;;  %7157 = vmatpush3.bf16.msra.mxu1 %v9098_v27  ;;  %v7415_v49 = vld [vmem:[%s8148_s13] ss:$0 sm:$0xff] }
0x1f19   :  { %7159 = vmatprep.subr.bf16.mxu1 %v9137_v56 }
0x1f1a   :  { %6799 = vmatprep.mubr.msk.f32.mxu1 %vm493_vm3, %v4901_v1 }
0x1f1b   :  { %6800 = vmatmul.mubr.msk.f32.gmra.mrb[62].mxu1 %vm493_vm3, %v4902_v11 }
0x1f1c   :  { %7161 = vmatpush3.bf16.msra.mxu1 %v9137_v56 }
0x1f1d   :  { %7171 = vmatprep.subr.bf16.mxu1 %v8078_v46 }
0x1fea   :  { %v6798_v53 = vpop.f32.mrb[60].mxu1 }
0x1feb   :  { %v4987_v12 = vadd.f32 %v7413_v47, %v6798_v53  ;;  %v4981_v17 = vpop.f32.mrb[61].mxu1 }
0x1fec   :  { %v4982_v13 = vadd.f32 %v7413_v47, %v4981_v17 }
0x1fed   :  { %v5005_v3 = vmul.f32 0.1, %v4987_v12  ;;  %vm5001_vm15 = vcmp.ge.f32.partialorder %v4987_v12, 0.0 }
0x1fee   :  { %vm5000_vm7 = vcmp.ge.f32.partialorder %v4982_v13, 0.0  ;;  %v5004_v27 = vmul.f32 0.1, %v4982_v13  ;;  %v6801_v0 = vpop.f32.mrb[62].mxu1 }
0x1fef   :  { %v4997_v54 = vadd.f32 %v7413_v47, %v6801_v0  ;;  %v4991_v33 = vpop.f32.mrb[63].mxu1  ;;  %v5009_v37 = vsel %vm5001_vm15, %v4987_v12, %v5005_v3  ;;  %vm5703_vm15 = vcmp.eq.s32.totalorder %v7761_v43, 4 }
0x1ff0   :  { %v4992_v35 = vadd.f32 %v7413_v47, %v4991_v33  ;;  %v5008_v16 = vsel %vm5000_vm7, %v4982_v13, %v5004_v27  ;;  %v9139_v33 = vld [vmem:[#allocation28_spill] sm:$0xff] }
0x1ff1   :  { %v5007_v61 = vmul.f32 0.1, %v4997_v54  ;;  %6810 = vmatprep.mubr.msk.f32.mxu1 %vm493_vm3, %v5008_v16  ;;  %vm5003_vm8 = vcmp.ge.f32.partialorder %v4997_v54, 0.0  ;;  %v7386_v16 = vpop.eup %7385 }
0x1ff2   :  { %vm5002_vm9 = vcmp.ge.f32.partialorder %v4992_v35, 0.0  ;;  %v5006_v62 = vmul.f32 0.1, %v4992_v35  ;;  %6811 = vmatmul.mubr.msk.f32.vlgmr.msra.gmra.mrb[64].mxu1 %vm493_vm3, %v5009_v37  ;;  %v7388_v37 = vpop.eup %7387 }
0x1ff3   :  { %7173 = vmatpush3.bf16.msra.mxu1 %v8078_v46  ;;  %v5011_v59 = vsel %vm5003_vm8, %v4997_v54, %v5007_v61  ;;  %v4496_v61 = vmul.f32 %v7386_v16, %v8621_v4  ;;  %vm5704_vm8 = vmand %vm5686_vm10, %vm5703_vm15 }
0x1ff4   :  { %v5010_v29 = vsel %vm5002_vm9, %v4992_v35, %v5006_v62  ;;  %7175 = vmatprep.subr.bf16.mxu1 %v8129_v44  ;;  %v7390_v62 = vpop.eup %7389 }
0x1ff5   :  { %6813 = vmatprep.mubr.msk.f32.mxu1 %vm493_vm3, %v5010_v29  ;;  %v7392_v29 = vpop.eup %7391 }
0x1ff6   :  { %6814 = vmatmul.mubr.msk.f32.gmra.mrb[66].mxu1 %vm493_vm3, %v5011_v59  ;;  %v1973_v59 = vmul.f32 %v7388_v37, %v8610_v30 }
0x1ff7   :  { %7177 = vmatpush3.bf16.msra.mxu1 %v8129_v44 }
0x1ff8   :  { %7179 = vmatprep.subr.bf16.mxu1 %v8138_v58  ;;  %vm5598_vm13 = vcmp.gt.f32.partialorder %v1973_v59, 0.0 }
0x1ffb   :  { %7181 = vmatpush3.bf16.msra.mxu1 %v8138_v58 }
0x1ffc   :  { %7183 = vmatprep.subr.bf16.mxu1 %v9138_v24 }
0x20c5   :  { %v6812_v31 = vpop.f32.mrb[64].mxu1 }
0x20c6   :  { %v5096_v5 = vadd.f32 %v7414_v60, %v6812_v31  ;;  %v5090_v46 = vpop.f32.mrb[65].mxu1  ;;  %v9140_v31 = vld [vmem:[#allocation23_spill] sm:$0xff] }
0x20c7   :  { %v5091_v38 = vadd.f32 %v7414_v60, %v5090_v46 }
0x20c8   :  { %v5110_v7 = vadd.f32 %v5096_v5, %v4900_v9  ;;  %v9141_v5 = vld [vmem:[#allocation24_spill] sm:$0xff] }
0x20c9   :  { %v5109_v48 = vadd.f32 %v5091_v38, %v4899_v14  ;;  %v6815_v36 = vpop.f32.mrb[66].mxu1  ;;  %v8949_v18 = vmul.f32 %v7392_v29, %v9141_v5  ;;  %v5635_v38 = vmax.f32 %v4496_v61, 1e-12 }
0x20ca   :  { %v5106_v57 = vadd.f32 %v7414_v60, %v6815_v36  ;;  %v5100_v51 = vpop.f32.mrb[67].mxu1 }
0x20cb   :  { %v5101_v8 = vadd.f32 %v7414_v60, %v5100_v51  ;;  %6824 = vmatprep.mubr.msk.f32.mxu0 %vm493_vm3, %v5109_v48  ;;  %v8946_v60 = vmul.f32 %v7390_v62, %v9140_v31  ;;  %v5587_v30 = vmax.f32 %v8949_v18, 1e-12  ;;  %v9144_v31 = vld [vmem:[#allocation31_spill] sm:$0xff]  ;;  %vm5599_vm14 = vcmp.gt.f32.partialorder %v8949_v18, 0.0 }
0x20cc   :  { %6825 = vmatmul.mubr.msk.f32.vlgmr.msra.gmra.mrb[60].mxu0 %vm493_vm3, %v5110_v7  ;;  %v5112_v58 = vadd.f32 %v5106_v57, %v4902_v11 }
0x20cd   :  { %v5111_v44 = vadd.f32 %v5101_v8, %v4901_v1  ;;  %v5567_v52 = vadd.f32 %v8946_v60, %v8949_v18  ;;  %vm5648_vm5 = vcmp.gt.f32.partialorder %v8946_v60, 0.0 }
0x20cf   :  { %6827 = vmatprep.mubr.msk.f32.mxu0 %vm493_vm3, %v5111_v44  ;;  %v5571_v46 = vmul.f32 0.5, %v5567_v52 }
0x20d0   :  { %6828 = vmatmul.mubr.msk.f32.gmra.mrb[62].mxu0 %vm493_vm3, %v5112_v58 }
0x20d1   :  { %v5575_v4 = vmax.f32 %v5571_v46, 1e-12 }
0x219f   :  { %v6826_v6 = vpop.f32.mrb[60].mxu0 }
0x21a0   :  { %v5197_v56 = vadd.f32 %v7415_v49, %v6826_v6  ;;  %v5191_v53 = vpop.f32.mrb[61].mxu0 }
0x21a1   :  { %v5192_v14 = vadd.f32 %v7415_v49, %v5191_v53 }
0x21a2   :  { %v5215_v47 = vmul.f32 0.1, %v5197_v56  ;;  %vm5211_vm6 = vcmp.ge.f32.partialorder %v5197_v56, 0.0 }
0x21a3   :  { %vm5210_vm12 = vcmp.ge.f32.partialorder %v5192_v14, 0.0  ;;  %v5214_v9 = vmul.f32 0.1, %v5192_v14  ;;  %v6829_v12 = vpop.f32.mrb[62].mxu0 }
0x21a4   :  { %v5207_v17 = vadd.f32 %v7415_v49, %v6829_v12  ;;  %v5201_v13 = vpop.f32.mrb[63].mxu0  ;;  %v5219_v1 = vsel %vm5211_vm6, %v5197_v56, %v5215_v47 }
0x21a5   :  { %v5202_v3 = vadd.f32 %v7415_v49, %v5201_v13  ;;  %v5218_v27 = vsel %vm5210_vm12, %v5192_v14, %v5214_v9  ;;  %v9142_v13 = vld [vmem:[#allocation30_spill] sm:$0xff] }
0x21a6   :  { %v5217_v11 = vmul.f32 0.1, %v5207_v17  ;;  %6842 = vmatprep.mubr.msk.f32.mxu1 %vm274_vm0, %v5218_v27  ;;  %vm5213_vm11 = vcmp.ge.f32.partialorder %v5207_v17, 0.0 }
0x21a7   :  { %vm5212_vm2 = vcmp.ge.f32.partialorder %v5202_v3, 0.0  ;;  %v5216_v0 = vmul.f32 0.1, %v5202_v3  ;;  %6843 = vmatmul.mubr.msk.f32.vlgmr.msra.gmra.mrb[68].mxu1 %vm274_vm0, %v5219_v1  ;;  %v9143_v1 = vld [vmem:[#allocation29_spill] sm:$0xff] }
0x21a8   :  { %7185 = vmatpush3.bf16.msra.mxu1 %v9138_v24  ;;  %v5221_v35 = vsel %vm5213_vm11, %v5207_v17, %v5217_v11  ;;  %v5566_v24 = vadd.f32 %v4496_v61, %v1973_v59 }
0x21a9   :  { %v5220_v54 = vsel %vm5212_vm2, %v5202_v3, %v5216_v0  ;;  %7187 = vmatprep.subr.bf16.mxu1 %v9139_v33 }
0x21aa   :  { %6845 = vmatprep.mubr.msk.f32.mxu1 %vm274_vm0, %v5220_v54  ;;  %v5570_v20 = vmul.f32 0.5, %v5566_v24 }
0x21ab   :  { %6846 = vmatmul.mubr.msk.f32.gmra.mrb[70].mxu1 %vm274_vm0, %v5221_v35 }
0x21ac   :  { %7189 = vmatpush3.bf16.msra.mxu1 %v9139_v33  ;;  %6856 = vmatprep.mubr.msk.f32.mxu1 %vm493_vm3, %v5109_v48  ;;  %v5574_v32 = vmax.f32 %v5570_v20, 1e-12  ;;  %v5586_v48 = vmax.f32 %v1973_v59, 1e-12 }
0x21ae   :  { %7393 = vlog2.f32 %v5574_v32 }
0x21af   :  { %6857 = vmatmul.mubr.msk.f32.vlgmr.msra.gmra.mrb[68].mxu1 %vm493_vm3, %v5110_v7  ;;  %7395 = vlog2.f32 %v5635_v38  ;;  %v5636_v7 = vmax.f32 %v8946_v60, 1e-12 }
0x21b0   :  { %6859 = vmatprep.mubr.msk.f32.mxu1 %vm493_vm3, %v5111_v44  ;;  %7397 = vlog2.f32 %v5586_v48 }
0x21b1   :  { %7399 = vlog2.f32 %v5575_v4 }
0x21b2   :  { %7401 = vlog2.f32 %v5587_v30 }
0x21b3   :  { %6860 = vmatmul.mubr.msk.f32.gmra.mrb[70].mxu1 %vm493_vm3, %v5112_v58  ;;  %7403 = vlog2.f32 %v5636_v7  ;;  %vm5647_vm3 = vcmp.gt.f32.partialorder %v4496_v61, 0.0 }
0x21b8   :  { %v7394_v36 = vpop.eup %7393 }
0x21b9   :  { %v7396_v57 = vpop.eup %7395  ;;  %v5581_v8 = vmul.f32 0.6931472, %v7394_v36  ;;  %v9145_v36 = vld [vmem:[#allocation32_spill] sm:$0xff] }
0x21ba   :  { %v7398_v51 = vpop.eup %7397  ;;  %v5642_v58 = vmul.f32 0.6931472, %v7396_v57 }
0x21bb   :  { %v7400_v44 = vpop.eup %7399  ;;  %v5593_v6 = vmul.f32 0.6931472, %v7398_v51 }
0x21bc   :  { %v7402_v49 = vpop.eup %7401  ;;  %v5651_v53 = vsub.f32 %v5642_v58, %v5581_v8  ;;  %v5583_v12 = vmul.f32 0.6931472, %v7400_v44 }
0x21bd   :  { %v5602_v9 = vsub.f32 %v5593_v6, %v5581_v8  ;;  %v5595_v27 = vmul.f32 0.6931472, %v7402_v49  ;;  %v7404_v24 = vpop.eup %7403 }
0x21be   :  { %v5655_v54 = vmul.f32 %v5651_v53, %v4496_v61  ;;  %v5644_v4 = vmul.f32 0.6931472, %v7404_v24  ;;  %v5553_v53 = vadd.f32 %v8861_v21, %v8863_v55 }
0x21bf   :  { %v5606_v37 = vmul.f32 %v5602_v9, %v1973_v59  ;;  %v5603_v62 = vsub.f32 %v5595_v27, %v5583_v12 }
0x21c0   :  { %v5659_v46 = vsel %vm5647_vm3, %v5655_v54, 0.0  ;;  %v5652_v61 = vsub.f32 %v5644_v4, %v5583_v12 }
0x21c1   :  { %v5610_v38 = vsel %vm5598_vm13, %v5606_v37, 0.0  ;;  %v5607_v48 = vmul.f32 %v5603_v62, %v8949_v18  ;;  %v5667_v57 = vsel %vm1931_vm4, %v5659_v46, 0.0 }
0x21c2   :  { %v5656_v58 = vmul.f32 %v5652_v61, %v8946_v60  ;;  %v2944_v60 = vadd.f32 %v8855_v28, %v8853_v45 }
0x21c3   :  { %v5611_v51 = vsel %vm5599_vm14, %v5607_v48, 0.0 }
0x21c4   :  { %v5621_v44 = vsel %vm1931_vm4, %v5611_v51, 0.0  ;;  %v5660_v49 = vsel %vm5648_vm5, %v5656_v58, 0.0 }
0x21c5   :  { %v5670_v18 = vsel %vm1931_vm4, %v5660_v49, 0.0 }
0x2282   :  { %v6858_v56 = vpop.f32.mrb[68].mxu1 }
0x2283   :  { %v7215_v14 = vadd.f32 %v8752_v10, %v6858_v56  ;;  %v5385_v47 = vpop.f32.mrb[69].mxu1  ;;  %v5504_v56 = vadd.f32 %v8857_v25, %v8859_v23 }
0x2284   :  { %v7217_v17 = vadd.f32 %v8752_v10, %v5385_v47  ;;  %v5554_v47 = vadd.f32 %v5553_v53, %v8868_v41  ;;  %v5624_v41 = vadd.f32 %v8884_v42, %v8893_v15 }
0x2285   :  { %v5409_v3 = vsub.f32 %v7215_v14, %v9142_v13  ;;  %v5505_v14 = vadd.f32 %v5504_v56, %v8870_v40 }
0x2286   :  { %v5408_v11 = vsub.f32 %v7217_v17, %v9143_v1  ;;  %v6861_v0 = vpop.f32.mrb[70].mxu1  ;;  %v5555_v12 = vadd.f32 %v5554_v47, %v8872_v19 }
0x2287   :  { %v5413_v33 = vmul.f32 %v5409_v3, %v5409_v3  ;;  %v7219_v35 = vadd.f32 %v8752_v10, %v6861_v0  ;;  %v5395_v16 = vpop.f32.mrb[71].mxu1  ;;  %v5506_v9 = vadd.f32 %v5505_v14, %v8886_v63  ;;  %v2945_v3 = vadd.f32 %v2944_v60, %v8866_v34 }
0x2288   :  { %v5412_v29 = vmul.f32 %v5408_v11, %v5408_v11  ;;  %v7221_v20 = vadd.f32 %v8752_v10, %v5395_v16  ;;  %v5618_v10 = vsel %vm1931_vm4, %v5610_v38, 0.0  ;;  %v5556_v25 = vrot.slane %v5555_v12, 4 }
0x2289   :  { %v5411_v5 = vsub.f32 %v7219_v35, %v9144_v31  ;;  %v5419_v52 = vsel %vm274_vm0, %v5413_v33, 0.0  ;;  %v5507_v17 = vrot.slane %v5506_v9, 4  ;;  %v2946_v23 = vadd.f32 %v2945_v3, %v8876_v50 }
0x228a   :  { %5420 = vadd.xlane.f32.xlu1 %v5419_v52  ;;  %v5416_v32 = vsel %vm274_vm0, %v5412_v29, 0.0  ;;  %v5410_v7 = vsub.f32 %v7221_v20, %v9145_v36  ;;  %v5557_v1 = vadd.f32 %v5556_v25, %v5555_v12  ;;  %v5673_v50 = vadd.f32 %v8891_v39, %v8895_v22 }
0x228b   :  { %5417 = vadd.xlane.f32.xlu0 %v5416_v32  ;;  %v5415_v30 = vmul.f32 %v5411_v5, %v5411_v5  ;;  %v5508_v21 = vadd.f32 %v5507_v17, %v5506_v9  ;;  %v2947_v63 = vrot.slane %v2946_v23, 4  ;;  %vm5699_vm4 = vcmp.eq.s32.totalorder %v7761_v43, 3 }
0x228c   :  { %v5414_v8 = vmul.f32 %v5410_v7, %v5410_v7  ;;  %v5558_v28 = vrot.slane %v5557_v1, 2  ;;  %vm5700_vm7 = vmand %vm5686_vm10, %vm5699_vm4 }
0x228d   :  { %v5425_v59 = vsel %vm274_vm0, %v5415_v30, 0.0  ;;  %v5509_v19 = vrot.slane %v5508_v21, 2  ;;  %v2948_v33 = vadd.f32 %v2947_v63, %v2946_v23 }
0x228e   :  { %5668 = vadd.xlane.f32.xlu1 %v5667_v57  ;;  %v5422_v6 = vsel %vm274_vm0, %v5414_v8, 0.0  ;;  %v5559_v29 = vadd.f32 %v5558_v28, %v5557_v1  ;;  %vm5695_vm0 = vcmp.eq.s32.totalorder %v7761_v43, 2 }
0x228f   :  { %5619 = vadd.xlane.f32.xlu0 %v5618_v10  ;;  %v5510_v35 = vadd.f32 %v5509_v19, %v5508_v21  ;;  %v2949_v31 = vrot.slane %v2948_v33, 2  ;;  %vm5696_vm1 = vmand %vm5686_vm10, %vm5695_vm0 }
0x2290   :  { %v5560_v38 = vrot.slane %v5559_v29, 1 }
0x2291   :  { %v5511_v5 = vrot.slane %v5510_v35, 1  ;;  %v2950_v48 = vadd.f32 %v2949_v31, %v2948_v33 }
0x2292   :  { %5426 = vadd.xlane.f32.xlu1 %v5425_v59  ;;  %v5561_v39 = vadd.f32 %v5560_v38, %v5559_v29 }
0x2293   :  { %5622 = vadd.xlane.f32.xlu0 %v5621_v44  ;;  %v5512_v36 = vadd.f32 %v5511_v5, %v5510_v35  ;;  %v2951_v22 = vrot.slane %v2950_v48, 1 }
0x2295   :  { %v5562_v8 = vadd.f32 %v5561_v39, %v5512_v36 }
0x2296   :  { %5423 = vadd.xlane.f32.xlu1 %v5422_v6  ;;  %v2952_v6 = vadd.f32 %v2951_v22, %v2950_v48 }
0x2297   :  { %v5563_v56 = vmul.f32 0.5, %v5562_v8 }
0x2299   :  { %v5701_v17 = vsel %vm5700_vm7, %v5563_v56, 0.0 }
0x229a   :  { %5671 = vadd.xlane.f32.xlu1 %v5670_v18 }
0x2317   :  { %v5421_v13 = vpop.xlane.xlu1 %5420 }
0x2318   :  { %v5418_v27 = vpop.xlane.xlu0 %5417 }
0x2319   :  { %v5428_v34 = vadd.f32 %v5421_v13, %v5418_v27 }
0x231b   :  { %v5669_v55 = vpop.xlane.xlu1 %5668 }
0x231c   :  { %v5620_v40 = vpop.xlane.xlu0 %5619  ;;  %v5674_v42 = vadd.f32 %v5673_v50, %v5669_v55 }
0x231d   :  { %v5625_v11 = vadd.f32 %v5624_v41, %v5620_v40 }
0x231f   :  { %v5427_v0 = vpop.xlane.xlu1 %5426 }
0x2320   :  { %v5623_v45 = vpop.xlane.xlu0 %5622 }
0x2321   :  { %v5626_v54 = vadd.f32 %v5625_v11, %v5623_v45 }
0x2323   :  { %v5627_v16 = vrot.slane %v5626_v54, 4  ;;  %v5424_v37 = vpop.xlane.xlu1 %5423 }
0x2324   :  { %v5429_v62 = vadd.f32 %v5428_v34, %v5424_v37 }
0x2325   :  { %v5628_v24 = vadd.f32 %v5627_v16, %v5626_v54 }
0x2326   :  { %v5430_v15 = vadd.f32 %v5429_v62, %v5427_v0 }
0x2327   :  { %v5672_v20 = vpop.xlane.xlu1 %5671  ;;  %v5629_v52 = vrot.slane %v5628_v24, 2 }
0x2328   :  { %v5431_v32 = vrot.slane %v5430_v15, 4  ;;  %v5675_v46 = vadd.f32 %v5674_v42, %v5672_v20 }
0x2329   :  { %v5630_v7 = vadd.f32 %v5629_v52, %v5628_v24 }
0x232a   :  { %v5432_v4 = vadd.f32 %v5431_v32, %v5430_v15  ;;  %v5676_v30 = vrot.slane %v5675_v46, 4 }
0x232b   :  { %v5631_v59 = vrot.slane %v5630_v7, 1 }
0x232c   :  { %v5433_v57 = vrot.slane %v5432_v4, 2  ;;  %v5677_v10 = vadd.f32 %v5676_v30, %v5675_v46 }
0x232d   :  { %v5632_v53 = vadd.f32 %v5631_v59, %v5630_v7 }
0x232e   :  { %v5434_v61 = vadd.f32 %v5433_v57, %v5432_v4  ;;  %v5678_v51 = vrot.slane %v5677_v10, 2 }
0x2330   :  { %v5435_v44 = vrot.slane %v5434_v61, 1  ;;  %v5679_v58 = vadd.f32 %v5678_v51, %v5677_v10 }
0x2332   :  { %v5436_v49 = vadd.f32 %v5435_v44, %v5434_v61  ;;  %v5680_v18 = vrot.slane %v5679_v58, 1 }
0x2334   :  { %v5443_v14 = vadd.f32 %v5436_v49, %v2952_v6  ;;  %v5681_v47 = vadd.f32 %v5680_v18, %v5679_v58 }
0x2336   :  { %v5697_v9 = vsel %vm5696_vm1, %v5443_v14, 0.0  ;;  %v5682_v12 = vadd.f32 %v5681_v47, %v5632_v53 }
0x2337   :  { %v5698_v60 = vadd.f32 %v5697_v9, %v8900_v2 }
0x2338   :  { %v5683_v13 = vmul.f32 0.5, %v5682_v12 }
0x2339   :  { %v5702_v3 = vadd.f32 %v5701_v17, %v5698_v60 }
0x233a   :  { %v5705_v43 = vsel %vm5704_vm8, %v5683_v13, 0.0 }
0x233b   :  { %v5706_v27 = vadd.f32 %v5705_v43, %v5702_v3 }
0x233d   :  { %5707 = vst [vmem:[%s5758_s17] sm:$0xff] %v5706_v27 }

</bundles_post_ra>
